<compile_context>
chip_gen: v5e
topology: v5e:2x2
jax: 0.10.0
libtpu: 0.0.40
codegen_flags: <defaults>
</compile_context>

<pallas_src>
import jax
import jax.numpy as jnp
from jax.experimental import pallas as pl
from jax.experimental.pallas import tpu as pltpu


def quaternion_weight(key, out_ch, in_ch):
    """Build the (out_ch, in_ch) 1x1 quaternion-conv weight (Hamilton block matrix)."""
    assert out_ch % 4 == 0 and in_ch % 4 == 0
    ko, ki = out_ch // 4, in_ch // 4
    kr, kim, kj, kk = jax.random.split(key, 4)
    # TODO(synk): real QuaternionConv uses quaternion-polar init; deterministic
    # scaled Gaussian is used here for this synthetic kernel.
    scale = 1.0 / jnp.sqrt(jnp.float32(in_ch))
    r = jax.random.normal(kr, (ko, ki), jnp.float32) * scale
    i = jax.random.normal(kim, (ko, ki), jnp.float32) * scale
    j = jax.random.normal(kj, (ko, ki), jnp.float32) * scale
    k = jax.random.normal(kk, (ko, ki), jnp.float32) * scale
    row_r = jnp.concatenate([r, -i, -j, -k], axis=1)
    row_i = jnp.concatenate([i, r, -k, j], axis=1)
    row_j = jnp.concatenate([j, k, r, -i], axis=1)
    row_k = jnp.concatenate([k, -j, i, r], axis=1)
    return jnp.concatenate([row_r, row_i, row_j, row_k], axis=0)  # (out_ch, in_ch)


def _qself_attn_kernel(x_ref, kT_ref, wag_ref, o_ref):
    # x_ref   : (1, C, tN)  f32   current spatial tile (flat H*W order)
    # kT_ref  : (1, M, C)   bf16  fused key  (phi_pooled^T @ w_theta), per batch
    # wag_ref : (1, C, M)   bf16  sigma * (w_attn @ g_pooled),          per batch
    x = x_ref[0]                                  # (C, tN) f32
    xb = x.astype(jnp.bfloat16)

    # logits^T (M, tN) = kT (M, C) @ x (C, tN): canonical MXU orientation,
    # contraction depth C; lane axis = tN (dense).
    logits_t = jnp.dot(kT_ref[0], xb, preferred_element_type=jnp.float32)

    # Softmax stats over M (sublane axis); normalization is applied AFTER the
    # value matmul (scale factors out of the contraction over M).
    m = jnp.max(logits_t, axis=0, keepdims=True)            # (1, tN)
    e = jnp.exp(logits_t - m)                                # (M, tN) f32
    denom = jnp.sum(e, axis=0, keepdims=True)                # (1, tN)

    # out_attn (C, tN) = wag (C, M) @ e (M, tN); wag already carries w_attn and
    # sigma, so the only remaining elementwise work is the (C, tN) scale + add.
    out_attn = jnp.dot(wag_ref[0], e.astype(jnp.bfloat16),
                       preferred_element_type=jnp.float32)   # (C, tN)

    inv_denom = pl.reciprocal(denom, approx=True)            # (1, tN), EUP
    o_ref[0] = (x + out_attn * inv_denom).astype(o_ref.dtype)


def _pick_tile_n(N, M, C):
    """Largest tile (preferring 256-aligned for v6e/v7x 256-lane MXUs, up to 1024)
    whose real per-step live set fits the per-generation VMEM budget."""
    try:
        vmem_cap = int(getattr(pltpu.get_tpu_info(), "vmem_capacity_bytes",
                               64 * 1024 * 1024))
    except Exception:  # pragma: no cover - conservative fallback
        vmem_cap = 64 * 1024 * 1024
    budget = min(vmem_cap // 2, 48 * 1024 * 1024)

    def live_bytes(t):
        temps = (2 * M * t + C * t) * 4          # logits_t + e (f32) + out_attn (f32)
        io = 2 * 2 * C * t * 4                   # double-buffered x and out blocks
        wts = 2 * 2 * (M * C) * 2                # double-buffered kT + wag (bf16)
        return temps + io + wts

    candidates = []
    for step in (256, 128):
        t = (min(N, 1024) // step) * step
        while t >= step:
            if N % t == 0 and live_bytes(t) <= budget:
                candidates.append(t)
                break
            t -= step
    tile = max(candidates) if candidates else 128
    assert N % tile == 0 and tile % 128 == 0
    return tile, budget


def _precompute_kT_wag(x, w_theta, w_phi, w_g, w_attn, sigma):
    """Per-batch precompute in plain XLA (tiny vs. the O(N*M*C) attention):
    conv -> 2x2 stride-2 max-pool for phi/g, then fold theta / w_attn / sigma."""
    B, C, H, W = x.shape
    M = (H * W) // 4

    def conv_pool(w):
        y = jnp.einsum("oc,bchw->bohw", w, x)                       # (B, Co, H, W)
        y = y.reshape(B, -1, H // 2, 2, W // 2, 2).max(axis=(3, 5))  # (B, Co, H/2, W/2)
        return y.reshape(B, -1, M)

    phi = conv_pool(w_phi)                                           # (B, C//8, M)
    g = conv_pool(w_g)                                               # (B, C//2, M)
    # logits = theta^T @ phi = x^T @ (w_theta^T @ phi)  ->  kT = phi^T @ w_theta
    kT = jnp.einsum("bom,oc->bmc", phi, w_theta)                     # (B, M, C)
    # Fold w_attn and sigma into the value weight once per batch.
    wag = sigma.reshape(1, 1, 1) * jnp.einsum("oc,bcm->bom", w_attn, g)  # (B, C, M)
    return kT.astype(jnp.bfloat16), wag.astype(jnp.bfloat16)


def qself_attn_pallas(x, w_theta, w_phi, w_g, w_attn, sigma, *, tile_n=None):
    B, C, H, W = x.shape
    assert C % 32 == 0, "quaternion convs need C, C//8, C//2 divisible by 4"
    assert H % 2 == 0 and W % 2 == 0
    N = H * W
    M = N // 4
    assert N % 128 == 0, "flattened spatial size must be a multiple of 128"
    assert M % 128 == 0, "M = H*W/4 must be a multiple of 128 for lane-dense layout"

    if tile_n is None:
        tile_n, budget = _pick_tile_n(N, M, C)
    else:
        _, budget = _pick_tile_n(N, M, C)
    assert N % tile_n == 0 and tile_n % 128 == 0

    x_flat = x.reshape(B, C, N)
    kT, wag = _precompute_kT_wag(x, w_theta, w_phi, w_g, w_attn, sigma)

    out_flat = pl.pallas_call(
        _qself_attn_kernel,
        out_shape=jax.ShapeDtypeStruct((B, C, N), x.dtype),
        grid_spec=pltpu.PrefetchScalarGridSpec(
            num_scalar_prefetch=0,
            grid=(B, N // tile_n),
            in_specs=[
                pl.BlockSpec((1, C, tile_n), lambda b, n: (b, 0, n)),
                # Grid-invariant along n -> DMA'd once per batch.
                pl.BlockSpec((1, M, C), lambda b, n: (b, 0, 0)),
                pl.BlockSpec((1, C, M), lambda b, n: (b, 0, 0)),
            ],
            out_specs=pl.BlockSpec((1, C, tile_n), lambda b, n: (b, 0, n)),
        ),
        compiler_params=pltpu.CompilerParams(
            # No per-batch scratch fill anymore -> both axes are independent and
            # can shard across v7x's two TensorCores.
            dimension_semantics=("parallel", "parallel"),
            vmem_limit_bytes=int(budget),
        ),
    )(x_flat, kT, wag)

    return out_flat.reshape(B, C, H, W)


def qself_attn_reference(x, w_theta, w_phi, w_g, w_attn, sigma):
    """Pure-JAX f32 reference mirroring the PyTorch forward (NCHW)."""
    B, C, H, W = x.shape
    N, M = H * W, (H * W) // 4
    xf = x.reshape(B, C, N)

    def pool(y):  # y: (B, c, H, W) -> (B, c, M)
        c = y.shape[1]
        return y.reshape(B, c, H // 2, 2, W // 2, 2).max(axis=(3, 5)).reshape(B, c, M)

    theta = jnp.einsum("oc,bcn->bon", w_theta, xf)                    # (B, C//8, N)
    phi = pool(jnp.einsum("oc,bchw->bohw", w_phi, x))                  # (B, C//8, M)
    attn = jax.nn.softmax(jnp.einsum("bon,bom->bnm", theta, phi), -1)  # (B, N, M)
    g = pool(jnp.einsum("oc,bchw->bohw", w_g, x))                      # (B, C//2, M)
    attn_g = jnp.einsum("bcm,bnm->bcn", g, attn)                       # (B, C//2, N)
    out_attn = jnp.einsum("oc,bcn->bon", w_attn, attn_g)               # (B, C, N)
    return x + sigma.reshape(1, 1, 1, 1) * out_attn.reshape(B, C, H, W)


if __name__ == "__main__":
    key = jax.random.PRNGKey(0)
    # Quaternion convs require C, C//8, C//2 all divisible by 4 -> C % 32 == 0.
    # 32x32 spatial keeps N = 1024, M = 256 lane-dense (multiples of 128).
    B, C, H, W = 2, 32, 32, 32
    kx, k1, k2, k3, k4 = jax.random.split(key, 5)

    x = jax.random.normal(kx, (B, C, H, W), jnp.float32)
    w_theta = quaternion_weight(k1, C // 8, C)     # (4, 32)
    w_phi = quaternion_weight(k2, C // 8, C)       # (4, 32)
    w_g = quaternion_weight(k3, C // 2, C)         # (16, 32)
    w_attn = quaternion_weight(k4, C, C // 2)      # (32, 16)
    # PyTorch initializes sigma to 0 (which makes out == x); use a nonzero
    # deterministic value so the attention path is actually exercised.
    sigma = jnp.array([0.5], jnp.float32)

    out = qself_attn_pallas(x, w_theta, w_phi, w_g, w_attn, sigma)
    out = jax.block_until_ready(out)

    ref = qself_attn_reference(x, w_theta, w_phi, w_g, w_attn, sigma)
    max_err = float(jnp.max(jnp.abs(out - ref)))
    rel_err = float(jnp.linalg.norm((out - ref).ravel())
                    / jnp.linalg.norm(ref.ravel()))
    # bf16 MXU operands + approx reciprocal -> looser tolerance than pure f32.
    assert max_err < 0.2 and rel_err < 0.05, f"max_err={max_err} rel_err={rel_err}"
    print("KERNEL_OK")
</pallas_src>

<mosaic_0001>
module attributes {stable_mosaic.version = 11 : i64} {
  func.func @_qself_attn_kernel(%arg0: i32, %arg1: i32, %arg2: memref<1x32x1024xf32, #tpu.memory_space<vmem>>, %arg3: memref<1x256x32xbf16, #tpu.memory_space<vmem>>, %arg4: memref<1x32x256xbf16, #tpu.memory_space<vmem>>, %arg5: memref<1x32x1024xf32, #tpu.memory_space<vmem>>) attributes {dimension_semantics = [#tpu.dimension_semantics<parallel>, #tpu.dimension_semantics<parallel>], iteration_bounds = array<i64: 2, 1>, scalar_prefetch = 0 : i64, scratch_operands = 0 : i64, tpu.core_type = #tpu.core_type<tc>, window_params = [{transform_indices = @transform_0, window_bounds = array<i64: 1, 32, 1024>}, {transform_indices = @transform_1, window_bounds = array<i64: 1, 256, 32>}, {transform_indices = @transform_2, window_bounds = array<i64: 1, 32, 256>}, {transform_indices = @transform_3, window_bounds = array<i64: 1, 32, 1024>}]} {
    %c0 = arith.constant 0 : index
    %c0_0 = arith.constant 0 : index
    %c0_1 = arith.constant 0 : index
    %0 = vector.load %arg2[%c0, %c0_0, %c0_1] : memref<1x32x1024xf32, #tpu.memory_space<vmem>>, vector<1x32x1024xf32>
    %1 = vector.shape_cast %0 : vector<1x32x1024xf32> to vector<32x1024xf32>
    %2 = arith.truncf %1 : vector<32x1024xf32> to vector<32x1024xbf16>
    %c0_2 = arith.constant 0 : index
    %c0_3 = arith.constant 0 : index
    %c0_4 = arith.constant 0 : index
    %3 = vector.load %arg3[%c0_2, %c0_3, %c0_4] : memref<1x256x32xbf16, #tpu.memory_space<vmem>>, vector<1x256x32xbf16>
    %4 = vector.shape_cast %3 : vector<1x256x32xbf16> to vector<256x32xbf16>
    %cst = arith.constant dense<0.000000e+00> : vector<256x1024xf32>
    %5 = tpu.matmul %4, %2, %cst {dimension_numbers = #tpu.dot_dimension_numbers<[1], [0], [0], [1], [0, 0, 1, 1], [], []>} : vector<256x32xbf16>, vector<32x1024xbf16>, vector<256x1024xf32> -> vector<256x1024xf32>
    %cst_5 = arith.constant dense<0xFF800000> : vector<1024xf32>
    %6 = vector.multi_reduction <maximumf>, %5, %cst_5 [0] : vector<256x1024xf32> to vector<1024xf32>
    %7 = vector.shape_cast %6 : vector<1024xf32> to vector<1x1024xf32>
    %8 = vector.broadcast %7 : vector<1x1024xf32> to vector<256x1024xf32>
    %9 = arith.subf %5, %8 : vector<256x1024xf32>
    %10 = math.exp %9 : vector<256x1024xf32>
    %cst_6 = arith.constant dense<0.000000e+00> : vector<1024xf32>
    %11 = vector.multi_reduction <add>, %10, %cst_6 [0] : vector<256x1024xf32> to vector<1024xf32>
    %12 = vector.shape_cast %11 : vector<1024xf32> to vector<1x1024xf32>
    %c0_7 = arith.constant 0 : index
    %c0_8 = arith.constant 0 : index
    %c0_9 = arith.constant 0 : index
    %13 = vector.load %arg4[%c0_7, %c0_8, %c0_9] : memref<1x32x256xbf16, #tpu.memory_space<vmem>>, vector<1x32x256xbf16>
    %14 = vector.shape_cast %13 : vector<1x32x256xbf16> to vector<32x256xbf16>
    %15 = arith.truncf %10 : vector<256x1024xf32> to vector<256x1024xbf16>
    %cst_10 = arith.constant dense<0.000000e+00> : vector<32x1024xf32>
    %16 = tpu.matmul %14, %15, %cst_10 {dimension_numbers = #tpu.dot_dimension_numbers<[1], [0], [0], [1], [0, 0, 1, 1], [], []>} : vector<32x256xbf16>, vector<256x1024xbf16>, vector<32x1024xf32> -> vector<32x1024xf32>
    %17 = tpu.reciprocal %12 {approx = true} : vector<1x1024xf32> -> vector<1x1024xf32>
    %18 = vector.broadcast %17 : vector<1x1024xf32> to vector<32x1024xf32>
    %19 = arith.mulf %16, %18 : vector<32x1024xf32>
    %20 = arith.addf %1, %19 : vector<32x1024xf32>
    %c0_11 = arith.constant 0 : index
    %c0_12 = arith.constant 0 : index
    %c0_13 = arith.constant 0 : index
    %21 = vector.load %arg5[%c0_11, %c0_12, %c0_13] : memref<1x32x1024xf32, #tpu.memory_space<vmem>>, vector<1x32x1024xf32>
    %22 = vector.shape_cast %21 : vector<1x32x1024xf32> to vector<32x1024xf32>
    %23 = vector.shape_cast %20 : vector<32x1024xf32> to vector<1x32x1024xf32>
    tpu.vector_store %arg5[%c0_11, %c0_12, %c0_13], %23 {strides = array<i32>} : memref<1x32x1024xf32, #tpu.memory_space<vmem>>, vector<1x32x1024xf32>,
    return
  }
  func.func @transform_0(%arg0: i32, %arg1: i32) -> (i32, i32, i32) {
    %c0_i32 = arith.constant 0 : i32
    %c0_i32_0 = arith.constant 0 : i32
    return %arg0, %c0_i32, %arg1 : i32, i32, i32
  }
  func.func @transform_1(%arg0: i32, %arg1: i32) -> (i32, i32, i32) {
    %c0_i32 = arith.constant 0 : i32
    %c0_i32_0 = arith.constant 0 : i32
    %c0_i32_1 = arith.constant 0 : i32
    return %arg0, %c0_i32, %c0_i32_0 : i32, i32, i32
  }
  func.func @transform_2(%arg0: i32, %arg1: i32) -> (i32, i32, i32) {
    %c0_i32 = arith.constant 0 : i32
    %c0_i32_0 = arith.constant 0 : i32
    %c0_i32_1 = arith.constant 0 : i32
    return %arg0, %c0_i32, %c0_i32_0 : i32, i32, i32
  }
  func.func @transform_3(%arg0: i32, %arg1: i32) -> (i32, i32, i32) {
    %c0_i32 = arith.constant 0 : i32
    %c0_i32_0 = arith.constant 0 : i32
    return %arg0, %c0_i32, %arg1 : i32, i32, i32
  }
}

</mosaic_0001>

<bundles_post_ra>
// kernel: tpu_custom_call.1
= control target key start
LH: loop header
LB: loop body
LE: loop exit
PB: predicated region body
PF: predicated region fallthrough
CT: control target
= control target key end

     0   :  { %8 = vsyncpa [#allocation3], 0  ;;  %s7343_s0 = inlined_call_operand.hbm [shape: f32[2,32,1024], index: 0, kind: input, shape index: {}]   ;;  %s7344_s1 = inlined_call_operand.vmem [shape: bf16[2,256,32], index: 1, kind: input, shape index: {}]   ;;  %s7345_s2 = inlined_call_operand.vmem [shape: bf16[2,32,256], index: 2, kind: input, shape index: {}]   ;;  %s7346_s3 = inlined_call_operand.hbm [shape: f32[2,32,1024], index: 3, kind: output, shape index: {}]  }
   0x1   :  { %10 = vsyncpa [#allocation3 + $0x1], 0 }
   0x2   :  { %11 = vsyncpa [#allocation4], 0 }
   0x3   :  { %13 = vsyncpa [#allocation4 + $0x1], 0  ;;  %s4241_s12 = smov 0   ;;  %s4243_s13 = smov 0  }
   0x4   :  { %s4245_s14 = smov 0   ;;  %s4247_s15 = smov 0  }
   0x5   :  { %s4249_s16 = smov 0   ;;  %s4251_s17 = smov 0  }
   0x6 LB: > { %s3222_s18 = sadd.s32 4294967295, %s4215_s17   ;;  %s3223_s19 = sadd.s32 4294967294, %s4215_s17   ;;  %s4215_s17 = sphi %s4251_s17, %s19_s17   ;;  %s4211_s16 = sphi %s4249_s16, %s8473_s16   ;;  %s4207_s15 = sphi %s4247_s15, %s8472_s15   ;;  %s4203_s14 = sphi %s4245_s14, %s8471_s14   ;;  %s4199_s13 = sphi %s4243_s13, %s8470_s13   ;;  %s4195_s12 = sphi %s4241_s12, %s8469_s12  }
   0x7   : > { %s31_s20 = sadd.s32 1, %s4211_s16  ;;  %s40_s21 = sadd.s32 1, %s4203_s14 }
   0x8   : > { %p33_p0 = scmp.ge.s32.totalorder %s31_s20, 2  ;;  %p47_p1 = scmp.ne.s32.totalorder %s4203_s14, %s4199_s13 }
   0x9   : > { %p48_p2 = scmp.eq.s32.totalorder %s4215_s17, 0  ;;  %p53_p3 = scmp.ne.s32.totalorder %s4199_s13, %s4195_s12 }
   0xa   : > { %s8475_s20 = smov (%p33_p0, %s31_s20), 0  ;;  %p54_p5 = scmp.eq.s32.totalorder %s3222_s18, 0 }
   0xb   : > { %p4282_p4 = por %p48_p2, %p47_p1  ;;  %s35_s23 = ssub.s32 %s4211_s16, %s8475_s20 }
   0xc   : > { %p131_p6 = scmp.eq.s32.totalorder %s3222_s18, 1  ;;  %p38_p7 = scmp.eq.s32.totalorder %s35_s23, 0 }
   0xd   : > { %p4288_p8 = por %p54_p5, %p53_p3  ;;  %p137_p10 = scmp.eq.s32.totalorder %s3223_s19, 1 }
   0xe   : > { %p4292_p9 = por %p131_p6, %p47_p1  ;;  %p3225_p12 = scmp.ge.s32.totalorder %s4215_s17, 2 }
   0xf   : > { %s4297_s26 = scalar_select %p38_p7, %s4203_s14, %s40_s21  }
  0x10   : > { %p4299_p11 = por %p137_p10, %p53_p3  ;;  %p3485_p13 = scmp.lt.s32.totalorder %s4215_s17, 2 }
  0x11   : > { %s157_s28 = sand.u32 1, %s4203_s14   ;;  %s3449_s30 = sshll.u32 %s4211_s16, 8 }
  0x12   : > { %s3226_s29 = sshll.u32 %s157_s28, 8  ;;  %s168_s6 = scalar_lea.hbm %s7343_s0, %s3449_s30 }
  0x13   : > { %s161_s7 = scalar_lea.vmem [#allocation2], %s3226_s29  ;;  %s169_s9 = sshll.u32 %s168_s6, 4  ;;  %s170_s9 = int_to_ptr.hbm [resolvable:$true] %s169_s9 }
  0x14   : > { %s171_s8 = sshll.u32 %s161_s7, 4  ;;  %p3478_p0 = pnand %p3485_p13, %p4282_p4  ;;  %s172_s8 = int_to_ptr.vmem [resolvable:$true] %s171_s8 }
  0x15   : > { %p3229_p1 = scmp.ge.s32.totalorder %s4215_s17, 1  ;;  %s158_s10 = scalar_lea.sflag [#allocation3], %s157_s28 }
  0x16   : > { %s4217_s11 = smov 1024   ;;  %s4218_s18 = smov 64  }
  0x17   : > { %3480 = dma.hbm_to_vmem [thread:$0]  (!%p3478_p0), %s170_s9, 4096, %s172_s8, %s158_s10, %s4217_s11, %s4217_s11, %s4218_s18  }
  0x18   : > { %p195_p2 = scmp.lt.s32.totalorder %s4215_s17, 3 }
  0x1a   : > { %p196_p3 = pnand %p3229_p1, %p195_p2 }
  0x1c   : > { %199 = sbr.rel (%p196_p3) target bundleno = 1164 (0x48c), region = 32 }
  0x21   : > { %s4315_s19 = sand.u32 1, %s4199_s13  }
  0x22   : > { %s3230_s21 = sshll.u32 %s4315_s19, 8  ;;  %s202_s23 = scalar_lea.sflag [#allocation3], %s4315_s19 }
  0x23   : > { %s4321_s22 = scalar_lea.vmem [#allocation2], %s3230_s21 }
  0x24   : > { %4186 = dma.done.wait (%p4288_p8), %s202_s23, 4096  }
  0x25   : > { %4188 = vsyncadd (%p4288_p8), %s202_s23, 4294963200  ;;  %p240_p4 = scmp.lt.s32.totalorder %s4207_s15, 1  ;;  %v268_v0 = vld [vmem:[%s4321_s22 + $0x80] sm:$0xff]  ;;  %v269_v2 = vld [vmem:[%s4321_s22 + $0x88] sm:$0xff]  ;;  %vm412_vm0 = vcmask 261120   ;;  %s6884_s9 = scalar_lea.vmem [#allocation5], %s3230_s21 }
  0x26   : > { %v276_v1 = vld [vmem:[%s4321_s22 + $0xc0] sm:$0xff]  ;;  %v277_v4 = vld [vmem:[%s4321_s22 + $0xc8] sm:$0xff]  ;;  %v270_v5 = vld [vmem:[%s4321_s22 + $0x90] sm:$0xff]  ;;  %s3472_s10 = sshll.u32 %s4207_s15, 8  ;;  %s3108_s23 = sshll.u32 %s6884_s9, 4  ;;  %s3109_s23 = int_to_ptr.vmem [resolvable:$true] %s3108_s23 }
  0x27   : > { %s4329_s28 = scalar_select %p240_p4, %s4207_s15, 1  ;;  %v292_v3 = vpack.c.bf16 %v276_v1, %v268_v0  ;;  %v278_v6 = vld [vmem:[%s4321_s22 + $0xd0] sm:$0xff]  ;;  %v293_v7 = vpack.c.bf16 %v277_v4, %v269_v2  ;;  %v271_v9 = vld [vmem:[%s4321_s22 + $0x98] sm:$0xff]  ;;  %v252_v11 = vld [vmem:[%s4321_s22] sm:$0xff] }
  0x28   : > { %v294_v8 = vpack.c.bf16 %v278_v6, %v270_v5  ;;  %v279_v10 = vld [vmem:[%s4321_s22 + $0xd8] sm:$0xff]  ;;  %v260_v13 = vld [vmem:[%s4321_s22 + $0x40] sm:$0xff]  ;;  %v253_v14 = vld [vmem:[%s4321_s22 + $0x8] sm:$0xff]  ;;  %s3107_s21 = scalar_lea.hbm %s7346_s3, %s3472_s10 }
  0x29   : > { %s3450_s24 = sshll.u32 %s4329_s28, 7  ;;  %467 = vmatpush.bf16.msra.mxu0 %v292_v3  ;;  %v295_v12 = vpack.c.bf16 %v279_v10, %v271_v9  ;;  %v261_v15 = vld [vmem:[%s4321_s22 + $0x48] sm:$0xff]  ;;  %556 = vmatpush.bf16.msra.mxu1 %v293_v7  ;;  %v284_v16 = vpack.c.bf16 %v260_v13, %v252_v11  ;;  %v254_v18 = vld [vmem:[%s4321_s22 + $0x10] sm:$0xff]  ;;  %v255_v20 = vld [vmem:[%s4321_s22 + $0x18] sm:$0xff]  ;;  %s3451_s5 = sshll.u32 %s4329_s28, 5 }
  0x2a   : > { %s4347_s4 = scalar_lea.vmem %s7344_s1, %s3450_s24  ;;  %645 = vmatpush.bf16.msra.mxu2 %v294_v8  ;;  %v285_v17 = vpack.c.bf16 %v261_v15, %v253_v14  ;;  %v262_v19 = vld [vmem:[%s4321_s22 + $0x50] sm:$0xff]  ;;  %v263_v22 = vld [vmem:[%s4321_s22 + $0x58] sm:$0xff]  ;;  %v273_v25 = vld [vmem:[%s4321_s22 + $0xa8] sm:$0xff]  ;;  %s249_s8 = scalar_lea.vmem %s7345_s2, %s3451_s5 }
  0x2b   : > { %734 = vmatpush.bf16.msra.mxu3 %v295_v12  ;;  %v286_v21 = vpack.c.bf16 %v262_v19, %v254_v18  ;;  %v287_v23 = vpack.c.bf16 %v263_v22, %v255_v20  ;;  %v4354_v24 = vld [vmem:[%s4347_s4] sm:$0xff]  ;;  %v281_v26 = vld [vmem:[%s4321_s22 + $0xe8] sm:$0xff]  ;;  %v275_v32 = vld [vmem:[%s4321_s22 + $0xb8] sm:$0xff]  ;;  %s3110_s15 = sshll.u32 %s3107_s21, 4  ;;  %s3094_s28 = scalar_lea.sflag [#allocation4], %s4315_s19  ;;  %s3111_s15 = int_to_ptr.hbm [resolvable:$true] %s3110_s15 }
  0x2c   : > { %v272_v27 = vld [vmem:[%s4321_s22 + $0xa0] sm:$0xff]  ;;  %v297_v28 = vpack.c.bf16 %v281_v26, %v273_v25  ;;  %v4369_v31 = vld [vmem:[%s4347_s4 + $0x8] sm:$0xff]  ;;  %v283_v33 = vld [vmem:[%s4321_s22 + $0xf8] sm:$0xff]  ;;  %s4147_s24 = sshra.s32 %s3111_s15, 4  ;;  %s4153_s5 = scalar_lea.hbm %s7346_s3, 512  ;;  %s4148_s24 = int_to_ptr.hbm [resolvable:$true] %s4147_s24 }
  0x2d   : > { %468 = vmatpush.bf16.msra.mxu0 %v284_v16  ;;  %557 = vmatpush.bf16.msra.mxu1 %v285_v17  ;;  %v280_v29 = vld [vmem:[%s4321_s22 + $0xe0] sm:$0xff]  ;;  %v299_v34 = vpack.c.bf16 %v283_v33, %v275_v32  ;;  %v4382_v35 = vld [vmem:[%s4347_s4 + $0x10] sm:$0xff]  ;;  %v4395_v39 = vld [vmem:[%s4347_s4 + $0x18] sm:$0xff]  ;;  %s4149_s29 = scalar_lea.hbm %s4148_s24, 256  ;;  %p4154_p8 = scmp.lt.s32.totalorder %s4148_s24, %s7346_s3 }
  0x2e   : > { %646 = vmatpush.bf16.msra.mxu2 %v286_v21  ;;  %v296_v30 = vpack.c.bf16 %v280_v29, %v272_v27  ;;  %v274_v36 = vld [vmem:[%s4321_s22 + $0xb0] sm:$0xff]  ;;  %v4406_v40 = vld [vmem:[%s4347_s4 + $0x20] sm:$0xff]  ;;  %v4417_v41 = vld [vmem:[%s4347_s4 + $0x28] sm:$0xff]  ;;  %p4150_p5 = scmp.ne.s32.totalorder %s4148_s24, %s4149_s29  ;;  %p4155_p10 = scmp.lt.s32.totalorder %s4153_s5, %s4149_s29 }
  0x2f   : > { %735 = vmatpush.bf16.msra.mxu3 %v287_v23  ;;  %v282_v37 = vld [vmem:[%s4321_s22 + $0xf0] sm:$0xff]  ;;  %v4439_v43 = vld [vmem:[%s4347_s4 + $0x38] sm:$0xff]  ;;  %v4450_v44 = vld [vmem:[%s4347_s4 + $0x40] sm:$0xff] }
  0x30   : > { %3300 = vmatmul.msk.bf16.vlgmr.msra.gmra.mxu0 %vm412_vm0, %v4354_v24  ;;  %3316 = vmatmul.msk.bf16.vlgmr.msra.gmra.mxu1 %vm412_vm0, %v4354_v24  ;;  %v298_v38 = vpack.c.bf16 %v282_v37, %v274_v36  ;;  %v4428_v42 = vld [vmem:[%s4347_s4 + $0x30] sm:$0xff]  ;;  %7694 = vst [vmem:[#allocation8_spill] sm:$0xff] %v4450_v44  ;;  %v257_v47 = vld [vmem:[%s4321_s22 + $0x28] sm:$0xff]  ;;  %v256_v54 = vld [vmem:[%s4321_s22 + $0x20] sm:$0xff]  ;;  %p4151_p6 = pnand %p4150_p5, %p4292_p9  ;;  %p4156_p13 = por %p4155_p10, %p4154_p8 }
  0x31   : > { %3332 = vmatmul.msk.bf16.vlgmr.msra.gmra.mxu2 %vm412_vm0, %v4354_v24  ;;  %912 = vmatpush.bf16.msrb.mxu1 %v297_v28  ;;  %v265_v48 = vld [vmem:[%s4321_s22 + $0x68] sm:$0xff]  ;;  %v264_v55 = vld [vmem:[%s4321_s22 + $0x60] sm:$0xff]  ;;  %v4506_v3 = vld [vmem:[%s4347_s4 + $0x50] sm:$0xff] }
  0x32   : > { %3348 = vmatmul.msk.bf16.vlgmr.msra.gmra.mxu3 %vm412_vm0, %v4354_v24  ;;  %823 = vmatpush.bf16.msrb.mxu0 %v296_v30  ;;  %v289_v49 = vpack.c.bf16 %v265_v48, %v257_v47  ;;  %v288_v56 = vpack.c.bf16 %v264_v55, %v256_v54  ;;  %v4479_v58 = vld [vmem:[%s4347_s4 + $0x48] sm:$0xff]  ;;  %7707 = vst [vmem:[#allocation21_spill] sm:$0xff] %v4506_v3  ;;  %v259_v7 = vld [vmem:[%s4321_s22 + $0x38] sm:$0xff]  ;;  %v258_v10 = vld [vmem:[%s4321_s22 + $0x30] sm:$0xff]  ;;  %p4152_p7 = pneg %p4151_p6 }
  0x33   : > { %1090 = vmatpush.bf16.msrb.mxu3 %v299_v34  ;;  %1001 = vmatpush.bf16.msrb.mxu2 %v298_v38  ;;  %7702 = vst [vmem:[#allocation16_spill] sm:$0xff] %v4479_v58  ;;  %v267_v8 = vld [vmem:[%s4321_s22 + $0x78] sm:$0xff]  ;;  %v266_v11 = vld [vmem:[%s4321_s22 + $0x70] sm:$0xff]  ;;  %v3464_v27 = vld [vmem:[%s4347_s4 + $0x60] sm:$0xff] }
  0x34   : > { %v291_v9 = vpack.c.bf16 %v267_v8, %v259_v7  ;;  %v290_v12 = vpack.c.bf16 %v266_v11, %v258_v10  ;;  %v4535_v17 = vld [vmem:[%s4347_s4 + $0x58] sm:$0xff]  ;;  %v3465_v37 = vld [vmem:[%s4347_s4 + $0x68] sm:$0xff]  ;;  %v3466_v7 = vld [vmem:[%s4347_s4 + $0x70] sm:$0xff]  ;;  %p4157_p0 = pnand %p4156_p13, %p4152_p7 }
  0x35   : > { %913 = vmatpush.bf16.msrb.mxu1 %v289_v49  ;;  %7711 = vst [vmem:[#allocation25_spill] sm:$0xff] %v4535_v17 }
  0x36   : > { %824 = vmatpush.bf16.msrb.mxu0 %v288_v56 }
  0x37   : > { %1091 = vmatpush.bf16.msrb.mxu3 %v291_v9  ;;  %1002 = vmatpush.bf16.msrb.mxu2 %v290_v12 }
  0x40   : > { %3301 = vmatmul.msk.bf16.gmra.mxu0 %vm412_vm0, %v4369_v31  ;;  %3317 = vmatmul.msk.bf16.gmra.mxu1 %vm412_vm0, %v4369_v31 }
  0x41   : > { %3333 = vmatmul.msk.bf16.gmra.mxu2 %vm412_vm0, %v4369_v31 }
  0x42   : > { %3349 = vmatmul.msk.bf16.gmra.mxu3 %vm412_vm0, %v4369_v31 }
  0x50   : > { %3302 = vmatmul.msk.bf16.gmra.mxu0 %vm412_vm0, %v4382_v35  ;;  %3318 = vmatmul.msk.bf16.gmra.mxu1 %vm412_vm0, %v4382_v35 }
  0x51   : > { %3334 = vmatmul.msk.bf16.gmra.mxu2 %vm412_vm0, %v4382_v35 }
  0x52   : > { %3350 = vmatmul.msk.bf16.gmra.mxu3 %vm412_vm0, %v4382_v35 }
  0x60   : > { %3303 = vmatmul.msk.bf16.gmra.mxu0 %vm412_vm0, %v4395_v39  ;;  %3319 = vmatmul.msk.bf16.gmra.mxu1 %vm412_vm0, %v4395_v39 }
  0x61   : > { %3335 = vmatmul.msk.bf16.gmra.mxu2 %vm412_vm0, %v4395_v39 }
  0x62   : > { %3351 = vmatmul.msk.bf16.gmra.mxu3 %vm412_vm0, %v4395_v39 }
  0x70   : > { %3304 = vmatmul.msk.bf16.gmra.mxu0 %vm412_vm0, %v4406_v40  ;;  %3320 = vmatmul.msk.bf16.gmra.mxu1 %vm412_vm0, %v4406_v40 }
  0x71   : > { %3336 = vmatmul.msk.bf16.gmra.mxu2 %vm412_vm0, %v4406_v40 }
  0x72   : > { %3352 = vmatmul.msk.bf16.gmra.mxu3 %vm412_vm0, %v4406_v40 }
  0x80   : > { %3305 = vmatmul.msk.bf16.gmra.mxu0 %vm412_vm0, %v4417_v41  ;;  %3321 = vmatmul.msk.bf16.gmra.mxu1 %vm412_vm0, %v4417_v41 }
  0x81   : > { %3337 = vmatmul.msk.bf16.gmra.mxu2 %vm412_vm0, %v4417_v41 }
  0x82   : > { %3353 = vmatmul.msk.bf16.gmra.mxu3 %vm412_vm0, %v4417_v41 }
  0x90   : > { %3306 = vmatmul.msk.bf16.gmra.mxu0 %vm412_vm0, %v4428_v42  ;;  %3322 = vmatmul.msk.bf16.gmra.mxu1 %vm412_vm0, %v4428_v42 }
  0x91   : > { %3338 = vmatmul.msk.bf16.gmra.mxu2 %vm412_vm0, %v4428_v42 }
  0x92   : > { %3354 = vmatmul.msk.bf16.gmra.mxu3 %vm412_vm0, %v4428_v42 }
  0xa0   : > { %3307 = vmatmul.msk.bf16.gmra.mxu0 %vm412_vm0, %v4439_v43  ;;  %3323 = vmatmul.msk.bf16.gmra.mxu1 %vm412_vm0, %v4439_v43 }
  0xa1   : > { %3339 = vmatmul.msk.bf16.gmra.mxu2 %vm412_vm0, %v4439_v43 }
  0xa2   : > { %3355 = vmatmul.msk.bf16.gmra.mxu3 %vm412_vm0, %v4439_v43 }
  0xad   : > { %v4452_v45 = vpop.f32.mrf.mxu0  ;;  %v4454_v46 = vpop.f32.mrf.mxu1 }
  0xae   : > { %7695 = vst [vmem:[#allocation9_spill] sm:$0xff] %v4452_v45 }
  0xaf   : > { %7696 = vst [vmem:[#allocation10_spill] sm:$0xff] %v4454_v46 }
  0xb0   : > { %3308 = vmatmul.msk.bf16.gmra.mxu0 %vm412_vm0, %v4450_v44  ;;  %3324 = vmatmul.msk.bf16.gmra.mxu1 %vm412_vm0, %v4450_v44 }
  0xb1   : > { %3340 = vmatmul.msk.bf16.gmra.mxu2 %vm412_vm0, %v4450_v44 }
  0xb2   : > { %3356 = vmatmul.msk.bf16.gmra.mxu3 %vm412_vm0, %v4450_v44 }
  0xb4   : > { %v4466_v50 = vpop.f32.mrf.mxu2 }
  0xb5   : > { %7697 = vst [vmem:[#allocation11_spill] sm:$0xff] %v4466_v50  ;;  %v4468_v51 = vpop.f32.mrf.mxu3  ;;  %v4470_v52 = vpop.f32.mrf.mxu0 }
  0xb6   : > { %7698 = vst [vmem:[#allocation12_spill] sm:$0xff] %v4468_v51  ;;  %v4472_v53 = vpop.f32.mrf.mxu1 }
  0xb7   : > { %7699 = vst [vmem:[#allocation13_spill] sm:$0xff] %v4470_v52 }
  0xb8   : > { %7700 = vst [vmem:[#allocation14_spill] sm:$0xff] %v4472_v53 }
  0xbc   : > { %v4476_v57 = vpop.f32.mrf.mxu2 }
  0xbd   : > { %7701 = vst [vmem:[#allocation15_spill] sm:$0xff] %v4476_v57  ;;  %v4481_v59 = vpop.f32.mrf.mxu3  ;;  %v4483_v60 = vpop.f32.mrf.mxu0 }
  0xbe   : > { %7703 = vst [vmem:[#allocation17_spill] sm:$0xff] %v4481_v59  ;;  %v4485_v61 = vpop.f32.mrf.mxu1 }
  0xc0   : > { %3309 = vmatmul.msk.bf16.gmra.mxu0 %vm412_vm0, %v4479_v58  ;;  %3325 = vmatmul.msk.bf16.gmra.mxu1 %vm412_vm0, %v4479_v58 }
  0xc1   : > { %3341 = vmatmul.msk.bf16.gmra.mxu2 %vm412_vm0, %v4479_v58 }
  0xc2   : > { %3357 = vmatmul.msk.bf16.gmra.mxu3 %vm412_vm0, %v4479_v58 }
  0xc4   : > { %v4495_v62 = vpop.f32.mrf.mxu2 }
  0xc5   : > { %7704 = vst [vmem:[#allocation18_spill] sm:$0xff] %v4495_v62  ;;  %v4497_v63 = vpop.f32.mrf.mxu3  ;;  %v4499_v0 = vpop.f32.mrf.mxu0 }
  0xc6   : > { %7705 = vst [vmem:[#allocation19_spill] sm:$0xff] %v4497_v63  ;;  %v4501_v1 = vpop.f32.mrf.mxu1 }
  0xcc   : > { %v4503_v2 = vpop.f32.mrf.mxu2 }
  0xcd   : > { %7706 = vst [vmem:[#allocation20_spill] sm:$0xff] %v4503_v2  ;;  %v4508_v4 = vpop.f32.mrf.mxu0  ;;  %v4510_v5 = vpop.f32.mrf.mxu3 }
  0xce   : > { %7708 = vst [vmem:[#allocation22_spill] sm:$0xff] %v4510_v5  ;;  %v4512_v6 = vpop.f32.mrf.mxu1 }
  0xd0   : > { %3310 = vmatmul.msk.bf16.gmra.mxu0 %vm412_vm0, %v4506_v3  ;;  %3326 = vmatmul.msk.bf16.gmra.mxu1 %vm412_vm0, %v4506_v3 }
  0xd1   : > { %3342 = vmatmul.msk.bf16.gmra.mxu2 %vm412_vm0, %v4506_v3 }
  0xd2   : > { %3358 = vmatmul.msk.bf16.gmra.mxu3 %vm412_vm0, %v4506_v3 }
  0xd4   : > { %v4526_v13 = vpop.f32.mrf.mxu2 }
  0xd5   : > { %7709 = vst [vmem:[#allocation23_spill] sm:$0xff] %v4526_v13  ;;  %v4528_v14 = vpop.f32.mrf.mxu0  ;;  %v4532_v16 = vpop.f32.mrf.mxu3 }
  0xd6   : > { %v4530_v15 = vpop.f32.mrf.mxu1  ;;  %7710 = vst [vmem:[#allocation24_spill] sm:$0xff] %v4532_v16 }
  0xdc   : > { %v4537_v18 = vpop.f32.mrf.mxu2 }
  0xdd   : > { %7712 = vst [vmem:[#allocation26_spill] sm:$0xff] %v4537_v18  ;;  %v4539_v19 = vpop.f32.mrf.mxu0  ;;  %v4549_v21 = vpop.f32.mrf.mxu3 }
  0xde   : > { %v4541_v20 = vpop.f32.mrf.mxu1  ;;  %7714 = vst [vmem:[#allocation28_spill] sm:$0xff] %v4549_v21 }
  0xdf   : > { %7713 = vst [vmem:[#allocation27_spill] sm:$0xff] %v4541_v20 }
  0xe0   : > { %3311 = vmatmul.msk.bf16.gmra.mxu0 %vm412_vm0, %v4535_v17  ;;  %3327 = vmatmul.msk.bf16.gmra.mxu1 %vm412_vm0, %v4535_v17 }
  0xe1   : > { %3343 = vmatmul.msk.bf16.gmra.mxu2 %vm412_vm0, %v4535_v17 }
  0xe2   : > { %3359 = vmatmul.msk.bf16.gmra.mxu3 %vm412_vm0, %v4535_v17  ;;  %v3467_v17 = vld [vmem:[%s4347_s4 + $0x78] sm:$0xff] }
  0xe4   : > { %v4557_v25 = vpop.f32.mrf.mxu2 }
  0xe5   : > { %v4553_v22 = vpop.f32.mrf.mxu0  ;;  %7716 = vst [vmem:[#allocation30_spill] sm:$0xff] %v4557_v25  ;;  %v4559_v26 = vpop.f32.mrf.mxu3 }
  0xe6   : > { %v4555_v23 = vpop.f32.mrf.mxu1  ;;  %7717 = vst [vmem:[#allocation31_spill] sm:$0xff] %v4559_v26 }
  0xe7   : > { %7715 = vst [vmem:[#allocation29_spill] sm:$0xff] %v4555_v23 }
  0xec   : > { %v4567_v30 = vpop.f32.mrf.mxu2 }
  0xed   : > { %v4562_v28 = vpop.f32.mrf.mxu0  ;;  %7720 = vst [vmem:[#allocation34_spill] sm:$0xff] %v4567_v30  ;;  %v4574_v33 = vpop.f32.mrf.mxu3 }
  0xee   : > { %7718 = vst [vmem:[#allocation32_spill] sm:$0xff] %v4562_v28  ;;  %v4564_v29 = vpop.f32.mrf.mxu1 }
  0xef   : > { %7719 = vst [vmem:[#allocation33_spill] sm:$0xff] %v4564_v29 }
  0xf0   : > { %3312 = vmatmul.msk.bf16.gmra.mxu0 %vm412_vm0, %v3464_v27  ;;  %3328 = vmatmul.msk.bf16.gmra.mxu1 %vm412_vm0, %v3464_v27  ;;  %7722 = vst [vmem:[#allocation36_spill] sm:$0xff] %v4574_v33 }
  0xf1   : > { %3344 = vmatmul.msk.bf16.gmra.mxu2 %vm412_vm0, %v3464_v27 }
  0xf2   : > { %3360 = vmatmul.msk.bf16.gmra.mxu3 %vm412_vm0, %v3464_v27 }
  0xf4   : > { %v4578_v36 = vpop.f32.mrf.mxu2 }
  0xf5   : > { %v4572_v32 = vpop.f32.mrf.mxu0  ;;  %7724 = vst [vmem:[#allocation38_spill] sm:$0xff] %v4578_v36  ;;  %v4585_v48 = vpop.f32.mrf.mxu3 }
  0xf6   : > { %7721 = vst [vmem:[#allocation35_spill] sm:$0xff] %v4572_v32  ;;  %v4576_v34 = vpop.f32.mrf.mxu1 }
  0xf7   : > { %7723 = vst [vmem:[#allocation37_spill] sm:$0xff] %v4576_v34 }
  0xf8   : > { %7727 = vst [vmem:[#allocation41_spill] sm:$0xff] %v4585_v48 }
  0xfc   : > { %v4591_v49 = vpop.f32.mrf.mxu2 }
  0xfd   : > { %v4581_v38 = vpop.f32.mrf.mxu0  ;;  %7728 = vst [vmem:[#allocation42_spill] sm:$0xff] %v4591_v49  ;;  %v4597_v56 = vpop.f32.mrf.mxu3 }
  0xfe   : > { %7725 = vst [vmem:[#allocation39_spill] sm:$0xff] %v4581_v38  ;;  %v4583_v47 = vpop.f32.mrf.mxu1 }
  0xff   : > { %7726 = vst [vmem:[#allocation40_spill] sm:$0xff] %v4583_v47 }
 0x100   : > { %3313 = vmatmul.msk.bf16.gmra.mxu0 %vm412_vm0, %v3465_v37  ;;  %3329 = vmatmul.msk.bf16.gmra.mxu1 %vm412_vm0, %v3465_v37  ;;  %7730 = vst [vmem:[#allocation44_spill] sm:$0xff] %v4597_v56 }
 0x101   : > { %3345 = vmatmul.msk.bf16.gmra.mxu2 %vm412_vm0, %v3465_v37 }
 0x102   : > { %3361 = vmatmul.msk.bf16.gmra.mxu3 %vm412_vm0, %v3465_v37 }
 0x104   : > { %v4604_v10 = vpop.f32.mrf.mxu2 }
 0x105   : > { %v4593_v54 = vpop.f32.mrf.mxu0  ;;  %7731 = vst [vmem:[#allocation45_spill] sm:$0xff] %v4604_v10  ;;  %v4610_v11 = vpop.f32.mrf.mxu3 }
 0x106   : > { %7729 = vst [vmem:[#allocation43_spill] sm:$0xff] %v4593_v54  ;;  %v4595_v55 = vpop.f32.mrf.mxu1 }
 0x107   : > { %7732 = vst [vmem:[#allocation46_spill] sm:$0xff] %v4610_v11 }
 0x10c   : > { %v4616_v37 = vpop.f32.mrf.mxu2 }
 0x10d   : > { %v4600_v8 = vpop.f32.mrf.mxu0  ;;  %7733 = vst [vmem:[#allocation47_spill] sm:$0xff] %v4616_v37  ;;  %v4621_v56 = vpop.f32.mrf.mxu3 }
 0x10e   : > { %v4602_v9 = vpop.f32.mrf.mxu1  ;;  %7734 = vst [vmem:[#allocation48_spill] sm:$0xff] %v4621_v56 }
 0x110   : > { %3314 = vmatmul.msk.bf16.gmra.mxu0 %vm412_vm0, %v3466_v7  ;;  %3330 = vmatmul.msk.bf16.gmra.mxu1 %vm412_vm0, %v3466_v7 }
 0x111   : > { %3346 = vmatmul.msk.bf16.gmra.mxu2 %vm412_vm0, %v3466_v7 }
 0x112   : > { %3362 = vmatmul.msk.bf16.gmra.mxu3 %vm412_vm0, %v3466_v7 }
 0x114   : > { %v4629_v7 = vpop.f32.mrf.mxu2 }
 0x115   : > { %v4612_v12 = vpop.f32.mrf.mxu0  ;;  %7736 = vst [vmem:[#allocation50_spill] sm:$0xff] %v4629_v7  ;;  %v4635_v26 = vpop.f32.mrf.mxu3 }
 0x116   : > { %v4614_v27 = vpop.f32.mrf.mxu1  ;;  %7738 = vst [vmem:[#allocation52_spill] sm:$0xff] %v4635_v26 }
 0x11c   : > { %v4637_v21 = vpop.f32.mrf.mxu2 }
 0x11d   : > { %v4619_v3 = vpop.f32.mrf.mxu0  ;;  %7739 = vst [vmem:[#allocation53_spill] sm:$0xff] %v4637_v21 }
 0x11e   : > { %v4623_v48 = vpop.f32.mrf.mxu1 }
 0x11f   : > { %7735 = vst [vmem:[#allocation49_spill] sm:$0xff] %v4623_v48 }
 0x120   : > { %3315 = vmatmul.msk.bf16.gmra.mxu0 %vm412_vm0, %v3467_v17  ;;  %3331 = vmatmul.msk.bf16.gmra.mxu1 %vm412_vm0, %v3467_v17 }
 0x121   : > { %3347 = vmatmul.msk.bf16.gmra.mxu2 %vm412_vm0, %v3467_v17 }
 0x122   : > { %3363 = vmatmul.msk.bf16.gmra.mxu3 %vm412_vm0, %v3467_v17  ;;  %v4649_v17 = vpop.f32.mrf.mxu3 }
 0x123   : > { %7741 = vst [vmem:[#allocation55_spill] sm:$0xff] %v4649_v17 }
 0x124   : > { %v4657_v21 = vpop.f32.mrf.mxu2 }
 0x125   : > { %v4631_v11 = vpop.f32.mrf.mxu0  ;;  %7743 = vst [vmem:[#allocation57_spill] sm:$0xff] %v4657_v21 }
 0x126   : > { %v4633_v33 = vpop.f32.mrf.mxu1 }
 0x127   : > { %7737 = vst [vmem:[#allocation51_spill] sm:$0xff] %v4633_v33 }
 0x12a   : > { %v4659_v7 = vpop.f32.mrf.mxu3 }
 0x12b   : > { %7744 = vst [vmem:[#allocation58_spill] sm:$0xff] %v4659_v7 }
 0x12c   : > { %v4667_v10 = vpop.f32.mrf.mxu2 }
 0x12d   : > { %v4639_v56 = vpop.f32.mrf.mxu0  ;;  %7746 = vst [vmem:[#allocation60_spill] sm:$0xff] %v4667_v10 }
 0x12e   : > { %v4641_v58 = vpop.f32.mrf.mxu1 }
 0x12f   : > { %7740 = vst [vmem:[#allocation54_spill] sm:$0xff] %v4641_v58 }
 0x130   : > { %3364 = vmatmul.msk.bf16.vlgmr.msrb.gmra.mxu0 %vm412_vm0, %v4354_v24  ;;  %3380 = vmatmul.msk.bf16.vlgmr.msrb.gmra.mxu1 %vm412_vm0, %v4354_v24 }
 0x131   : > { %3396 = vmatmul.msk.bf16.vlgmr.msrb.gmra.mxu2 %vm412_vm0, %v4354_v24 }
 0x132   : > { %3412 = vmatmul.msk.bf16.vlgmr.msrb.gmra.mxu3 %vm412_vm0, %v4354_v24  ;;  %v4677_v7 = vpop.f32.mrf.mxu3 }
 0x133   : > { %7747 = vst [vmem:[#allocation61_spill] sm:$0xff] %v4677_v7 }
 0x134   : > { %v4681_v21 = vpop.f32.mrf.mxu2 }
 0x135   : > { %v4653_v26 = vpop.f32.mrf.mxu0  ;;  %7749 = vst [vmem:[#allocation63_spill] sm:$0xff] %v4681_v21 }
 0x136   : > { %v4655_v16 = vpop.f32.mrf.mxu1 }
 0x137   : > { %7742 = vst [vmem:[#allocation56_spill] sm:$0xff] %v4655_v16 }
 0x13a   : > { %v4687_v49 = vpop.f32.mrf.mxu3 }
 0x13b   : > { %7751 = vst [vmem:[#allocation65_spill] sm:$0xff] %v4687_v49 }
 0x13c   : > { %v4700_v21 = vpop.f32.mrf.mxu2 }
 0x13d   : > { %v4661_v5 = vpop.f32.mrf.mxu0  ;;  %7752 = vst [vmem:[#allocation66_spill] sm:$0xff] %v4700_v21 }
 0x13e   : > { %v4663_v37 = vpop.f32.mrf.mxu1 }
 0x13f   : > { %7745 = vst [vmem:[#allocation59_spill] sm:$0xff] %v4663_v37 }
 0x140   : > { %3365 = vmatmul.msk.bf16.gmra.mxu0 %vm412_vm0, %v4369_v31  ;;  %3381 = vmatmul.msk.bf16.gmra.mxu1 %vm412_vm0, %v4369_v31 }
 0x141   : > { %3397 = vmatmul.msk.bf16.gmra.mxu2 %vm412_vm0, %v4369_v31 }
 0x142   : > { %3413 = vmatmul.msk.bf16.gmra.mxu3 %vm412_vm0, %v4369_v31  ;;  %v1173_v31 = vmax.f32 %v4452_v45, %v4470_v52  ;;  %v4709_v30 = vpop.f32.mrf.mxu3 }
 0x143   : > { %7754 = vst [vmem:[#allocation68_spill] sm:$0xff] %v4709_v30 }
 0x144   : > { %v1174_v7 = vmax.f32 %v1173_v31, %v4483_v60  ;;  %v4717_v21 = vpop.f32.mrf.mxu2 }
 0x145   : > { %v4675_v24 = vpop.f32.mrf.mxu0  ;;  %7756 = vst [vmem:[#allocation70_spill] sm:$0xff] %v4717_v21 }
 0x146   : > { %v4679_v17 = vpop.f32.mrf.mxu1  ;;  %v1175_v36 = vmax.f32 %v1174_v7, %v4499_v0 }
 0x147   : > { %7748 = vst [vmem:[#allocation62_spill] sm:$0xff] %v4679_v17 }
 0x148   : > { %v1176_v59 = vmax.f32 %v1175_v36, %v4508_v4  ;;  %v1210_v36 = vmax.f32 %v4454_v46, %v4472_v53 }
 0x14a   : > { %v1177_v44 = vmax.f32 %v1176_v59, %v4528_v14  ;;  %v4730_v59 = vpop.f32.mrf.mxu3 }
 0x14b   : > { %7757 = vst [vmem:[#allocation71_spill] sm:$0xff] %v4730_v59 }
 0x14c   : > { %v1178_v52 = vmax.f32 %v1177_v44, %v4539_v19 }
 0x14d   : > { %v4683_v63 = vpop.f32.mrf.mxu0 }
 0x14e   : > { %v4685_v10 = vpop.f32.mrf.mxu1 }
 0x14f   : > { %7750 = vst [vmem:[#allocation64_spill] sm:$0xff] %v4685_v10 }
 0x150   : > { %3366 = vmatmul.msk.bf16.gmra.mxu0 %vm412_vm0, %v4382_v35  ;;  %3382 = vmatmul.msk.bf16.gmra.mxu1 %vm412_vm0, %v4382_v35 }
 0x151   : > { %3398 = vmatmul.msk.bf16.gmra.mxu2 %vm412_vm0, %v4382_v35 }
 0x152   : > { %3414 = vmatmul.msk.bf16.gmra.mxu3 %vm412_vm0, %v4382_v35  ;;  %v1179_v35 = vmax.f32 %v1178_v52, %v4553_v22 }
 0x154   : > { %v1180_v7 = vmax.f32 %v1179_v35, %v4562_v28  ;;  %v1211_v28 = vmax.f32 %v1210_v36, %v4485_v61 }
 0x155   : > { %v4702_v49 = vpop.f32.mrf.mxu0 }
 0x156   : > { %v4705_v51 = vpop.f32.mrf.mxu1  ;;  %v1181_v44 = vmax.f32 %v1180_v7, %v4572_v32  ;;  %v1212_v32 = vmax.f32 %v1211_v28, %v4501_v1 }
 0x157   : > { %7753 = vst [vmem:[#allocation67_spill] sm:$0xff] %v4705_v51 }
 0x158   : > { %v1182_v52 = vmax.f32 %v1181_v44, %v4581_v38  ;;  %v1213_v59 = vmax.f32 %v1212_v32, %v4512_v6 }
 0x15a   : > { %v1183_v30 = vmax.f32 %v1182_v52, %v4593_v54  ;;  %v1214_v46 = vmax.f32 %v1213_v59, %v4530_v15  ;;  %v4751_v54 = vpop.f32.mrf.mxu3 }
 0x15b   : > { %7760 = vst [vmem:[#allocation74_spill] sm:$0xff] %v4751_v54 }
 0x15c   : > { %v1184_v7 = vmax.f32 %v1183_v30, %v4600_v8  ;;  %v1215_v28 = vmax.f32 %v1214_v46, %v4541_v20 }
 0x15d   : > { %v4712_v45 = vpop.f32.mrf.mxu0 }
 0x15e   : > { %v4715_v31 = vpop.f32.mrf.mxu1  ;;  %v1185_v44 = vmax.f32 %v1184_v7, %v4612_v12  ;;  %v1216_v32 = vmax.f32 %v1215_v28, %v4555_v23 }
 0x15f   : > { %7755 = vst [vmem:[#allocation69_spill] sm:$0xff] %v4715_v31 }
 0x160   : > { %3367 = vmatmul.msk.bf16.gmra.mxu0 %vm412_vm0, %v4395_v39  ;;  %3383 = vmatmul.msk.bf16.gmra.mxu1 %vm412_vm0, %v4395_v39  ;;  %v1186_v53 = vmax.f32 %v1185_v44, %v4619_v3  ;;  %v1217_v46 = vmax.f32 %v1216_v32, %v4564_v29 }
 0x161   : > { %3399 = vmatmul.msk.bf16.gmra.mxu2 %vm412_vm0, %v4395_v39 }
 0x162   : > { %3415 = vmatmul.msk.bf16.gmra.mxu3 %vm412_vm0, %v4395_v39  ;;  %v4742_v39 = vpop.f32.mrf.mxu2  ;;  %v1187_v52 = vmax.f32 %v1186_v53, %v4631_v11  ;;  %v1218_v44 = vmax.f32 %v1217_v46, %v4576_v34  ;;  %v4779_v20 = vpop.f32.mrf.mxu3 }
 0x163   : > { %7759 = vst [vmem:[#allocation73_spill] sm:$0xff] %v4742_v39 }
 0x164   : > { %v1188_v30 = vmax.f32 %v1187_v52, %v4639_v56  ;;  %v1219_v23 = vmax.f32 %v1218_v44, %v4583_v47  ;;  %7763 = vst [vmem:[#allocation77_spill] sm:$0xff] %v4779_v20 }
 0x165   : > { %v4734_v35 = vpop.f32.mrf.mxu0 }
 0x166   : > { %v4737_v21 = vpop.f32.mrf.mxu1  ;;  %v1189_v53 = vmax.f32 %v1188_v30, %v4653_v26 }
 0x167   : > { %7758 = vst [vmem:[#allocation72_spill] sm:$0xff] %v4737_v21 }
 0x168   : > { %v1190_v7 = vmax.f32 %v1189_v53, %v4661_v5 }
 0x16a   : > { %v4768_v59 = vpop.f32.mrf.mxu2  ;;  %v1191_v28 = vmax.f32 %v1190_v7, %v4675_v24 }
 0x16c   : > { %v1192_v30 = vmax.f32 %v1191_v28, %v4683_v63 }
 0x16d   : > { %v4748_v38 = vpop.f32.mrf.mxu0 }
 0x16e   : > { %v4753_v36 = vpop.f32.mrf.mxu1  ;;  %v1193_v32 = vmax.f32 %v1192_v30, %v4702_v49 }
 0x16f   : > { %7761 = vst [vmem:[#allocation75_spill] sm:$0xff] %v4753_v36 }
 0x170   : > { %3368 = vmatmul.msk.bf16.gmra.mxu0 %vm412_vm0, %v4406_v40  ;;  %3384 = vmatmul.msk.bf16.gmra.mxu1 %vm412_vm0, %v4406_v40  ;;  %v1194_v46 = vmax.f32 %v1193_v32, %v4712_v45 }
 0x171   : > { %3400 = vmatmul.msk.bf16.gmra.mxu2 %vm412_vm0, %v4406_v40 }
 0x172   : > { %3416 = vmatmul.msk.bf16.gmra.mxu3 %vm412_vm0, %v4406_v40  ;;  %v1220_v40 = vmax.f32 %v1219_v23, %v4595_v55  ;;  %v4786_v29 = vpop.f32.mrf.mxu2  ;;  %v1195_v44 = vmax.f32 %v1194_v46, %v4734_v35 }
 0x174   : > { %v1221_v53 = vmax.f32 %v1220_v40, %v4602_v9  ;;  %v1196_v23 = vmax.f32 %v1195_v44, %v4748_v38  ;;  %v4802_v40 = vpop.f32.mrf.mxu3 }
 0x175   : > { %v4772_v52 = vpop.f32.mrf.mxu0  ;;  %7765 = vst [vmem:[#allocation79_spill] sm:$0xff] %v4802_v40 }
 0x176   : > { %v4775_v54 = vpop.f32.mrf.mxu1  ;;  %v1222_v34 = vmax.f32 %v1221_v53, %v4614_v27  ;;  %v1197_v32 = vmax.f32 %v1196_v23, %v4772_v52 }
 0x177   : > { %7762 = vst [vmem:[#allocation76_spill] sm:$0xff] %v4775_v54 }
 0x178   : > { %v1223_v28 = vmax.f32 %v1222_v34, %v4623_v48 }
 0x17a   : > { %v1224_v30 = vmax.f32 %v1223_v28, %v4633_v33  ;;  %v4816_v40 = vpop.f32.mrf.mxu2 }
 0x17c   : > { %v1225_v34 = vmax.f32 %v1224_v30, %v4641_v58  ;;  %v4820_v48 = vpop.f32.mrf.mxu3  ;;  %v7785_v58 = vld [vmem:[#allocation22_spill] sm:$0xff] }
 0x17d   : > { %v4788_v7 = vpop.f32.mrf.mxu0  ;;  %7767 = vst [vmem:[#allocation81_spill] sm:$0xff] %v4820_v48  ;;  %v7783_v48 = vld [vmem:[#allocation9_spill] sm:$0xff] }
 0x17e   : > { %v4791_v47 = vpop.f32.mrf.mxu1  ;;  %v1198_v53 = vmax.f32 %v1197_v32, %v4788_v7  ;;  %v1226_v46 = vmax.f32 %v1225_v34, %v4655_v16 }
 0x17f   : > { %7764 = vst [vmem:[#allocation78_spill] sm:$0xff] %v4791_v47 }
 0x180   : > { %3369 = vmatmul.msk.bf16.gmra.mxu0 %vm412_vm0, %v4417_v41  ;;  %3385 = vmatmul.msk.bf16.gmra.mxu1 %vm412_vm0, %v4417_v41  ;;  %v1227_v20 = vmax.f32 %v1226_v46, %v4663_v37  ;;  %v7773_v37 = vld [vmem:[#allocation8_spill] sm:$0xff] }
 0x181   : > { %3401 = vmatmul.msk.bf16.gmra.mxu2 %vm412_vm0, %v4417_v41 }
 0x182   : > { %3417 = vmatmul.msk.bf16.gmra.mxu3 %vm412_vm0, %v4417_v41  ;;  %v1228_v23 = vmax.f32 %v1227_v20, %v4679_v17  ;;  %v4832_v20 = vpop.f32.mrf.mxu2 }
 0x184   : > { %v1229_v41 = vmax.f32 %v1228_v23, %v4685_v10 }
 0x185   : > { %v4810_v44 = vpop.f32.mrf.mxu0 }
 0x186   : > { %v1199_v28 = vmax.f32 %v1198_v53, %v4810_v44  ;;  %v4813_v33 = vpop.f32.mrf.mxu1  ;;  %v1230_v30 = vmax.f32 %v1229_v41, %v4705_v51 }
 0x187   : > { %7766 = vst [vmem:[#allocation80_spill] sm:$0xff] %v4813_v33 }
 0x188   : > { %v1231_v53 = vmax.f32 %v1230_v30, %v4715_v31  ;;  %v4844_v30 = vpop.f32.mrf.mxu3 }
 0x189   : > { %7769 = vst [vmem:[#allocation83_spill] sm:$0xff] %v4844_v30 }
 0x18a   : > { %v1232_v46 = vmax.f32 %v1231_v53, %v4737_v21  ;;  %v4851_v10 = vpop.f32.mrf.mxu2 }
 0x18d   : > { %v4823_v32 = vpop.f32.mrf.mxu0 }
 0x18e   : > { %v1200_v34 = vmax.f32 %v1199_v28, %v4823_v32  ;;  %v4826_v16 = vpop.f32.mrf.mxu1  ;;  %v1233_v28 = vmax.f32 %v1232_v46, %v4753_v36  ;;  %v1247_v46 = vmax.f32 %v4466_v50, %v4476_v57 }
 0x18f   : > { %7768 = vst [vmem:[#allocation82_spill] sm:$0xff] %v4826_v16 }
 0x190   : > { %3370 = vmatmul.msk.bf16.gmra.mxu0 %vm412_vm0, %v4428_v42  ;;  %3386 = vmatmul.msk.bf16.gmra.mxu1 %vm412_vm0, %v4428_v42  ;;  %v1234_v23 = vmax.f32 %v1233_v28, %v4775_v54 }
 0x191   : > { %3402 = vmatmul.msk.bf16.gmra.mxu2 %vm412_vm0, %v4428_v42 }
 0x192   : > { %3418 = vmatmul.msk.bf16.gmra.mxu3 %vm412_vm0, %v4428_v42  ;;  %v1235_v31 = vmax.f32 %v1234_v23, %v4791_v47  ;;  %v1248_v23 = vmax.f32 %v1247_v46, %v4495_v62 }
 0x194   : > { %v1236_v51 = vmax.f32 %v1235_v31, %v4813_v33  ;;  %v4864_v31 = vpop.f32.mrf.mxu3 }
 0x195   : > { %v4842_v41 = vpop.f32.mrf.mxu0  ;;  %7770 = vst [vmem:[#allocation84_spill] sm:$0xff] %v4864_v31 }
 0x196   : > { %v1201_v53 = vmax.f32 %v1200_v34, %v4842_v41  ;;  %v4847_v21 = vpop.f32.mrf.mxu1  ;;  %v1237_v42 = vmax.f32 %v1236_v51, %v4826_v16  ;;  %v1249_v51 = vmax.f32 %v1248_v23, %v4503_v2  ;;  %v7772_v23 = vld [vmem:[#allocation34_spill] sm:$0xff] }
 0x198   : > { %v1238_v28 = vmax.f32 %v1237_v42, %v4847_v21 }
 0x19c   : > { %v4881_v33 = vpop.f32.mrf.mxu3 }
 0x19d   : > { %v4857_v54 = vpop.f32.mrf.mxu0  ;;  %7771 = vst [vmem:[#allocation85_spill] sm:$0xff] %v4881_v33 }
 0x19e   : > { %v1202_v36 = vmax.f32 %v1201_v53, %v4857_v54  ;;  %v4860_v34 = vpop.f32.mrf.mxu1  ;;  %v4875_v53 = vpop.f32.mrf.mxu2 }
 0x19f   : > { %v1239_v17 = vmax.f32 %v1238_v28, %v4860_v34  ;;  %v1250_v28 = vmax.f32 %v1249_v51, %v4526_v13  ;;  %v7775_v51 = vld [vmem:[#allocation12_spill] sm:$0xff] }
 0x1a0   : > { %3371 = vmatmul.msk.bf16.gmra.mxu0 %vm412_vm0, %v4439_v43  ;;  %3387 = vmatmul.msk.bf16.gmra.mxu1 %vm412_vm0, %v4439_v43 }
 0x1a1   : > { %3403 = vmatmul.msk.bf16.gmra.mxu2 %vm412_vm0, %v4439_v43  ;;  %v1251_v62 = vmax.f32 %v1250_v28, %v4537_v18  ;;  %v7779_v28 = vld [vmem:[#allocation19_spill] sm:$0xff] }
 0x1a2   : > { %3419 = vmatmul.msk.bf16.gmra.mxu3 %vm412_vm0, %v4439_v43  ;;  %v7782_v18 = vld [vmem:[#allocation47_spill] sm:$0xff] }
 0x1a3   : > { %v1252_v50 = vmax.f32 %v1251_v62, %v4557_v25 }
 0x1a5   : > { %v4877_v42 = vpop.f32.mrf.mxu0  ;;  %v1253_v2 = vmax.f32 %v1252_v50, %v7772_v23 }
 0x1a6   : > { %v1203_v46 = vmax.f32 %v1202_v36, %v4877_v42  ;;  %v4885_v31 = vpop.f32.mrf.mxu2  ;;  %v7774_v36 = vld [vmem:[#allocation17_spill] sm:$0xff]  ;;  %v4906_v25 = vpop.f32.mrf.mxu1 }
 0x1a7   : > { %v1284_v13 = vmax.f32 %v7775_v51, %v7774_v36  ;;  %v7780_v36 = vld [vmem:[#allocation45_spill] sm:$0xff]  ;;  %7781 = vst [vmem:[#allocation86_spill] sm:$0xff] %v4906_v25 }
 0x1a8   : > { %v1204_v16 = vrot.slane %v1203_v46, 4 }
 0x1a9   : > { %v1285_v23 = vmax.f32 %v1284_v13, %v7779_v28  ;;  %v7786_v13 = vld [vmem:[#allocation50_spill] sm:$0xff] }
 0x1aa   : > { %v1205_v47 = vmax.f32 %v1203_v46, %v1204_v16  ;;  %v7776_v16 = vld [vmem:[#allocation38_spill] sm:$0xff] }
 0x1ab   : > { %v1254_v62 = vmax.f32 %v1253_v2, %v7776_v16  ;;  %v7784_v16 = vld [vmem:[#allocation13_spill] sm:$0xff] }
 0x1ac   : > { %v1206_v57 = vrot.slane %v1205_v47, 2 }
 0x1ae   : > { %v1207_v43 = vmax.f32 %v1205_v47, %v1206_v57  ;;  %v7777_v57 = vld [vmem:[#allocation42_spill] sm:$0xff]  ;;  %v4900_v47 = vpop.f32.mrf.mxu3 }
 0x1af   : > { %v1255_v50 = vmax.f32 %v1254_v62, %v7777_v57  ;;  %7778 = vst [vmem:[#allocation8_spill] sm:$0xff] %v4900_v47  ;;  %v1286_v62 = vmax.f32 %v1285_v23, %v7785_v58  ;;  %v4914_v57 = vpop.f32.mrf.mxu2 }
 0x1b0   : > { %v1208_v30 = vrot.slane %v1207_v43, 1  ;;  %3372 = vmatmul.msk.bf16.gmra.mxu0 %vm412_vm0, %v7773_v37  ;;  %3388 = vmatmul.msk.bf16.gmra.mxu1 %vm412_vm0, %v7773_v37 }
 0x1b1   : > { %3404 = vmatmul.msk.bf16.gmra.mxu2 %vm412_vm0, %v7773_v37  ;;  %v1256_v51 = vmax.f32 %v1255_v50, %v7780_v36 }
 0x1b2   : > { %3420 = vmatmul.msk.bf16.gmra.mxu3 %vm412_vm0, %v7773_v37  ;;  %v4902_v46 = vmax.f32 %v1207_v43, %v1208_v30 }
 0x1b3   : > { %v1257_v33 = vmax.f32 %v1256_v51, %v7782_v18  ;;  %v7788_v18 = vld [vmem:[#allocation57_spill] sm:$0xff] }
 0x1b4   : > { %v1469_v2 = vsub.f32 %v7783_v48, %v4902_v46  ;;  %v1477_v37 = vsub.f32 %v7784_v16, %v4902_v46  ;;  %v1485_v30 = vsub.f32 %v4483_v60, %v4902_v46  ;;  %v1240_v48 = vmax.f32 %v1239_v17, %v4906_v25  ;;  %v7790_v25 = vld [vmem:[#allocation24_spill] sm:$0xff] }
 0x1b5   : > { %v1258_v43 = vmax.f32 %v1257_v33, %v7786_v13  ;;  %v1493_v16 = vsub.f32 %v4499_v0, %v4902_v46  ;;  %v7787_v33 = vld [vmem:[#allocation53_spill] sm:$0xff]  ;;  %v1501_v51 = vsub.f32 %v4508_v4, %v4902_v46  ;;  %v1287_v47 = vmax.f32 %v1286_v62, %v7790_v25  ;;  %v7793_v4 = vld [vmem:[#allocation28_spill] sm:$0xff] }
 0x1b6   : > { %v1725_v50 = vmul.f32 1.442695, %v1469_v2  ;;  %v1741_v13 = vmul.f32 1.442695, %v1477_v37  ;;  %v1757_v17 = vmul.f32 1.442695, %v1485_v30  ;;  %v4936_v0 = vpop.f32.mrf.mxu3  ;;  %v1509_v58 = vsub.f32 %v4528_v14, %v4902_v46 }
 0x1b7   : > { %v1259_v28 = vmax.f32 %v1258_v43, %v7787_v33  ;;  %7789 = vst [vmem:[#allocation9_spill] sm:$0xff] %v4936_v0  ;;  %v1241_v23 = vrot.slane %v1240_v48, 4  ;;  %v1773_v60 = vmul.f32 1.442695, %v1493_v16  ;;  %v7791_v43 = vld [vmem:[#allocation60_spill] sm:$0xff]  ;;  %v1288_v30 = vmax.f32 %v1287_v47, %v7793_v4  ;;  %v7794_v14 = vld [vmem:[#allocation63_spill] sm:$0xff]  ;;  %v4955_v47 = vpop.f32.mrf.mxu2 }
 0x1b8   : > { %3539 = vpow2.f32 %v1725_v50  ;;  %v7792_v37 = vld [vmem:[#allocation16_spill] sm:$0xff]  ;;  %v1789_v50 = vmul.f32 1.442695, %v1501_v51  ;;  %v1805_v51 = vmul.f32 1.442695, %v1509_v58  ;;  %v7797_v4 = vld [vmem:[#allocation66_spill] sm:$0xff] }
 0x1b9   : > { %v1260_v36 = vmax.f32 %v1259_v28, %v7788_v18  ;;  %3541 = vpow2.f32 %v1741_v13  ;;  %v1517_v28 = vsub.f32 %v4539_v19, %v4902_v46  ;;  %v1242_v13 = vmax.f32 %v1240_v48, %v1241_v23  ;;  %v7800_v23 = vld [vmem:[#allocation32_spill] sm:$0xff]  ;;  %v7803_v18 = vld [vmem:[#allocation41_spill] sm:$0xff] }
 0x1ba   : > { %3543 = vpow2.f32 %v1757_v17  ;;  %v1525_v19 = vsub.f32 %v4553_v22, %v4902_v46 }
 0x1bb   : > { %v1261_v2 = vmax.f32 %v1260_v36, %v7791_v43  ;;  %v7795_v36 = vld [vmem:[#allocation31_spill] sm:$0xff]  ;;  %3545 = vpow2.f32 %v1773_v60  ;;  %v1243_v60 = vrot.slane %v1242_v13, 2 }
 0x1bc   : > { %v1289_v16 = vmax.f32 %v1288_v30, %v7795_v36  ;;  %3547 = vpow2.f32 %v1789_v50  ;;  %v1821_v30 = vmul.f32 1.442695, %v1517_v28  ;;  %v7801_v36 = vld [vmem:[#allocation70_spill] sm:$0xff]  ;;  %v7807_v50 = vld [vmem:[#allocation44_spill] sm:$0xff] }
 0x1bd   : > { %v1262_v62 = vmax.f32 %v1261_v2, %v7794_v14  ;;  %v7799_v2 = vld [vmem:[#allocation36_spill] sm:$0xff]  ;;  %3549 = vpow2.f32 %v1805_v51 }
 0x1be   : > { %v4959_v17 = vpop.eup %3539  ;;  %v1290_v48 = vmax.f32 %v1289_v16, %v7799_v2  ;;  %v1837_v16 = vmul.f32 1.442695, %v1525_v19  ;;  %3551 = vpow2.f32 %v1821_v30  ;;  %v1244_v19 = vmax.f32 %v1242_v13, %v1243_v60 }
 0x1bf   : > { %7796 = vst [vmem:[#allocation13_spill] sm:$0xff] %v4959_v17  ;;  %v1263_v25 = vmax.f32 %v1262_v62, %v7797_v4  ;;  %v4962_v43 = vpop.eup %3541  ;;  %v7804_v62 = vld [vmem:[#allocation35_spill] sm:$0xff]  ;;  %v1565_v13 = vsub.f32 %v4600_v8, %v4902_v46 }
 0x1c0   : > { %3373 = vmatmul.msk.bf16.gmra.mxu0 %vm412_vm0, %v7792_v37  ;;  %3389 = vmatmul.msk.bf16.gmra.mxu1 %vm412_vm0, %v7792_v37  ;;  %7798 = vst [vmem:[#allocation16_spill] sm:$0xff] %v4962_v43  ;;  %v2237_v22 = vadd.f32 %v4962_v43, %v4959_v17  ;;  %v4970_v58 = vpop.eup %3543  ;;  %v1291_v33 = vmax.f32 %v1290_v48, %v7803_v18  ;;  %v7808_v17 = vld [vmem:[#allocation39_spill] sm:$0xff]  ;;  %3553 = vpow2.f32 %v1837_v16 }
 0x1c1   : > { %3405 = vmatmul.msk.bf16.gmra.mxu2 %vm412_vm0, %v7792_v37  ;;  %v1264_v14 = vmax.f32 %v1263_v25, %v7801_v36  ;;  %7802 = vst [vmem:[#allocation32_spill] sm:$0xff] %v4970_v58  ;;  %v1541_v4 = vsub.f32 %v7804_v62, %v4902_v46  ;;  %v4979_v25 = vpop.eup %3545  ;;  %v1549_v36 = vsub.f32 %v7808_v17, %v4902_v46 }
 0x1c2   : > { %3421 = vmatmul.msk.bf16.gmra.mxu3 %vm412_vm0, %v7792_v37  ;;  %v1533_v37 = vsub.f32 %v7800_v23, %v4902_v46  ;;  %v4976_v23 = vpop.f32.mrf.mxu3  ;;  %v2238_v28 = vadd.f32 %v4970_v58, %v2237_v22  ;;  %7806 = vst [vmem:[#allocation87_spill] sm:$0xff] %v4979_v25  ;;  %v1292_v43 = vmax.f32 %v1291_v33, %v7807_v50  ;;  %v4986_v62 = vpop.eup %3547  ;;  %v7811_v22 = vld [vmem:[#allocation43_spill] sm:$0xff] }
 0x1c3   : > { %v1265_v2 = vmax.f32 %v1264_v14, %v4742_v39  ;;  %7805 = vst [vmem:[#allocation35_spill] sm:$0xff] %v4976_v23  ;;  %v7810_v14 = vld [vmem:[#allocation46_spill] sm:$0xff]  ;;  %v1557_v58 = vsub.f32 %v7811_v22, %v4902_v46  ;;  %v1869_v23 = vmul.f32 1.442695, %v1541_v4  ;;  %v4993_v30 = vpop.eup %3549  ;;  %v4996_v50 = vpop.f32.mrf.mxu2  ;;  %v1245_v4 = vrot.slane %v1244_v19, 1 }
 0x1c4   : > { %v1853_v48 = vmul.f32 1.442695, %v1533_v37  ;;  %v2239_v51 = vadd.f32 %v4979_v25, %v2238_v28  ;;  %7809 = vst [vmem:[#allocation39_spill] sm:$0xff] %v4986_v62  ;;  %v1293_v39 = vmax.f32 %v1292_v43, %v7810_v14  ;;  %v7813_v37 = vld [vmem:[#allocation48_spill] sm:$0xff]  ;;  %v1885_v43 = vmul.f32 1.442695, %v1549_v36  ;;  %v5002_v28 = vpop.eup %3551 }
 0x1c5   : > { %v1266_v18 = vmax.f32 %v1265_v2, %v4768_v59  ;;  %7812 = vst [vmem:[#allocation46_spill] sm:$0xff] %v4993_v30  ;;  %v1573_v22 = vsub.f32 %v4612_v12, %v4902_v46 }
 0x1c6   : > { %v2240_v17 = vadd.f32 %v4986_v62, %v2239_v51  ;;  %v1294_v2 = vmax.f32 %v1293_v39, %v7813_v37  ;;  %3555 = vpow2.f32 %v1853_v48  ;;  %7814 = vst [vmem:[#allocation43_spill] sm:$0xff] %v5002_v28  ;;  %v1901_v39 = vmul.f32 1.442695, %v1557_v58  ;;  %v7816_v48 = vld [vmem:[#allocation21_spill] sm:$0xff]  ;;  %v5011_v36 = vpop.eup %3553 }
 0x1c7   : > { %v1267_v33 = vmax.f32 %v1266_v18, %v4786_v29  ;;  %v7815_v18 = vld [vmem:[#allocation52_spill] sm:$0xff]  ;;  %3557 = vpow2.f32 %v1869_v23  ;;  %7817 = vst [vmem:[#allocation48_spill] sm:$0xff] %v5011_v36  ;;  %v1597_v62 = vsub.f32 %v4639_v56, %v4902_v46 }
 0x1c8   : > { %v2241_v16 = vadd.f32 %v4993_v30, %v2240_v17  ;;  %v1295_v51 = vmax.f32 %v1294_v2, %v7815_v18  ;;  %v1581_v30 = vsub.f32 %v4619_v3, %v4902_v46  ;;  %3559 = vpow2.f32 %v1885_v43 }
 0x1c9   : > { %v1268_v60 = vmax.f32 %v1267_v33, %v4816_v40  ;;  %v7818_v33 = vld [vmem:[#allocation55_spill] sm:$0xff]  ;;  %v1917_v2 = vmul.f32 1.442695, %v1565_v13  ;;  %v7821_v13 = vld [vmem:[#allocation58_spill] sm:$0xff]  ;;  %3561 = vpow2.f32 %v1901_v39 }
 0x1ca   : > { %v2242_v8 = vadd.f32 %v5002_v28, %v2241_v16  ;;  %v1296_v17 = vmax.f32 %v1295_v51, %v7818_v33  ;;  %v5021_v58 = vpop.f32.mrf.mxu3  ;;  %v1589_v16 = vsub.f32 %v4631_v11, %v4902_v46  ;;  %v1933_v51 = vmul.f32 1.442695, %v1573_v22  ;;  %v7824_v39 = vld [vmem:[#allocation10_spill] sm:$0xff] }
 0x1cb   : > { %v1269_v25 = vmax.f32 %v1268_v60, %v4832_v20  ;;  %7819 = vst [vmem:[#allocation52_spill] sm:$0xff] %v5021_v58  ;;  %v5024_v60 = vmax.f32 %v1244_v19, %v1245_v4  ;;  %3563 = vpow2.f32 %v1917_v2  ;;  %v5050_v28 = vpop.f32.mrf.mxu2 }
 0x1cc   : > { %v2243_v23 = vadd.f32 %v5011_v36, %v2242_v8  ;;  %v5028_v3 = vpop.eup %3555  ;;  %v1297_v43 = vmax.f32 %v1296_v17, %v7821_v13  ;;  %v7823_v8 = vld [vmem:[#allocation61_spill] sm:$0xff]  ;;  %v1605_v36 = vsub.f32 %v4653_v26, %v4902_v46  ;;  %v1949_v17 = vmul.f32 1.442695, %v1581_v30  ;;  %v7826_v26 = vld [vmem:[#allocation14_spill] sm:$0xff] }
 0x1cd   : > { %v1270_v12 = vmax.f32 %v1269_v25, %v4851_v10  ;;  %7820 = vst [vmem:[#allocation21_spill] sm:$0xff] %v5028_v3  ;;  %v5037_v4 = vpop.eup %3557  ;;  %3565 = vpow2.f32 %v1933_v51  ;;  %v1478_v2 = vsub.f32 %v7826_v26, %v5024_v60  ;;  %v1486_v26 = vsub.f32 %v4485_v61, %v5024_v60 }
 0x1ce   : > { %v2244_v19 = vadd.f32 %v5028_v3, %v2243_v23  ;;  %7822 = vst [vmem:[#allocation55_spill] sm:$0xff] %v5037_v4  ;;  %v5048_v23 = vpop.eup %3559  ;;  %3567 = vpow2.f32 %v1949_v17  ;;  %v1629_v61 = vsub.f32 %v4683_v63, %v4902_v46 }
 0x1cf   : > { %v1271_v25 = vmax.f32 %v1270_v12, %v4875_v53  ;;  %v1470_v12 = vsub.f32 %v7824_v39, %v5024_v60  ;;  %7825 = vst [vmem:[#allocation58_spill] sm:$0xff] %v5048_v23  ;;  %v1613_v39 = vsub.f32 %v4661_v5, %v4902_v46  ;;  %v5062_v3 = vpop.eup %3561  ;;  %v1743_v17 = vmul.f32 1.442695, %v1478_v2 }
 0x1d0   : > { %3374 = vmatmul.msk.bf16.gmra.mxu0 %vm412_vm0, %v7816_v48  ;;  %3390 = vmatmul.msk.bf16.gmra.mxu1 %vm412_vm0, %v7816_v48  ;;  %v2245_v22 = vadd.f32 %v5037_v4, %v2244_v19  ;;  %v1981_v4 = vmul.f32 1.442695, %v1597_v62  ;;  %7828 = vst [vmem:[#allocation10_spill] sm:$0xff] %v5062_v3 }
 0x1d1   : > { %3406 = vmatmul.msk.bf16.gmra.mxu2 %vm412_vm0, %v7816_v48  ;;  %v1272_v11 = vmax.f32 %v1271_v25, %v4885_v31  ;;  %v7827_v25 = vld [vmem:[#allocation65_spill] sm:$0xff]  ;;  %v1727_v62 = vmul.f32 1.442695, %v1470_v12 }
 0x1d2   : > { %3422 = vmatmul.msk.bf16.gmra.mxu3 %vm412_vm0, %v7816_v48  ;;  %v1298_v48 = vmax.f32 %v1297_v43, %v7823_v8  ;;  %v1965_v43 = vmul.f32 1.442695, %v1589_v16  ;;  %v2246_v56 = vadd.f32 %v5048_v23, %v2245_v22  ;;  %v1997_v16 = vmul.f32 1.442695, %v1605_v36  ;;  %v7829_v8 = vld [vmem:[#allocation68_spill] sm:$0xff]  ;;  %v7839_v23 = vld [vmem:[#allocation33_spill] sm:$0xff] }
 0x1d3   : > { %v1273_v51 = vmax.f32 %v1272_v11, %v4914_v57  ;;  %v1494_v36 = vsub.f32 %v4501_v1, %v5024_v60  ;;  %v2013_v11 = vmul.f32 1.442695, %v1613_v39  ;;  %v1637_v1 = vsub.f32 %v4702_v49, %v4902_v46 }
 0x1d4   : > { %v5057_v19 = vmax.f32 %v1298_v48, %v7827_v25  ;;  %v1621_v48 = vsub.f32 %v4675_v24, %v4902_v46  ;;  %v2247_v5 = vadd.f32 %v5062_v3, %v2246_v56  ;;  %v5072_v25 = vpop.eup %3563  ;;  %3569 = vpow2.f32 %v1965_v43 }
 0x1d5   : > { %7830 = vst [vmem:[#allocation14_spill] sm:$0xff] %v5072_v25  ;;  %v1274_v22 = vmax.f32 %v1273_v51, %v4955_v47  ;;  %3571 = vpow2.f32 %v1981_v4  ;;  %v5080_v24 = vpop.eup %3565  ;;  %v1502_v56 = vsub.f32 %v4512_v6, %v5024_v60  ;;  %v1759_v43 = vmul.f32 1.442695, %v1486_v26 }
 0x1d6   : > { %v2248_v30 = vadd.f32 %v5072_v25, %v2247_v5  ;;  %7831 = vst [vmem:[#allocation88_spill] sm:$0xff] %v5080_v24  ;;  %3573 = vpow2.f32 %v1997_v16  ;;  %v2029_v2 = vmul.f32 1.442695, %v1621_v48  ;;  %v5088_v63 = vpop.eup %3567  ;;  %v1510_v39 = vsub.f32 %v4530_v15, %v5024_v60  ;;  %v7832_v48 = vld [vmem:[#allocation25_spill] sm:$0xff] }
 0x1d7   : > { %v1275_v12 = vmax.f32 %v1274_v22, %v4996_v50  ;;  %3575 = vpow2.f32 %v1727_v62  ;;  %v1775_v16 = vmul.f32 1.442695, %v1494_v36  ;;  %v1645_v6 = vsub.f32 %v4712_v45, %v4902_v46  ;;  %v7833_v62 = vld [vmem:[#allocation27_spill] sm:$0xff]  ;;  %v5104_v36 = vpop.f32.mrf.mxu2 }
 0x1d8   : > { %v2249_v51 = vadd.f32 %v5080_v24, %v2248_v30  ;;  %3577 = vpow2.f32 %v1743_v17  ;;  %v2045_v26 = vmul.f32 1.442695, %v1629_v61  ;;  %v1653_v5 = vsub.f32 %v4734_v35, %v4902_v46 }
 0x1d9   : > { %v1276_v4 = vmax.f32 %v1275_v12, %v5050_v28  ;;  %3579 = vpow2.f32 %v2013_v11  ;;  %v1518_v15 = vsub.f32 %v7833_v62, %v5024_v60  ;;  %v1791_v22 = vmul.f32 1.442695, %v1502_v56  ;;  %v7836_v56 = vld [vmem:[#allocation29_spill] sm:$0xff] }
 0x1da   : > { %v2250_v49 = vadd.f32 %v5088_v63, %v2249_v51  ;;  %v5098_v30 = vpop.eup %3569  ;;  %3581 = vpow2.f32 %v1759_v43  ;;  %v1661_v17 = vsub.f32 %v4748_v38, %v4902_v46  ;;  %v2061_v35 = vmul.f32 1.442695, %v1637_v1 }
 0x1db   : > { %v5110_v45 = vpop.eup %3571  ;;  %3583 = vpow2.f32 %v2029_v2  ;;  %v1669_v12 = vsub.f32 %v4772_v52, %v4902_v46  ;;  %v1526_v43 = vsub.f32 %v7836_v56, %v5024_v60  ;;  %v1807_v51 = vmul.f32 1.442695, %v1510_v39 }
 0x1dc   : > { %7834 = vst [vmem:[#allocation25_spill] sm:$0xff] %v5110_v45  ;;  %v2251_v61 = vadd.f32 %v5098_v30, %v2250_v49  ;;  %v5115_v11 = vpop.eup %3573  ;;  %3585 = vpow2.f32 %v1775_v16  ;;  %v2077_v3 = vmul.f32 1.442695, %v1645_v6  ;;  %v1277_v1 = vmax.f32 %v1276_v4, %v5104_v36  ;;  %v5131_v16 = vpop.f32.mrf.mxu3 }
 0x1dd   : > { %7835 = vst [vmem:[#allocation27_spill] sm:$0xff] %v5115_v11  ;;  %v5121_v62 = vpop.eup %3575  ;;  %3587 = vpow2.f32 %v2045_v26  ;;  %v2093_v49 = vmul.f32 1.442695, %v1653_v5  ;;  %v1534_v24 = vsub.f32 %v7839_v23, %v5024_v60  ;;  %v1823_v52 = vmul.f32 1.442695, %v1518_v15  ;;  %v7845_v15 = vld [vmem:[#allocation37_spill] sm:$0xff] }
 0x1de   : > { %7837 = vst [vmem:[#allocation29_spill] sm:$0xff] %v5121_v62  ;;  %v2252_v38 = vadd.f32 %v5110_v45, %v2251_v61  ;;  %v5125_v2 = vpop.eup %3577  ;;  %3589 = vpow2.f32 %v1791_v22  ;;  %v1278_v26 = vrot.slane %v1277_v1, 4  ;;  %v7843_v61 = vld [vmem:[#allocation71_spill] sm:$0xff]  ;;  %v7844_v5 = vmax.f32 %v5057_v19, %v7829_v8  ;;  %v7848_v19 = vld [vmem:[#allocation40_spill] sm:$0xff] }
 0x1df   : > { %7838 = vst [vmem:[#allocation89_spill] sm:$0xff] %v5125_v2  ;;  %v5129_v25 = vpop.eup %3579  ;;  %3591 = vpow2.f32 %v2061_v35  ;;  %v2274_v6 = vadd.f32 %v5125_v2, %v5121_v62  ;;  %v1542_v22 = vsub.f32 %v7845_v15, %v5024_v60  ;;  %v1839_v56 = vmul.f32 1.442695, %v1526_v43 }
 0x1e0   : > { %3375 = vmatmul.msk.bf16.gmra.mxu0 %vm412_vm0, %v7832_v48  ;;  %3391 = vmatmul.msk.bf16.gmra.mxu1 %vm412_vm0, %v7832_v48  ;;  %7840 = vst [vmem:[#allocation33_spill] sm:$0xff] %v5129_v25  ;;  %v2253_v39 = vadd.f32 %v5115_v11, %v2252_v38  ;;  %v5136_v4 = vpop.eup %3581  ;;  %v5142_v23 = vmax.f32 %v7844_v5, %v7843_v61  ;;  %3593 = vpow2.f32 %v1807_v51  ;;  %v2109_v38 = vmul.f32 1.442695, %v1661_v17 }
 0x1e1   : > { %3407 = vmatmul.msk.bf16.gmra.mxu2 %vm412_vm0, %v7832_v48  ;;  %7841 = vst [vmem:[#allocation90_spill] sm:$0xff] %v5131_v16  ;;  %v5146_v35 = vpop.eup %3583  ;;  %3595 = vpow2.f32 %v2077_v3  ;;  %v2275_v62 = vadd.f32 %v5136_v4, %v2274_v6  ;;  %v2125_v45 = vmul.f32 1.442695, %v1669_v12  ;;  %v1550_v5 = vsub.f32 %v7848_v19, %v5024_v60 }
 0x1e2   : > { %7842 = vst [vmem:[#allocation91_spill] sm:$0xff] %v5136_v4  ;;  %v2254_v2 = vadd.f32 %v5129_v25, %v2253_v39  ;;  %v5150_v11 = vpop.eup %3585  ;;  %3597 = vpow2.f32 %v1823_v52  ;;  %v1855_v61 = vmul.f32 1.442695, %v1534_v24  ;;  %v1279_v17 = vmax.f32 %v1277_v1, %v1278_v26  ;;  %v7851_v39 = vld [vmem:[#allocation74_spill] sm:$0xff] }
 0x1e3   : > { %7846 = vst [vmem:[#allocation37_spill] sm:$0xff] %v5146_v35  ;;  %v5154_v8 = vpop.eup %3587  ;;  %3599 = vpow2.f32 %v2093_v49  ;;  %v2276_v3 = vadd.f32 %v5150_v11, %v2275_v62  ;;  %v1302_v6 = vmax.f32 %v5142_v23, %v7851_v39  ;;  %v1558_v12 = vsub.f32 %v4595_v55, %v5024_v60 }
 0x1e4   : > { %7847 = vst [vmem:[#allocation92_spill] sm:$0xff] %v5150_v11  ;;  %v2255_v43 = vadd.f32 %v5146_v35, %v2254_v2  ;;  %v5158_v51 = vpop.eup %3589  ;;  %3601 = vpow2.f32 %v1839_v56  ;;  %v1871_v15 = vmul.f32 1.442695, %v1542_v22  ;;  %v7853_v24 = vsub.f32 %v4788_v7, %v4902_v46  ;;  %v7866_v11 = vld [vmem:[#allocation77_spill] sm:$0xff] }
 0x1e5   : > { %7849 = vst [vmem:[#allocation40_spill] sm:$0xff] %v5154_v8  ;;  %v5164_v52 = vpop.eup %3591  ;;  %3603 = vpow2.f32 %v2109_v38  ;;  %v2277_v1 = vadd.f32 %v5158_v51, %v2276_v3  ;;  %v7855_v26 = vsub.f32 %v4810_v44, %v4902_v46  ;;  %v1566_v55 = vsub.f32 %v4602_v9, %v5024_v60 }
 0x1e6   : > { %7850 = vst [vmem:[#allocation93_spill] sm:$0xff] %v5158_v51  ;;  %v2141_v2 = vmul.f32 1.442695, %v7853_v24  ;;  %v2256_v62 = vadd.f32 %v5154_v8, %v2255_v43  ;;  %v5171_v49 = vpop.eup %3593  ;;  %3605 = vpow2.f32 %v1855_v61  ;;  %v1887_v22 = vmul.f32 1.442695, %v1550_v5 }
 0x1e7   : > { %7852 = vst [vmem:[#allocation74_spill] sm:$0xff] %v5164_v52  ;;  %v2157_v23 = vmul.f32 1.442695, %v7855_v26  ;;  %v5178_v56 = vpop.eup %3595  ;;  %3607 = vpow2.f32 %v2125_v45  ;;  %v2278_v38 = vadd.f32 %v5171_v49, %v2277_v1  ;;  %v1280_v19 = vrot.slane %v1279_v17, 2  ;;  %v5195_v1 = vpop.f32.mrf.mxu3  ;;  %3423 = vmatmul.msk.bf16.gmra.mxu3 %vm412_vm0, %v7832_v48 }
 0x1e8   : > { %7854 = vst [vmem:[#allocation94_spill] sm:$0xff] %v5171_v49  ;;  %v2257_v7 = vadd.f32 %v5164_v52, %v2256_v62  ;;  %v5182_v43 = vpop.eup %3597  ;;  %v1717_v3 = vsub.f32 %v4877_v42, %v4902_v46  ;;  %v1574_v44 = vsub.f32 %v4614_v27, %v5024_v60  ;;  %3609 = vpow2.f32 %v1871_v15  ;;  %v7863_v15 = vld [vmem:[#allocation49_spill] sm:$0xff]  ;;  %v7875_v49 = vld [vmem:[#allocation59_spill] sm:$0xff] }
 0x1e9   : > { %7856 = vst [vmem:[#allocation95_spill] sm:$0xff] %v5178_v56  ;;  %v1903_v9 = vmul.f32 1.442695, %v1558_v12  ;;  %v5188_v61 = vpop.eup %3599  ;;  %3611 = vpow2.f32 %v2141_v2  ;;  %v7859_v45 = vsub.f32 %v4823_v32, %v4902_v46  ;;  %v2279_v62 = vadd.f32 %v5182_v43, %v2278_v38 }
 0x1ea   : > { %7857 = vst [vmem:[#allocation96_spill] sm:$0xff] %v5182_v43  ;;  %v2258_v24 = vadd.f32 %v5178_v56, %v2257_v7  ;;  %v5199_v42 = vpop.eup %3601  ;;  %v7862_v27 = vsub.f32 %v4842_v41, %v4902_v46  ;;  %v1582_v2 = vsub.f32 %v7863_v15, %v5024_v60  ;;  %3613 = vpow2.f32 %v1887_v22  ;;  %v7867_v41 = vld [vmem:[#allocation51_spill] sm:$0xff] }
 0x1eb   : > { %7858 = vst [vmem:[#allocation97_spill] sm:$0xff] %v5188_v61  ;;  %v2173_v5 = vmul.f32 1.442695, %v7859_v45  ;;  %v1919_v32 = vmul.f32 1.442695, %v1566_v55  ;;  %v5206_v26 = vpop.eup %3603  ;;  %3615 = vpow2.f32 %v2157_v23  ;;  %v2280_v38 = vadd.f32 %v5199_v42, %v2279_v62 }
 0x1ec   : > { %7860 = vst [vmem:[#allocation98_spill] sm:$0xff] %v5195_v1  ;;  %v2189_v12 = vmul.f32 1.442695, %v7862_v27  ;;  %v2259_v7 = vadd.f32 %v5188_v61, %v2258_v24  ;;  %v1281_v45 = vmax.f32 %v1279_v17, %v1280_v19  ;;  %v5210_v48 = vpop.eup %3605  ;;  %v1303_v4 = vmax.f32 %v1302_v6, %v7866_v11  ;;  %v7871_v6 = vld [vmem:[#allocation54_spill] sm:$0xff]  ;;  %v7881_v61 = vld [vmem:[#allocation11_spill] sm:$0xff] }
 0x1ed   : > { %7861 = vst [vmem:[#allocation99_spill] sm:$0xff] %v5199_v42  ;;  %v1590_v27 = vsub.f32 %v7867_v41, %v5024_v60  ;;  %3617 = vpow2.f32 %v1903_v9  ;;  %v1935_v35 = vmul.f32 1.442695, %v1574_v44  ;;  %v5215_v15 = vpop.eup %3607  ;;  %v7869_v23 = vsub.f32 %v4857_v54, %v4902_v46 }
 0x1ee   : > { %7864 = vst [vmem:[#allocation49_spill] sm:$0xff] %v5206_v26  ;;  %3619 = vpow2.f32 %v2173_v5  ;;  %v2260_v22 = vadd.f32 %v5206_v26, %v2259_v7  ;;  %v2281_v17 = vadd.f32 %v5210_v48, %v2280_v38  ;;  %v5222_v19 = vpop.eup %3609  ;;  %v2221_v24 = vmul.f32 1.442695, %v1717_v3  ;;  %v7872_v7 = vld [vmem:[#allocation79_spill] sm:$0xff]  ;;  %v7885_v26 = vld [vmem:[#allocation69_spill] sm:$0xff] }
 0x1ef   : > { %7865 = vst [vmem:[#allocation100_spill] sm:$0xff] %v5210_v48  ;;  %v2205_v55 = vmul.f32 1.442695, %v7869_v23  ;;  %v1598_v62 = vsub.f32 %v7871_v6, %v5024_v60  ;;  %3621 = vpow2.f32 %v1919_v32  ;;  %v1951_v9 = vmul.f32 1.442695, %v1582_v2  ;;  %v5226_v44 = vpop.eup %3611  ;;  %v7873_v23 = vld [vmem:[#allocation56_spill] sm:$0xff] }
 0x1f0   : > { %7868 = vst [vmem:[#allocation77_spill] sm:$0xff] %v5215_v15  ;;  %3623 = vpow2.f32 %v2189_v12  ;;  %v2261_v5 = vadd.f32 %v5215_v15, %v2260_v22  ;;  %v2282_v54 = vadd.f32 %v5222_v19, %v2281_v17  ;;  %v1282_v46 = vrot.slane %v1281_v45, 1  ;;  %v5230_v41 = vpop.eup %3613  ;;  %v7874_v22 = vld [vmem:[#allocation81_spill] sm:$0xff]  ;;  %v7884_v15 = vld [vmem:[#allocation8_spill] sm:$0xff] }
 0x1f1   : > { %7870 = vst [vmem:[#allocation51_spill] sm:$0xff] %v5222_v19  ;;  %v1304_v38 = vmax.f32 %v1303_v4, %v7872_v7  ;;  %v1606_v3 = vsub.f32 %v7873_v23, %v5024_v60  ;;  %3625 = vpow2.f32 %v1935_v35  ;;  %v1967_v25 = vmul.f32 1.442695, %v1590_v27  ;;  %v5235_v6 = vpop.eup %3615 }
 0x1f2   : > { %3627 = vpow2.f32 %v2205_v55  ;;  %v2262_v2 = vadd.f32 %v5226_v44, %v2261_v5  ;;  %v2283_v12 = vadd.f32 %v5230_v41, %v2282_v54  ;;  %v1614_v51 = vsub.f32 %v7875_v49, %v5024_v60  ;;  %v7876_v54 = vld [vmem:[#allocation83_spill] sm:$0xff] }
 0x1f3   : > { %v5239_v32 = vpop.eup %3617  ;;  %v1305_v17 = vmax.f32 %v1304_v38, %v7874_v22  ;;  %3629 = vpow2.f32 %v1951_v9  ;;  %v1983_v4 = vmul.f32 1.442695, %v1598_v62  ;;  %v5248_v55 = vmax.f32 %v1281_v45, %v1282_v46  ;;  %v7877_v38 = vld [vmem:[#allocation62_spill] sm:$0xff]  ;;  %v7879_v46 = vld [vmem:[#allocation84_spill] sm:$0xff] }
 0x1f4   : > { %v5244_v52 = vpop.eup %3619  ;;  %3631 = vpow2.f32 %v2221_v24  ;;  %v2263_v35 = vadd.f32 %v5235_v6, %v2262_v2  ;;  %v2284_v27 = vadd.f32 %v5239_v32, %v2283_v12  ;;  %v1622_v8 = vsub.f32 %v7877_v38, %v5024_v60  ;;  %v7878_v24 = vld [vmem:[#allocation64_spill] sm:$0xff] }
 0x1f5   : > { %v5250_v5 = vpop.eup %3621  ;;  %v1306_v23 = vmax.f32 %v1305_v17, %v7876_v54  ;;  %3633 = vpow2.f32 %v1967_v25  ;;  %v1999_v49 = vmul.f32 1.442695, %v1606_v3  ;;  %v1630_v2 = vsub.f32 %v7878_v24, %v5024_v60  ;;  %v7880_v17 = vld [vmem:[#allocation67_spill] sm:$0xff]  ;;  %v7893_v22 = vld [vmem:[#allocation20_spill] sm:$0xff] }
 0x1f6   : > { %v5255_v9 = vpop.eup %3623  ;;  %v2264_v62 = vadd.f32 %v5244_v52, %v2263_v35  ;;  %v2285_v12 = vadd.f32 %v5250_v5, %v2284_v27  ;;  %v1638_v43 = vsub.f32 %v7880_v17, %v5024_v60  ;;  %3635 = vpow2.f32 %v1983_v4  ;;  %v7882_v27 = vld [vmem:[#allocation85_spill] sm:$0xff] }
 0x1f7   : > { %v5261_v45 = vpop.eup %3625  ;;  %v1307_v42 = vmax.f32 %v1306_v23, %v7879_v46  ;;  %v2015_v38 = vmul.f32 1.442695, %v1614_v51  ;;  %v1471_v24 = vsub.f32 %v7881_v61, %v5248_v55  ;;  %3637 = vpow2.f32 %v1999_v49  ;;  %v7883_v46 = vld [vmem:[#allocation15_spill] sm:$0xff]  ;;  %v7887_v49 = vld [vmem:[#allocation72_spill] sm:$0xff] }
 0x1f8   : > { %v5266_v25 = vpop.eup %3627  ;;  %v2265_v3 = vadd.f32 %v5255_v9, %v2264_v62  ;;  %v2286_v35 = vadd.f32 %v5261_v45, %v2285_v12  ;;  %v2031_v23 = vmul.f32 1.442695, %v1622_v8  ;;  %v1479_v17 = vsub.f32 %v7883_v46, %v5248_v55 }
 0x1f9   : > { %v5272_v56 = vpop.eup %3629  ;;  %v1308_v19 = vmax.f32 %v1307_v42, %v7882_v27  ;;  %v2047_v48 = vmul.f32 1.442695, %v1630_v2  ;;  %v1646_v54 = vsub.f32 %v7885_v26, %v5024_v60  ;;  %3639 = vpow2.f32 %v2015_v38 }
 0x1fa   : > { %v5277_v4 = vpop.eup %3631  ;;  %v2266_v51 = vadd.f32 %v5266_v25, %v2265_v3  ;;  %v2287_v62 = vadd.f32 %v5272_v56, %v2286_v35  ;;  %v2063_v42 = vmul.f32 1.442695, %v1638_v43  ;;  %v1654_v46 = vsub.f32 %v7887_v49, %v5024_v60  ;;  %v7890_v43 = vld [vmem:[#allocation75_spill] sm:$0xff] }
 0x1fb   : > { %v5281_v12 = vpop.eup %3633  ;;  %v1309_v61 = vmax.f32 %v1308_v19, %v7884_v15  ;;  %v1729_v2 = vmul.f32 1.442695, %v1471_v24  ;;  %3641 = vpow2.f32 %v2031_v23  ;;  %v7889_v19 = vld [vmem:[#allocation18_spill] sm:$0xff]  ;;  %v1745_v26 = vmul.f32 1.442695, %v1479_v17  ;;  %v7892_v49 = vld [vmem:[#allocation35_spill] sm:$0xff] }
 0x1fc   : > { %v5287_v8 = vadd.f32 %v5277_v4, %v2266_v51  ;;  %v2288_v3 = vadd.f32 %v5281_v12, %v2287_v62  ;;  %v5292_v27 = vpop.eup %3635  ;;  %v1487_v15 = vsub.f32 %v7889_v19, %v5248_v55  ;;  %v1662_v38 = vsub.f32 %v7890_v43, %v5024_v60  ;;  %v7894_v23 = vld [vmem:[#allocation76_spill] sm:$0xff] }
 0x1fd   : > { %7888 = vst [vmem:[#allocation79_spill] sm:$0xff] %v5292_v27  ;;  %v1310_v35 = vmax.f32 %v1309_v61, %v4936_v0  ;;  %3643 = vpow2.f32 %v2047_v48  ;;  %v2079_v24 = vmul.f32 1.442695, %v1646_v54  ;;  %v1495_v61 = vsub.f32 %v7893_v22, %v5248_v55  ;;  %v7897_v54 = vld [vmem:[#allocation78_spill] sm:$0xff] }
 0x1fe   : > { %7886 = vst [vmem:[#allocation54_spill] sm:$0xff] %v5287_v8  ;;  %v2289_v51 = vadd.f32 %v5292_v27, %v2288_v3  ;;  %v5300_v8 = vpop.eup %3637  ;;  %3645 = vpow2.f32 %v2063_v42  ;;  %v1670_v0 = vsub.f32 %v7894_v23, %v5024_v60  ;;  %v2095_v19 = vmul.f32 1.442695, %v1654_v46  ;;  %v7896_v3 = vld [vmem:[#allocation23_spill] sm:$0xff] }
 0x1ff   : > { %7891 = vst [vmem:[#allocation56_spill] sm:$0xff] %v5300_v8  ;;  %v1311_v62 = vmax.f32 %v1310_v35, %v7892_v49  ;;  %3647 = vpow2.f32 %v1729_v2  ;;  %v5308_v43 = vpop.eup %3639  ;;  %v1503_v27 = vsub.f32 %v7896_v3, %v5248_v55  ;;  %v1761_v42 = vmul.f32 1.442695, %v1487_v15  ;;  %v7899_v2 = vld [vmem:[#allocation26_spill] sm:$0xff] }
 0x200   : > { %v2290_v17 = vadd.f32 %v5300_v8, %v2289_v51  ;;  %7895 = vst [vmem:[#allocation59_spill] sm:$0xff] %v5308_v43  ;;  %3649 = vpow2.f32 %v1745_v26  ;;  %v1678_v35 = vsub.f32 %v7897_v54, %v5024_v60  ;;  %v2111_v22 = vmul.f32 1.442695, %v1662_v38  ;;  %v7901_v26 = vld [vmem:[#allocation80_spill] sm:$0xff] }
 0x201   : > { %v1312_v48 = vmax.f32 %v1311_v62, %v5021_v58  ;;  %v5316_v23 = vpop.eup %3641  ;;  %3651 = vpow2.f32 %v2079_v24  ;;  %v1511_v51 = vsub.f32 %v7899_v2, %v5248_v55  ;;  %v1777_v62 = vmul.f32 1.442695, %v1495_v61  ;;  %v7904_v24 = vld [vmem:[#allocation30_spill] sm:$0xff] }
 0x202   : > { %v2291_v49 = vadd.f32 %v5308_v43, %v2290_v17  ;;  %7898 = vst [vmem:[#allocation62_spill] sm:$0xff] %v5316_v23  ;;  %v1686_v15 = vsub.f32 %v7901_v26, %v5024_v60  ;;  %3653 = vpow2.f32 %v2095_v19  ;;  %v2127_v3 = vmul.f32 1.442695, %v1670_v0  ;;  %v7903_v17 = vld [vmem:[#allocation82_spill] sm:$0xff] }
 0x203   : > { %v1313_v46 = vmax.f32 %v1312_v48, %v5131_v16  ;;  %v5321_v8 = vpop.eup %3643  ;;  %v1694_v43 = vsub.f32 %v7903_v17, %v5024_v60  ;;  %v1519_v48 = vsub.f32 %v7904_v24, %v5248_v55  ;;  %3655 = vpow2.f32 %v1761_v42  ;;  %v7908_v16 = vld [vmem:[#allocation86_spill] sm:$0xff] }
 0x204   : > { %7900 = vst [vmem:[#allocation64_spill] sm:$0xff] %v5321_v8  ;;  %v2292_v38 = vadd.f32 %v5316_v23, %v2291_v49  ;;  %v5326_v54 = vpop.eup %3645  ;;  %v1793_v2 = vmul.f32 1.442695, %v1503_v27  ;;  %3657 = vpow2.f32 %v2111_v22  ;;  %v2143_v58 = vmul.f32 1.442695, %v1678_v35  ;;  %v7907_v49 = vld [vmem:[#allocation34_spill] sm:$0xff] }
 0x205   : > { %7902 = vst [vmem:[#allocation67_spill] sm:$0xff] %v5326_v54  ;;  %v5332_v61 = vpop.eup %3647  ;;  %v1314_v0 = vmax.f32 %v1313_v46, %v5195_v1  ;;  %v1527_v23 = vsub.f32 %v7907_v49, %v5248_v55  ;;  %3659 = vpow2.f32 %v1777_v62  ;;  %v1809_v17 = vmul.f32 1.442695, %v1511_v51 }
 0x206   : > { %7905 = vst [vmem:[#allocation11_spill] sm:$0xff] %v5332_v61  ;;  %v2293_v26 = vadd.f32 %v5321_v8, %v2292_v38  ;;  %v5336_v19 = vpop.eup %3649  ;;  %v1718_v24 = vsub.f32 %v7908_v16, %v5024_v60  ;;  %3661 = vpow2.f32 %v2127_v3  ;;  %v2159_v27 = vmul.f32 1.442695, %v1686_v15  ;;  %v7910_v38 = vld [vmem:[#allocation38_spill] sm:$0xff] }
 0x207   : > { %7906 = vst [vmem:[#allocation15_spill] sm:$0xff] %v5336_v19  ;;  %v5343_v22 = vpop.eup %3651  ;;  %v2175_v35 = vmul.f32 1.442695, %v1694_v43  ;;  %v1535_v46 = vsub.f32 %v7910_v38, %v5248_v55  ;;  %3663 = vpow2.f32 %v1793_v2  ;;  %v1825_v8 = vmul.f32 1.442695, %v1519_v48 }
 0x208   : > { %v2294_v42 = vadd.f32 %v5326_v54, %v2293_v26  ;;  %7909 = vst [vmem:[#allocation69_spill] sm:$0xff] %v5343_v22  ;;  %v5347_v1 = vpop.eup %3653  ;;  %3665 = vpow2.f32 %v2143_v58  ;;  %v2311_v16 = vadd.f32 %v5336_v19, %v5332_v61  ;;  %v1315_v62 = vrot.slane %v1314_v0, 4  ;;  %v7914_v26 = vld [vmem:[#allocation42_spill] sm:$0xff]  ;;  %v7916_v61 = vld [vmem:[#allocation45_spill] sm:$0xff] }
 0x209   : > { %7911 = vst [vmem:[#allocation72_spill] sm:$0xff] %v5347_v1  ;;  %v5352_v15 = vpop.eup %3655  ;;  %v7913_v3 = vsub.f32 %v4847_v21, %v5024_v60  ;;  %v1543_v49 = vsub.f32 %v7914_v26, %v5248_v55  ;;  %3667 = vpow2.f32 %v1809_v17  ;;  %v1841_v48 = vmul.f32 1.442695, %v1527_v23 }
 0x20a   : > { %v2295_v51 = vadd.f32 %v5343_v22, %v2294_v42  ;;  %7912 = vst [vmem:[#allocation18_spill] sm:$0xff] %v5352_v15  ;;  %v5359_v2 = vpop.eup %3657  ;;  %3669 = vpow2.f32 %v2159_v27  ;;  %v2312_v42 = vadd.f32 %v5352_v15, %v2311_v16  ;;  %v1316_v38 = vmax.f32 %v1314_v0, %v1315_v62  ;;  %v7920_v0 = vld [vmem:[#allocation47_spill] sm:$0xff] }
 0x20b   : > { %v2191_v43 = vmul.f32 1.442695, %v7913_v3  ;;  %v5363_v19 = vpop.eup %3659  ;;  %v1551_v54 = vsub.f32 %v7916_v61, %v5248_v55  ;;  %3671 = vpow2.f32 %v1825_v8  ;;  %v1857_v21 = vmul.f32 1.442695, %v1535_v46 }
 0x20c   : > { %v2296_v58 = vadd.f32 %v5347_v1, %v2295_v51  ;;  %7915 = vst [vmem:[#allocation75_spill] sm:$0xff] %v5363_v19  ;;  %v5367_v3 = vpop.eup %3661  ;;  %3673 = vpow2.f32 %v2175_v35  ;;  %v7918_v23 = vsub.f32 %v4860_v34, %v5024_v60  ;;  %v2313_v51 = vadd.f32 %v5363_v19, %v2312_v42 }
 0x20d   : > { %7917 = vst [vmem:[#allocation20_spill] sm:$0xff] %v5367_v3  ;;  %v5374_v16 = vpop.eup %3663  ;;  %v1559_v62 = vsub.f32 %v7920_v0, %v5248_v55  ;;  %3675 = vpow2.f32 %v1841_v48  ;;  %v1873_v61 = vmul.f32 1.442695, %v1543_v49  ;;  %v1317_v8 = vrot.slane %v1316_v38, 2 }
 0x20e   : > { %v2207_v17 = vmul.f32 1.442695, %v7918_v23  ;;  %v2297_v27 = vadd.f32 %v5359_v2, %v2296_v58  ;;  %7919 = vst [vmem:[#allocation76_spill] sm:$0xff] %v5374_v16  ;;  %v5378_v46 = vpop.eup %3665  ;;  %3677 = vpow2.f32 %v2191_v43  ;;  %v2223_v35 = vmul.f32 1.442695, %v1718_v24  ;;  %v7922_v58 = vld [vmem:[#allocation50_spill] sm:$0xff] }
 0x20f   : > { %v2314_v34 = vadd.f32 %v5374_v16, %v2313_v51  ;;  %v5382_v60 = vpop.eup %3667  ;;  %v1567_v42 = vsub.f32 %v7922_v58, %v5248_v55  ;;  %3679 = vpow2.f32 %v1857_v21  ;;  %v1889_v23 = vmul.f32 1.442695, %v1551_v54  ;;  %v7924_v24 = vld [vmem:[#allocation53_spill] sm:$0xff]  ;;  %v5400_v58 = vpop.f32.mrf.mxu0 }
 0x210   : > { %v2298_v26 = vadd.f32 %v5367_v3, %v2297_v27  ;;  %7921 = vst [vmem:[#allocation23_spill] sm:$0xff] %v5382_v60  ;;  %v5386_v19 = vpop.eup %3669  ;;  %3681 = vpow2.f32 %v2207_v17  ;;  %v1575_v27 = vsub.f32 %v7924_v24, %v5248_v55  ;;  %v1905_v51 = vmul.f32 1.442695, %v1559_v62  ;;  %v7925_v21 = vld [vmem:[#allocation57_spill] sm:$0xff]  ;;  %v5438_v3 = vpop.f32.mrf.mxu3 }
 0x211   : > { %v2315_v48 = vadd.f32 %v5382_v60, %v2314_v34  ;;  %v5390_v43 = vpop.eup %3671  ;;  %3683 = vpow2.f32 %v1873_v61  ;;  %v1318_v0 = vmax.f32 %v1316_v38, %v1317_v8  ;;  %v1583_v17 = vsub.f32 %v7925_v21, %v5248_v55  ;;  %7926 = vst [vmem:[#allocation26_spill] sm:$0xff] %v5400_v58  ;;  %v5402_v34 = vpop.f32.mrf.mxu1  ;;  %v7929_v61 = vld [vmem:[#allocation60_spill] sm:$0xff] }
 0x212   : > { %v2299_v49 = vadd.f32 %v5378_v46, %v2298_v26  ;;  %7923 = vst [vmem:[#allocation78_spill] sm:$0xff] %v5390_v43  ;;  %v5394_v15 = vpop.eup %3673  ;;  %3685 = vpow2.f32 %v2223_v35  ;;  %v1591_v62 = vsub.f32 %v7929_v61, %v5248_v55  ;;  %v1921_v38 = vmul.f32 1.442695, %v1567_v42 }
 0x213   : > { %v2316_v26 = vadd.f32 %v5390_v43, %v2315_v48  ;;  %7927 = vst [vmem:[#allocation80_spill] sm:$0xff] %v5402_v34  ;;  %v5404_v60 = vpop.eup %3675  ;;  %3687 = vpow2.f32 %v1889_v23  ;;  %v7932_v34 = vld [vmem:[#allocation66_spill] sm:$0xff]  ;;  %v1937_v16 = vmul.f32 1.442695, %v1575_v27  ;;  %v1319_v43 = vrot.slane %v1318_v0, 1 }
 0x214   : > { %v2300_v54 = vadd.f32 %v5386_v19, %v2299_v49  ;;  %7928 = vst [vmem:[#allocation82_spill] sm:$0xff] %v5404_v60  ;;  %v5408_v8 = vpop.eup %3677  ;;  %v7930_v49 = vld [vmem:[#allocation63_spill] sm:$0xff]  ;;  %v1607_v58 = vsub.f32 %v7932_v34, %v5248_v55  ;;  %3689 = vpow2.f32 %v1905_v51  ;;  %v7933_v23 = vld [vmem:[#allocation70_spill] sm:$0xff]  ;;  %v1953_v1 = vmul.f32 1.442695, %v1583_v17 }
 0x215   : > { %v1599_v24 = vsub.f32 %v7930_v49, %v5248_v55  ;;  %v2317_v48 = vadd.f32 %v5404_v60, %v2316_v26  ;;  %v5414_v21 = vpop.eup %3679  ;;  %v7935_v26 = vld [vmem:[#allocation73_spill] sm:$0xff]  ;;  %v1631_v51 = vsub.f32 %v4768_v59, %v5248_v55  ;;  %3691 = vpow2.f32 %v1921_v38  ;;  %7937 = vst [vmem:[#allocation38_spill] sm:$0xff] %v5438_v3  ;;  %v4067_v3 = vld [vmem:[%s4347_s4 + $0x60] sm:$0xff] }
 0x216   : > { %v2301_v35 = vadd.f32 %v5394_v15, %v2300_v54  ;;  %7931 = vst [vmem:[#allocation30_spill] sm:$0xff] %v5414_v21  ;;  %v5418_v61 = vpop.eup %3681  ;;  %v1615_v54 = vsub.f32 %v7933_v23, %v5248_v55  ;;  %v1623_v60 = vsub.f32 %v7935_v26, %v5248_v55  ;;  %v1969_v27 = vmul.f32 1.442695, %v1591_v62 }
 0x217   : > { %v2318_v49 = vadd.f32 %v5414_v21, %v2317_v48  ;;  %v5424_v22 = vpop.eup %3683  ;;  %v1639_v23 = vsub.f32 %v4786_v29, %v5248_v55  ;;  %v1985_v17 = vmul.f32 1.442695, %v1599_v24  ;;  %v5436_v21 = vpop.f32.mrf.mxu2  ;;  %v1647_v59 = vsub.f32 %v4816_v40, %v5248_v55 }
 0x218   : > { %v2302_v42 = vadd.f32 %v5408_v8, %v2301_v35  ;;  %7934 = vst [vmem:[#allocation34_spill] sm:$0xff] %v5424_v22  ;;  %v5430_v34 = vpop.eup %3685  ;;  %3693 = vpow2.f32 %v1937_v16  ;;  %v2001_v62 = vmul.f32 1.442695, %v1607_v58  ;;  %v5444_v38 = vmax.f32 %v1318_v0, %v1319_v43 }
 0x219   : > { %v2319_v48 = vadd.f32 %v5424_v22, %v2318_v49  ;;  %7936 = vst [vmem:[#allocation86_spill] sm:$0xff] %v5436_v21  ;;  %v5440_v26 = vpop.eup %3687  ;;  %3695 = vpow2.f32 %v1953_v1  ;;  %v2017_v29 = vmul.f32 1.442695, %v1615_v54  ;;  %v5450_v49 = vpop.f32.mrf.mxu0  ;;  %3376 = vmatmul.msk.bf16.gmra.mxu0 %vm412_vm0, %v4067_v3  ;;  %v1655_v16 = vsub.f32 %v4832_v20, %v5248_v55 }
 0x21a   : > { %v2303_v35 = vadd.f32 %v5418_v61, %v2302_v42  ;;  %7939 = vst [vmem:[#allocation45_spill] sm:$0xff] %v5450_v49  ;;  %v5452_v21 = vpop.f32.mrf.mxu1  ;;  %3392 = vmatmul.msk.bf16.gmra.mxu1 %vm412_vm0, %v4067_v3  ;;  %v5457_v40 = vpop.eup %3689  ;;  %3697 = vpow2.f32 %v1969_v27  ;;  %v2033_v43 = vmul.f32 1.442695, %v1623_v60  ;;  %v1663_v1 = vsub.f32 %v4851_v10, %v5248_v55  ;;  %v7942_v60 = vld [vmem:[#allocation17_spill] sm:$0xff] }
 0x21b   : > { %v2320_v24 = vadd.f32 %v5440_v26, %v2319_v48  ;;  %7940 = vst [vmem:[#allocation47_spill] sm:$0xff] %v5452_v21  ;;  %3699 = vpow2.f32 %v1985_v17  ;;  %v2049_v0 = vmul.f32 1.442695, %v1631_v51  ;;  %v5464_v54 = vpop.eup %3691  ;;  %v7941_v48 = vld [vmem:[#allocation12_spill] sm:$0xff]  ;;  %v2081_v21 = vmul.f32 1.442695, %v1647_v59 }
 0x21c   : > { %v5447_v42 = vadd.f32 %v5430_v34, %v2303_v35  ;;  %3701 = vpow2.f32 %v2001_v62  ;;  %v2065_v35 = vmul.f32 1.442695, %v1639_v23  ;;  %v1480_v27 = vsub.f32 %v7942_v60, %v5444_v38 }
 0x21d   : > { %v2321_v58 = vadd.f32 %v5457_v40, %v2320_v24  ;;  %3703 = vpow2.f32 %v2017_v29  ;;  %v1671_v10 = vsub.f32 %v4875_v53, %v5248_v55  ;;  %v2097_v51 = vmul.f32 1.442695, %v1655_v16  ;;  %v5482_v24 = vpop.f32.mrf.mxu3  ;;  %3424 = vmatmul.msk.bf16.gmra.mxu3 %vm412_vm0, %v4067_v3 }
 0x21e   : > { %7938 = vst [vmem:[#allocation42_spill] sm:$0xff] %v5447_v42  ;;  %v1472_v42 = vsub.f32 %v7941_v48, %v5444_v38  ;;  %v5471_v49 = vpop.eup %3693  ;;  %3705 = vpow2.f32 %v2033_v43  ;;  %v1679_v23 = vsub.f32 %v4885_v31, %v5248_v55  ;;  %v2113_v62 = vmul.f32 1.442695, %v1663_v1 }
 0x21f   : > { %v2322_v20 = vadd.f32 %v5464_v54, %v2321_v58  ;;  %v5475_v17 = vpop.eup %3695  ;;  %3707 = vpow2.f32 %v2049_v0  ;;  %v5480_v29 = vpop.f32.mrf.mxu2  ;;  %7944 = vst [vmem:[#allocation53_spill] sm:$0xff] %v5482_v24  ;;  %3408 = vmatmul.msk.bf16.gmra.mxu2 %vm412_vm0, %v4067_v3  ;;  %v1687_v16 = vsub.f32 %v4914_v57, %v5248_v55  ;;  %v7946_v0 = vld [vmem:[#allocation19_spill] sm:$0xff]  ;;  %v1747_v48 = vmul.f32 1.442695, %v1480_v27 }
 0x220   : > { %7943 = vst [vmem:[#allocation50_spill] sm:$0xff] %v5480_v29  ;;  %v5486_v53 = vpop.eup %3697  ;;  %3709 = vpow2.f32 %v2065_v35  ;;  %v1731_v43 = vmul.f32 1.442695, %v1472_v42  ;;  %v1488_v58 = vsub.f32 %v7946_v0, %v5444_v38  ;;  %v1695_v57 = vsub.f32 %v4955_v47, %v5248_v55  ;;  %v7951_v0 = vld [vmem:[#allocation22_spill] sm:$0xff] }
 0x221   : > { %v2323_v59 = vadd.f32 %v5471_v49, %v2322_v20  ;;  %v5490_v31 = vpop.eup %3699  ;;  %3711 = vpow2.f32 %v2081_v21  ;;  %v5495_v20 = vpop.f32.mrf.mxu0  ;;  %v2129_v42 = vmul.f32 1.442695, %v1671_v10  ;;  %v2145_v21 = vmul.f32 1.442695, %v1679_v23  ;;  %v7953_v10 = vld [vmem:[#allocation24_spill] sm:$0xff] }
 0x222   : > { %7945 = vst [vmem:[#allocation57_spill] sm:$0xff] %v5490_v31  ;;  %v5497_v60 = vpop.f32.mrf.mxu1  ;;  %v5499_v3 = vpop.eup %3701  ;;  %3713 = vpow2.f32 %v2097_v51  ;;  %v1496_v27 = vsub.f32 %v7951_v0, %v5444_v38  ;;  %v1703_v29 = vsub.f32 %v4996_v50, %v5248_v55  ;;  %v1504_v51 = vsub.f32 %v7953_v10, %v5444_v38 }
 0x223   : > { %v2324_v1 = vadd.f32 %v5475_v17, %v2323_v59  ;;  %7947 = vst [vmem:[#allocation60_spill] sm:$0xff] %v5495_v20  ;;  %v5503_v35 = vpop.eup %3703  ;;  %3715 = vpow2.f32 %v2113_v62  ;;  %v1763_v23 = vmul.f32 1.442695, %v1488_v58  ;;  %v2177_v0 = vmul.f32 1.442695, %v1695_v57 }
 0x224   : > { %7948 = vst [vmem:[#allocation63_spill] sm:$0xff] %v5497_v60  ;;  %v5508_v24 = vpop.eup %3705  ;;  %v2161_v60 = vmul.f32 1.442695, %v1687_v16  ;;  %3717 = vpow2.f32 %v1731_v43  ;;  %v7954_v16 = vld [vmem:[#allocation28_spill] sm:$0xff]  ;;  %v2193_v57 = vmul.f32 1.442695, %v1703_v29 }
 0x225   : > { %7949 = vst [vmem:[#allocation66_spill] sm:$0xff] %v5499_v3  ;;  %v2325_v59 = vadd.f32 %v5486_v53, %v2324_v1  ;;  %v5512_v20 = vpop.eup %3707  ;;  %3719 = vpow2.f32 %v1747_v48  ;;  %v1711_v1 = vsub.f32 %v5050_v28, %v5248_v55  ;;  %v1512_v43 = vsub.f32 %v7954_v16, %v5444_v38  ;;  %v5528_v58 = vpop.f32.mrf.mxu3  ;;  %v7960_v29 = vld [vmem:[#allocation36_spill] sm:$0xff] }
 0x226   : > { %7950 = vst [vmem:[#allocation70_spill] sm:$0xff] %v5503_v35  ;;  %v5517_v62 = vpop.eup %3709  ;;  %3721 = vpow2.f32 %v2129_v42  ;;  %v1719_v28 = vsub.f32 %v5104_v36, %v5248_v55 }
 0x227   : > { %7952 = vst [vmem:[#allocation73_spill] sm:$0xff] %v5508_v24  ;;  %v2326_v47 = vadd.f32 %v5490_v31, %v2325_v59  ;;  %v5521_v22 = vpop.eup %3711  ;;  %3723 = vpow2.f32 %v2145_v21  ;;  %v1779_v59 = vmul.f32 1.442695, %v1496_v27  ;;  %v5526_v10 = vpop.f32.mrf.mxu2  ;;  %v1795_v27 = vmul.f32 1.442695, %v1504_v51 }
 0x228   : > { %7955 = vst [vmem:[#allocation12_spill] sm:$0xff] %v5526_v10  ;;  %v5530_v48 = vpop.eup %3713  ;;  %3725 = vpow2.f32 %v2161_v60  ;;  %v2209_v55 = vmul.f32 1.442695, %v1711_v1  ;;  %v1528_v60 = vsub.f32 %v7960_v29, %v5444_v38 }
 0x229   : > { %v2327_v50 = vadd.f32 %v5499_v3, %v2326_v47  ;;  %7956 = vst [vmem:[#allocation17_spill] sm:$0xff] %v5528_v58  ;;  %v5534_v42 = vpop.eup %3715  ;;  %v7957_v47 = vld [vmem:[#allocation31_spill] sm:$0xff]  ;;  %3727 = vpow2.f32 %v1763_v23  ;;  %v5539_v16 = vpop.f32.mrf.mxu0  ;;  %v4068_v58 = vld [vmem:[%s4347_s4 + $0x68] sm:$0xff]  ;;  %v1811_v23 = vmul.f32 1.442695, %v1512_v43 }
 0x22a   : > { %v1520_v3 = vsub.f32 %v7957_v47, %v5444_v38  ;;  %7958 = vst [vmem:[#allocation19_spill] sm:$0xff] %v5539_v16  ;;  %v5541_v10 = vpop.f32.mrf.mxu1  ;;  %3377 = vmatmul.msk.bf16.gmra.mxu0 %vm412_vm0, %v4068_v58  ;;  %3393 = vmatmul.msk.bf16.gmra.mxu1 %vm412_vm0, %v4068_v58  ;;  %v5546_v36 = vpop.eup %3717  ;;  %3729 = vpow2.f32 %v2177_v0  ;;  %v7962_v16 = vld [vmem:[#allocation41_spill] sm:$0xff]  ;;  %v7963_v0 = vld [vmem:[#allocation44_spill] sm:$0xff] }
 0x22b   : > { %v2328_v21 = vadd.f32 %v5503_v35, %v2327_v50  ;;  %7959 = vst [vmem:[#allocation22_spill] sm:$0xff] %v5541_v10  ;;  %v5550_v50 = vpop.eup %3719  ;;  %3731 = vpow2.f32 %v1779_v59  ;;  %v5555_v10 = vmul.f32 1.442695, %v1719_v28  ;;  %v1536_v31 = vsub.f32 %v7962_v16, %v5444_v38 }
 0x22c   : > { %7961 = vst [vmem:[#allocation24_spill] sm:$0xff] %v5550_v50  ;;  %v5553_v47 = vpop.eup %3721  ;;  %3733 = vpow2.f32 %v2193_v57  ;;  %v1544_v1 = vsub.f32 %v7963_v0, %v5444_v38  ;;  %v1827_v43 = vmul.f32 1.442695, %v1520_v3  ;;  %v1560_v28 = vsub.f32 %v7813_v37, %v5444_v38 }
 0x22d   : > { %v2329_v51 = vadd.f32 %v5508_v24, %v2328_v21  ;;  %v5561_v35 = vpop.eup %3723  ;;  %v1552_v21 = vsub.f32 %v7810_v14, %v5444_v38  ;;  %3735 = vpow2.f32 %v1795_v27  ;;  %v1843_v57 = vmul.f32 1.442695, %v1528_v60 }
 0x22e   : > { %v5566_v59 = vpop.eup %3725  ;;  %3737 = vpow2.f32 %v2209_v55  ;;  %v2348_v16 = vadd.f32 %v5550_v50, %v5546_v36  ;;  %v2593_v14 = vpack.c.bf16 %v5098_v30, %v5088_v63  ;;  %v2657_v3 = vpack.c.bf16 %v5277_v4, %v5266_v25  ;;  %v5581_v55 = vpop.f32.mrf.mxu3  ;;  %3425 = vmatmul.msk.bf16.gmra.mxu3 %vm412_vm0, %v4068_v58 }
 0x22f   : > { %v2330_v29 = vadd.f32 %v5512_v20, %v2329_v51  ;;  %v5572_v0 = vpop.eup %3727  ;;  %3739 = vpow2.f32 %v1811_v23  ;;  %v5579_v27 = vpop.f32.mrf.mxu2  ;;  %7965 = vst [vmem:[#allocation31_spill] sm:$0xff] %v5581_v55  ;;  %3409 = vmatmul.msk.bf16.gmra.mxu2 %vm412_vm0, %v4068_v58  ;;  %v1568_v60 = vsub.f32 %v7815_v18, %v5444_v38  ;;  %v1859_v63 = vmul.f32 1.442695, %v1536_v31  ;;  %v7970_v51 = vld [vmem:[#allocation14_spill] sm:$0xff]  ;;  %v7971_v55 = vld [vmem:[#allocation88_spill] sm:$0xff] }
 0x230   : > { %7964 = vst [vmem:[#allocation28_spill] sm:$0xff] %v5579_v27  ;;  %v5585_v37 = vpop.eup %3729  ;;  %v2349_v30 = vadd.f32 %v5572_v0, %v2348_v16  ;;  %3741 = vpow2.f32 %v1827_v43  ;;  %2685 = vmatpush.bf16.msra.mxu0 %v2593_v14  ;;  %2704 = vmatpush.bf16.msra.mxu1 %v2657_v3  ;;  %v2594_v58 = vpack.c.bf16 %v5281_v12, %v5272_v56  ;;  %v7969_v14 = vld [vmem:[#allocation65_spill] sm:$0xff]  ;;  %v7972_v43 = vld [vmem:[#allocation68_spill] sm:$0xff] }
 0x231   : > { %v2331_v24 = vadd.f32 %v5517_v62, %v2330_v29  ;;  %v5592_v25 = vpop.eup %3731  ;;  %v2658_v23 = vpack.c.bf16 %v5430_v34, %v5418_v61  ;;  %v5599_v18 = vpop.f32.mrf.mxu0  ;;  %3743 = vpow2.f32 %v1843_v57  ;;  %v1875_v34 = vmul.f32 1.442695, %v1544_v1 }
 0x232   : > { %7966 = vst [vmem:[#allocation36_spill] sm:$0xff] %v5599_v18  ;;  %v5601_v29 = vpop.f32.mrf.mxu1  ;;  %v5603_v31 = vpop.eup %3733  ;;  %v2350_v56 = vadd.f32 %v5592_v25, %v2349_v30  ;;  %2723 = vmatpush.bf16.msra.mxu2 %v2594_v58  ;;  %v2585_v27 = vpack.c.bf16 %v7971_v55, %v7970_v51  ;;  %v1891_v18 = vmul.f32 1.442695, %v1552_v21  ;;  %v2649_v30 = vpack.c.bf16 %v5255_v9, %v5244_v52  ;;  %v7973_v51 = vld [vmem:[#allocation71_spill] sm:$0xff] }
 0x233   : > { %v2332_v4 = vadd.f32 %v5521_v22, %v2331_v24  ;;  %7967 = vst [vmem:[#allocation41_spill] sm:$0xff] %v5601_v29  ;;  %v7968_v24 = vld [vmem:[#allocation61_spill] sm:$0xff]  ;;  %v5612_v12 = vpop.eup %3735  ;;  %2742 = vmatpush.bf16.msra.mxu3 %v2658_v23  ;;  %3745 = vpow2.f32 %v1859_v63  ;;  %v2586_v57 = vpack.c.bf16 %v5261_v45, %v5250_v5  ;;  %v2650_v55 = vpack.c.bf16 %v5408_v8, %v5394_v15  ;;  %v7974_v45 = vld [vmem:[#allocation58_spill] sm:$0xff] }
 0x234   : > { %v5617_v16 = vpop.eup %3737  ;;  %v2351_v3 = vadd.f32 %v5612_v12, %v2350_v56  ;;  %2686 = vmatpush.bf16.msra.mxu0 %v2585_v27  ;;  %2705 = vmatpush.bf16.msra.mxu1 %v2649_v30  ;;  %3747 = vpow2.f32 %v1875_v34  ;;  %v1907_v5 = vmul.f32 1.442695, %v1560_v28  ;;  %v7975_v15 = vld [vmem:[#allocation10_spill] sm:$0xff]  ;;  %v1923_v56 = vmul.f32 1.442695, %v1568_v60 }
 0x235   : > { %v2333_v61 = vadd.f32 %v5530_v48, %v2332_v4  ;;  %v5624_v50 = vpop.eup %3739  ;;  %v2577_v8 = vpack.c.bf16 %v7975_v15, %v7974_v45  ;;  %v2641_v34 = vpack.c.bf16 %v5235_v6, %v5226_v44  ;;  %3749 = vpow2.f32 %v1891_v18  ;;  %v7980_v44 = vld [vmem:[#allocation81_spill] sm:$0xff]  ;;  %v7981_v18 = vld [vmem:[#allocation83_spill] sm:$0xff] }
 0x236   : > { %v2352_v9 = vadd.f32 %v5624_v50, %v2351_v3  ;;  %v5638_v63 = vpop.eup %3741  ;;  %2724 = vmatpush.bf16.msra.mxu2 %v2586_v57  ;;  %v5645_v23 = vpop.f32.mrf.mxu3  ;;  %v2642_v57 = vpack.c.bf16 %v5386_v19, %v5378_v46  ;;  %3751 = vpow2.f32 %v5555_v10  ;;  %v7982_v46 = vsub.f32 %v7818_v33, %v5444_v38  ;;  %v7983_v45 = vld [vmem:[#allocation21_spill] sm:$0xff]  ;;  %v7984_v15 = vld [vmem:[#allocation55_spill] sm:$0xff] }
 0x237   : > { %v2334_v1 = vadd.f32 %v5534_v42, %v2333_v61  ;;  %2743 = vmatpush.bf16.msra.mxu3 %v2650_v55  ;;  %v5643_v58 = vpop.f32.mrf.mxu2  ;;  %7977 = vst [vmem:[#allocation61_spill] sm:$0xff] %v5645_v23  ;;  %v5652_v28 = vpop.eup %3743  ;;  %3753 = vpow2.f32 %v1907_v5  ;;  %v7988_v5 = vld [vmem:[#allocation77_spill] sm:$0xff] }
 0x238   : > { %7976 = vst [vmem:[#allocation44_spill] sm:$0xff] %v5643_v58  ;;  %v2353_v61 = vadd.f32 %v5638_v63, %v2352_v9  ;;  %2687 = vmatpush.bf16.msra.mxu0 %v2577_v8  ;;  %v4069_v9 = vld [vmem:[%s4347_s4 + $0x70] sm:$0xff]  ;;  %2706 = vmatpush.bf16.msra.mxu1 %v2641_v34  ;;  %v1939_v10 = vmul.f32 1.442695, %v7982_v46  ;;  %v2569_v8 = vpack.c.bf16 %v7984_v15, %v7983_v45  ;;  %3755 = vpow2.f32 %v1923_v56 }
 0x239   : > { %v2335_v27 = vadd.f32 %v5553_v47, %v2334_v1  ;;  %v2578_v1 = vpack.c.bf16 %v5239_v32, %v5230_v41  ;;  %v5659_v55 = vpop.f32.mrf.mxu0  ;;  %v5672_v32 = vpop.eup %3745  ;;  %v7986_v34 = vsub.f32 %v7821_v13, %v5444_v38  ;;  %v7992_v13 = vld [vmem:[#allocation84_spill] sm:$0xff] }
 0x23a   : > { %7978 = vst [vmem:[#allocation65_spill] sm:$0xff] %v5659_v55  ;;  %v5661_v60 = vpop.f32.mrf.mxu1  ;;  %3394 = vmatmul.msk.bf16.gmra.mxu1 %vm412_vm0, %v4069_v9  ;;  %v2354_v41 = vadd.f32 %v5652_v28, %v2353_v61  ;;  %3378 = vmatmul.msk.bf16.gmra.mxu0 %vm412_vm0, %v4069_v9  ;;  %v5688_v4 = vpop.eup %3747  ;;  %3757 = vpow2.f32 %v1939_v10  ;;  %v8000_v10 = vld [vmem:[#allocation97_spill] sm:$0xff] }
 0x23b   : > { %v2336_v30 = vadd.f32 %v5561_v35, %v2335_v27  ;;  %7979 = vst [vmem:[#allocation14_spill] sm:$0xff] %v5661_v60  ;;  %2725 = vmatpush.bf16.msra.mxu2 %v2578_v1  ;;  %2744 = vmatpush.bf16.msra.mxu3 %v2642_v57  ;;  %v7985_v27 = vld [vmem:[#allocation90_spill] sm:$0xff]  ;;  %v1955_v6 = vmul.f32 1.442695, %v7986_v34  ;;  %v7989_v1 = vld [vmem:[#allocation100_spill] sm:$0xff]  ;;  %v7990_v57 = vld [vmem:[#allocation51_spill] sm:$0xff]  ;;  %v5702_v56 = vpop.eup %3749 }
 0x23c   : > { %v1712_v61 = vsub.f32 %v7985_v27, %v5444_v38  ;;  %v2355_v3 = vadd.f32 %v5672_v32, %v2354_v41  ;;  %2688 = vmatpush.bf16.msra.mxu0 %v2569_v8  ;;  %v2570_v46 = vpack.c.bf16 %v7990_v57, %v7989_v1  ;;  %v7991_v27 = vld [vmem:[#allocation20_spill] sm:$0xff]  ;;  %v7993_v41 = vld [vmem:[#allocation35_spill] sm:$0xff]  ;;  %v8033_v60 = vld [vmem:[#allocation62_spill] sm:$0xff] }
 0x23d   : > { %v2337_v19 = vadd.f32 %v5566_v59, %v2336_v30  ;;  %v7987_v30 = vld [vmem:[#allocation49_spill] sm:$0xff]  ;;  %v2634_v45 = vpack.c.bf16 %v7991_v27, %v5359_v2  ;;  %v1696_v34 = vsub.f32 %v7993_v41, %v5444_v38  ;;  %v7995_v2 = vsub.f32 %v7968_v24, %v5444_v38  ;;  %v7996_v1 = vld [vmem:[#allocation43_spill] sm:$0xff]  ;;  %v7997_v57 = vld [vmem:[#allocation48_spill] sm:$0xff]  ;;  %v5710_v41 = vpop.eup %3751 }
 0x23e   : > { %v2633_v52 = vpack.c.bf16 %v7988_v5, %v7987_v30  ;;  %v7994_v30 = vld [vmem:[#allocation98_spill] sm:$0xff]  ;;  %v2356_v21 = vadd.f32 %v5688_v4, %v2355_v3  ;;  %v2561_v27 = vpack.c.bf16 %v7997_v57, %v7996_v1  ;;  %v7998_v3 = vsub.f32 %v7969_v14, %v5444_v38  ;;  %v5720_v24 = vpop.f32.mrf.mxu3  ;;  %3426 = vmatmul.msk.bf16.gmra.mxu3 %vm412_vm0, %v4069_v9  ;;  %v8003_v14 = vld [vmem:[#allocation96_spill] sm:$0xff] }
 0x23f   : > { %v2338_v33 = vadd.f32 %v5585_v37, %v2337_v19  ;;  %v1720_v5 = vsub.f32 %v7994_v30, %v5444_v38  ;;  %v1971_v8 = vmul.f32 1.442695, %v7995_v2  ;;  %2726 = vmatpush.bf16.msra.mxu2 %v2570_v46  ;;  %2745 = vmatpush.bf16.msra.mxu3 %v2634_v45  ;;  %v2211_v30 = vmul.f32 1.442695, %v1712_v61  ;;  %v5718_v23 = vpop.f32.mrf.mxu2  ;;  %8002 = vst [vmem:[#allocation68_spill] sm:$0xff] %v5720_v24  ;;  %v5724_v46 = vpop.eup %3753  ;;  %v8004_v61 = vld [vmem:[#allocation99_spill] sm:$0xff] }
 0x240   : > { %2707 = vmatpush.bf16.msra.mxu1 %v2633_v52  ;;  %v1987_v52 = vmul.f32 1.442695, %v7998_v3  ;;  %v2357_v15 = vadd.f32 %v5702_v56, %v2356_v21  ;;  %8001 = vst [vmem:[#allocation88_spill] sm:$0xff] %v5718_v23  ;;  %3410 = vmatmul.msk.bf16.gmra.mxu2 %vm412_vm0, %v4069_v9  ;;  %3759 = vpow2.f32 %v1955_v6  ;;  %v2562_v21 = vpack.c.bf16 %v8004_v61, %v8003_v14  ;;  %v8005_v2 = vld [vmem:[#allocation69_spill] sm:$0xff]  ;;  %v8006_v1 = vld [vmem:[#allocation72_spill] sm:$0xff]  ;;  %v5736_v58 = vpop.eup %3755  ;;  %v8011_v14 = vld [vmem:[#allocation39_spill] sm:$0xff] }
 0x241   : > { %v2339_v19 = vadd.f32 %v5603_v31, %v2338_v33  ;;  %v7999_v33 = vld [vmem:[#allocation95_spill] sm:$0xff]  ;;  %2689 = vmatpush.bf16.msra.mxu0 %v2561_v27  ;;  %v2626_v57 = vpack.c.bf16 %v8006_v1, %v8005_v2  ;;  %v8007_v3 = vld [vmem:[#allocation8_spill] sm:$0xff]  ;;  %v2227_v23 = vmul.f32 1.442695, %v1720_v5  ;;  %3761 = vpow2.f32 %v1971_v8  ;;  %v8012_v61 = vld [vmem:[#allocation46_spill] sm:$0xff]  ;;  %v5746_v1 = vpop.f32.mrf.mxu0 }
 0x242   : > { %v2625_v29 = vpack.c.bf16 %v8000_v10, %v7999_v33  ;;  %v1680_v33 = vsub.f32 %v8007_v3, %v5444_v38  ;;  %v8008_v10 = vld [vmem:[#allocation52_spill] sm:$0xff]  ;;  %v2358_v9 = vadd.f32 %v5724_v46, %v2357_v15  ;;  %v2553_v2 = vpack.c.bf16 %v8012_v61, %v8011_v14  ;;  %8013 = vst [vmem:[#allocation58_spill] sm:$0xff] %v5746_v1  ;;  %v5748_v5 = vpop.f32.mrf.mxu1  ;;  %v8017_v3 = vld [vmem:[#allocation74_spill] sm:$0xff] }
 0x243   : > { %v2340_v45 = vadd.f32 %v5617_v16, %v2339_v19  ;;  %v1704_v24 = vsub.f32 %v8008_v10, %v5444_v38  ;;  %v8010_v19 = vsub.f32 %v7972_v43, %v5444_v38  ;;  %2727 = vmatpush.bf16.msra.mxu2 %v2562_v21  ;;  %2746 = vmatpush.bf16.msra.mxu3 %v2626_v57  ;;  %3763 = vpow2.f32 %v1987_v52  ;;  %v5756_v10 = vpop.eup %3757  ;;  %v8018_v57 = vld [vmem:[#allocation93_spill] sm:$0xff]  ;;  %v8020_v61 = vld [vmem:[#allocation64_spill] sm:$0xff] }
 0x244   : > { %2708 = vmatpush.bf16.msra.mxu1 %v2625_v29  ;;  %8014 = vst [vmem:[#allocation10_spill] sm:$0xff] %v5748_v5  ;;  %v8015_v29 = vsub.f32 %v7973_v51, %v5444_v38  ;;  %v2359_v8 = vadd.f32 %v5736_v58, %v2358_v9  ;;  %v2179_v21 = vmul.f32 1.442695, %v1696_v34  ;;  %3765 = vpow2.f32 %v2211_v30  ;;  %v8022_v5 = vld [vmem:[#allocation9_spill] sm:$0xff] }
 0x245   : > { %v5739_v6 = vadd.f32 %v5710_v41, %v2340_v45  ;;  %v2003_v27 = vmul.f32 1.442695, %v8010_v19  ;;  %v8016_v45 = vld [vmem:[#allocation40_spill] sm:$0xff]  ;;  %2690 = vmatpush.bf16.msra.mxu0 %v2553_v2  ;;  %v8019_v19 = vld [vmem:[#allocation94_spill] sm:$0xff]  ;;  %v1688_v51 = vsub.f32 %v8022_v5, %v5444_v38  ;;  %3767 = vpow2.f32 %v2227_v23  ;;  %v8023_v34 = vld [vmem:[#allocation85_spill] sm:$0xff] }
 0x246   : > { %v2019_v15 = vmul.f32 1.442695, %v8015_v29  ;;  %v2617_v43 = vpack.c.bf16 %v8017_v3, %v8016_v45  ;;  %v2554_v14 = vpack.c.bf16 %v8019_v19, %v8018_v57  ;;  %v2195_v29 = vmul.f32 1.442695, %v1704_v24  ;;  %v5765_v45 = vpop.eup %3759  ;;  %v8026_v57 = vld [vmem:[#allocation87_spill] sm:$0xff]  ;;  %v8029_v19 = vld [vmem:[#allocation37_spill] sm:$0xff] }
 0x247   : > { %8009 = vst [vmem:[#allocation71_spill] sm:$0xff] %v5739_v6  ;;  %v8021_v6 = vld [vmem:[#allocation67_spill] sm:$0xff]  ;;  %v2360_v9 = vadd.f32 %v5756_v10, %v2359_v8  ;;  %v1672_v30 = vsub.f32 %v8023_v34, %v5444_v38  ;;  %3769 = vpow2.f32 %v2003_v27  ;;  %v8024_v2 = vsub.f32 %v7851_v39, %v5444_v38  ;;  %v3762_v27 = vpop.eup %3761 }
 0x248   : > { %v2618_v52 = vpack.c.bf16 %v8021_v6, %v8020_v61  ;;  %2709 = vmatpush.bf16.msra.mxu1 %v2617_v43  ;;  %2728 = vmatpush.bf16.msra.mxu2 %v2554_v14  ;;  %v8025_v6 = vld [vmem:[#allocation32_spill] sm:$0xff]  ;;  %3771 = vpow2.f32 %v2019_v15  ;;  %v8027_v23 = vsub.f32 %v7866_v11, %v5444_v38  ;;  %v8028_v43 = vld [vmem:[#allocation33_spill] sm:$0xff]  ;;  %v2147_v34 = vmul.f32 1.442695, %v1680_v33  ;;  %v8030_v39 = vld [vmem:[#allocation91_spill] sm:$0xff] }
 0x249   : > { %v2035_v3 = vmul.f32 1.442695, %v8024_v2  ;;  %v2545_v5 = vpack.c.bf16 %v8026_v57, %v8025_v6  ;;  %v2361_v8 = vadd.f32 %v5765_v45, %v2360_v9  ;;  %v2609_v61 = vpack.c.bf16 %v8029_v19, %v8028_v43  ;;  %v8031_v14 = vld [vmem:[#allocation92_spill] sm:$0xff]  ;;  %v8032_v2 = vld [vmem:[#allocation59_spill] sm:$0xff]  ;;  %v5784_v15 = vpop.eup %3763  ;;  %v8037_v19 = vld [vmem:[#allocation13_spill] sm:$0xff] }
 0x24a   : > { %2747 = vmatpush.bf16.msra.mxu3 %v2618_v52  ;;  %v2051_v24 = vmul.f32 1.442695, %v8027_v23  ;;  %3773 = vpow2.f32 %v2179_v21  ;;  %v2546_v52 = vpack.c.bf16 %v8031_v14, %v8030_v39  ;;  %v2610_v6 = vpack.c.bf16 %v8033_v60, %v8032_v2  ;;  %v5789_v43 = vpop.eup %3765  ;;  %v5808_v14 = vpop.f32.mrf.mxu3 }
 0x24b   : > { %2691 = vmatpush.bf16.msra.mxu0 %v2545_v5  ;;  %v8034_v11 = vsub.f32 %v7872_v7, %v5444_v38  ;;  %v2163_v9 = vmul.f32 1.442695, %v1688_v51  ;;  %3775 = vpow2.f32 %v2195_v29  ;;  %v2362_v23 = vadd.f32 %v3762_v27, %v2361_v8  ;;  %v8038_v7 = vld [vmem:[#allocation16_spill] sm:$0xff]  ;;  %v5799_v51 = vpop.f32.mrf.mxu2  ;;  %v5801_v29 = vpop.eup %3767  ;;  %v8040_v8 = vld [vmem:[#allocation25_spill] sm:$0xff]  ;;  %8042 = vst [vmem:[#allocation83_spill] sm:$0xff] %v5808_v14 }
 0x24c   : > { %2710 = vmatpush.bf16.msra.mxu1 %v2609_v61  ;;  %3777 = vpow2.f32 %v2035_v3  ;;  %v8035_v33 = vsub.f32 %v7980_v44, %v5444_v38  ;;  %v8036_v60 = vsub.f32 %v7992_v13, %v5444_v38  ;;  %2729 = vmatpush.bf16.msra.mxu2 %v2546_v52  ;;  %v2537_v39 = vpack.c.bf16 %v8038_v7, %v8037_v19  ;;  %v8041_v44 = vld [vmem:[#allocation27_spill] sm:$0xff]  ;;  %v5818_v7 = vpop.f32.mrf.mxu1 }
 0x24d   : > { %v2067_v57 = vmul.f32 1.442695, %v8034_v11  ;;  %8039 = vst [vmem:[#allocation81_spill] sm:$0xff] %v5799_v51  ;;  %3779 = vpow2.f32 %v2051_v24  ;;  %v2363_v3 = vadd.f32 %v5784_v15, %v2362_v23  ;;  %v2601_v61 = vpack.c.bf16 %v8041_v44, %v8040_v8  ;;  %v5810_v52 = vpop.eup %3769  ;;  %v8044_v11 = vld [vmem:[#allocation89_spill] sm:$0xff]  ;;  %v8046_v24 = vld [vmem:[#allocation56_spill] sm:$0xff]  ;;  %v5816_v23 = vpop.f32.mrf.mxu0  ;;  %v4070_v8 = vld [vmem:[%s4347_s4 + $0x78] sm:$0xff] }
 0x24e   : > { %v2083_v21 = vmul.f32 1.442695, %v8035_v33  ;;  %v2115_v5 = vmul.f32 1.442695, %v8036_v60  ;;  %2748 = vmatpush.bf16.msra.mxu3 %v2610_v6  ;;  %v2595_v13 = vpack.c.bf16 %v5486_v53, %v5475_v17  ;;  %v2131_v2 = vmul.f32 1.442695, %v1672_v30  ;;  %3395 = vmatmul.msk.bf16.gmra.mxu1 %vm412_vm0, %v4070_v8  ;;  %v5822_v17 = vpop.eup %3771 }
 0x24f   : > { %3781 = vpow2.f32 %v2147_v34  ;;  %2692 = vmatpush.bf16.msra.mxu0 %v2537_v39  ;;  %v8043_v6 = vld [vmem:[#allocation29_spill] sm:$0xff]  ;;  %v8045_v60 = vld [vmem:[#allocation79_spill] sm:$0xff]  ;;  %8047 = vst [vmem:[#allocation21_spill] sm:$0xff] %v5816_v23  ;;  %v2364_v53 = vadd.f32 %v5810_v52, %v2363_v3  ;;  %v2659_v30 = vpack.c.bf16 %v5710_v41, %v5617_v16  ;;  %v2596_v34 = vpack.c.bf16 %v3762_v27, %v5765_v45 }
 0x250   : > { %v2538_v33 = vpack.c.bf16 %v8044_v11, %v8043_v6  ;;  %v2602_v19 = vpack.c.bf16 %v8046_v24, %v8045_v60  ;;  %8048 = vst [vmem:[#allocation55_spill] sm:$0xff] %v5818_v7  ;;  %3783 = vpow2.f32 %v2163_v9  ;;  %2711 = vmatpush.bf16.msra.mxu1 %v2601_v61  ;;  %v5828_v39 = vpop.eup %3773  ;;  %v8049_v44 = vsub.f32 %v7981_v18, %v5444_v38 }
 0x251   : > { %3785 = vpow2.f32 %v2067_v57  ;;  %v2660_v9 = vpack.c.bf16 %v5801_v29, %v5789_v43  ;;  %v5835_v3 = vpop.eup %3775  ;;  %v2365_v61 = vadd.f32 %v5822_v17, %v2364_v53  ;;  %v2587_v16 = vpack.c.bf16 %v5471_v49, %v5464_v54  ;;  %3379 = vmatmul.msk.bf16.gmra.mxu0 %vm412_vm0, %v4070_v8  ;;  %v8054_v53 = vld [vmem:[#allocation30_spill] sm:$0xff] }
 0x252   : > { %v2099_v6 = vmul.f32 1.442695, %v8049_v44  ;;  %2730 = vmatpush.bf16.msra.mxu2 %v2538_v33  ;;  %2749 = vmatpush.bf16.msra.mxu3 %v2602_v19  ;;  %3787 = vpow2.f32 %v2083_v21  ;;  %v5840_v41 = vpop.eup %3777  ;;  %v2651_v45 = vpack.c.bf16 %v5603_v31, %v5585_v37  ;;  %v2588_v27 = vpack.c.bf16 %v5756_v10, %v5736_v58  ;;  %v5866_v60 = vpop.f32.mrf.mxu3 }
 0x253   : > { %2761 = vmatpush.bf16.msrb.mxu0 %v2595_v13  ;;  %3789 = vpow2.f32 %v2115_v5  ;;  %v5843_v38 = vpop.eup %3779  ;;  %v2366_v18 = vadd.f32 %v5840_v41, %v2365_v61  ;;  %v2652_v49 = vpack.c.bf16 %v5835_v3, %v5828_v39  ;;  %v5852_v54 = vpop.f32.mrf.mxu2  ;;  %3411 = vmatmul.msk.bf16.gmra.mxu2 %vm412_vm0, %v4070_v8  ;;  %v2579_v37 = vpack.c.bf16 %v5457_v40, %v5440_v26 }
 0x254   : > { %2780 = vmatpush.bf16.msrb.mxu1 %v2659_v30  ;;  %3791 = vpow2.f32 %v2131_v2  ;;  %8050 = vst [vmem:[#allocation90_spill] sm:$0xff] %v5852_v54  ;;  %v5860_v10 = vpop.f32.mrf.mxu1  ;;  %v2643_v11 = vpack.c.bf16 %v5566_v59, %v5561_v35  ;;  %v2580_v33 = vpack.c.bf16 %v5724_v46, %v5702_v56  ;;  %3427 = vmatmul.msk.bf16.gmra.mxu3 %vm412_vm0, %v4070_v8  ;;  %v8055_v30 = vld [vmem:[#allocation34_spill] sm:$0xff] }
 0x255   : > { %v3782_v57 = vpop.eup %3781  ;;  %3793 = vpow2.f32 %v2099_v6  ;;  %v2367_v5 = vadd.f32 %v5843_v38, %v2366_v18  ;;  %v5858_v58 = vpop.f32.mrf.mxu0  ;;  %8052 = vst [vmem:[#allocation77_spill] sm:$0xff] %v5860_v10  ;;  %v2635_v35 = vpack.c.bf16 %v5553_v47, %v5534_v42  ;;  %v2572_v59 = vpack.c.bf16 %v5688_v4, %v5672_v32  ;;  %v8056_v8 = vld [vmem:[#allocation78_spill] sm:$0xff] }
 0x256   : > { %2799 = vmatpush.bf16.msrb.mxu2 %v2596_v34  ;;  %2818 = vmatpush.bf16.msrb.mxu3 %v2660_v9  ;;  %v3784_v21 = vpop.eup %3783  ;;  %8051 = vst [vmem:[#allocation49_spill] sm:$0xff] %v5858_v58  ;;  %v2571_v34 = vpack.c.bf16 %v8055_v30, %v8054_v53  ;;  %v8057_v9 = vld [vmem:[#allocation82_spill] sm:$0xff]  ;;  %v2627_v42 = vpack.c.bf16 %v5530_v48, %v5521_v22  ;;  %v8073_v53 = vld [vmem:[#allocation57_spill] sm:$0xff] }
 0x257   : > { %2762 = vmatpush.bf16.msrb.mxu0 %v2587_v16  ;;  %v3786_v31 = vpop.eup %3785  ;;  %8053 = vst [vmem:[#allocation100_spill] sm:$0xff] %v5866_v60  ;;  %v2644_v40 = vpack.c.bf16 %v3784_v21, %v3782_v57  ;;  %v2563_v61 = vpack.c.bf16 %v8057_v9, %v8056_v8  ;;  %v2564_v47 = vpack.c.bf16 %v5652_v28, %v5638_v63  ;;  %v8074_v30 = vld [vmem:[#allocation66_spill] sm:$0xff] }
 0x258   : > { %2781 = vmatpush.bf16.msrb.mxu1 %v2651_v45  ;;  %v3788_v13 = vpop.eup %3787  ;;  %v2368_v2 = vadd.f32 %v3786_v31, %v2367_v5  ;;  %v2620_v48 = vpack.c.bf16 %v3786_v31, %v5843_v38  ;;  %v2612_v31 = vpack.c.bf16 %v5840_v41, %v5822_v17 }
 0x259   : > { %v3790_v26 = vpop.eup %3789 }
 0x25a   : > { %2800 = vmatpush.bf16.msrb.mxu2 %v2588_v27  ;;  %2819 = vmatpush.bf16.msrb.mxu3 %v2652_v49  ;;  %v3792_v24 = vpop.eup %3791  ;;  %v2369_v19 = vadd.f32 %v3788_v13, %v2368_v2  ;;  %v8060_v27 = vld [vmem:[#allocation76_spill] sm:$0xff]  ;;  %v8061_v49 = vld [vmem:[#allocation23_spill] sm:$0xff]  ;;  %v2619_v2 = vpack.c.bf16 %v5517_v62, %v5512_v20  ;;  %v5895_v28 = vpop.f32.mrf.mxu3 }
 0x25b   : > { %2763 = vmatpush.bf16.msrb.mxu0 %v2579_v37  ;;  %v3794_v44 = vpop.eup %3793  ;;  %v2636_v56 = vpack.c.bf16 %v3792_v24, %v3790_v26  ;;  %v2555_v5 = vpack.c.bf16 %v8061_v49, %v8060_v27  ;;  %v5891_v22 = vpop.f32.mrf.mxu2  ;;  %8063 = vst [vmem:[#allocation35_spill] sm:$0xff] %v5895_v28  ;;  %v3438_v27 = vld [vmem:[%s249_s8 + $0x10] sm:$0xf]  ;;  %v3471_v49 = vld [vmem:[%s249_s8 + $0x14] sm:$0xf0] }
 0x25c   : > { %2782 = vmatpush.bf16.msrb.mxu1 %v2643_v11  ;;  %v2370_v6 = vadd.f32 %v3794_v44, %v2369_v19  ;;  %v5879_v18 = vpop.f32.mrf.mxu1  ;;  %v2628_v4 = vpack.c.bf16 %v3794_v44, %v3788_v13  ;;  %v2556_v11 = vpack.c.bf16 %v5624_v50, %v5612_v12  ;;  %8062 = vst [vmem:[#allocation84_spill] sm:$0xff] %v5891_v22  ;;  %v8065_v13 = vld [vmem:[#allocation75_spill] sm:$0xff]  ;;  %v8068_v50 = vld [vmem:[#allocation70_spill] sm:$0xff]  ;;  %v8069_v12 = vld [vmem:[#allocation73_spill] sm:$0xff] }
 0x25d   : > { %v5877_v16 = vpop.f32.mrf.mxu0  ;;  %8059 = vst [vmem:[#allocation20_spill] sm:$0xff] %v5879_v18  ;;  %v2611_v38 = vpack.c.bf16 %v8069_v12, %v8068_v50 }
 0x25e   : > { %2801 = vmatpush.bf16.msrb.mxu2 %v2580_v33  ;;  %2820 = vmatpush.bf16.msrb.mxu3 %v2644_v40  ;;  %v2371_v46 = vadd.f32 %v3790_v26, %v2370_v6  ;;  %8058 = vst [vmem:[#allocation51_spill] sm:$0xff] %v5877_v16  ;;  %v8070_v40 = vld [vmem:[#allocation11_spill] sm:$0xff] }
 0x25f   : > { %2764 = vmatpush.bf16.msrb.mxu0 %v2571_v34  ;;  %v2603_v34 = vpack.c.bf16 %v8074_v30, %v8073_v53 }
 0x260   : > { %2783 = vmatpush.bf16.msrb.mxu1 %v2635_v35  ;;  %v2372_v45 = vadd.f32 %v3792_v24, %v2371_v46  ;;  %v8071_v24 = vld [vmem:[#allocation15_spill] sm:$0xff]  ;;  %v3469_v35 = vld [vmem:[%s249_s8 + $0x4] sm:$0xf0]  ;;  %v3432_v46 = vld [vmem:[%s249_s8 + $0x8] sm:$0xf0] }
 0x261   : > { %v2539_v19 = vpack.c.bf16 %v8071_v24, %v8070_v40 }
 0x262   : > { %2802 = vmatpush.bf16.msrb.mxu2 %v2572_v59  ;;  %2821 = vmatpush.bf16.msrb.mxu3 %v2636_v56  ;;  %v2373_v32 = vadd.f32 %v3782_v57, %v2372_v45  ;;  %v8064_v57 = vld [vmem:[#allocation18_spill] sm:$0xff]  ;;  %v3468_v59 = vld [vmem:[%s249_s8 + $0x4] sm:$0xf] }
 0x263   : > { %2765 = vmatpush.bf16.msrb.mxu0 %v2563_v61  ;;  %v5922_v17 = vpop.f32.mrf.mxu2  ;;  %v5944_v9 = vor.u32 %v3468_v59, %v3432_v46 }
 0x264   : > { %2784 = vmatpush.bf16.msrb.mxu1 %v2627_v42  ;;  %v2374_v37 = vadd.f32 %v3784_v21, %v2373_v32  ;;  %v2547_v21 = vpack.c.bf16 %v8065_v13, %v8064_v57  ;;  %v5901_v20 = vpop.f32.mrf.mxu1  ;;  %8076 = vst [vmem:[#allocation95_spill] sm:$0xff] %v5922_v17 }
 0x265   : > { %v5899_v33 = vpop.f32.mrf.mxu0  ;;  %8067 = vst [vmem:[#allocation43_spill] sm:$0xff] %v5901_v20  ;;  %2712 = vmatmul.bf16.vlgmr.msra.gmra.mxu1 %v5944_v9 }
 0x266   : > { %2803 = vmatpush.bf16.msrb.mxu2 %v2564_v47  ;;  %2822 = vmatpush.bf16.msrb.mxu3 %v2628_v4  ;;  %v2375_v63 = vadd.f32 %v5828_v39, %v2374_v37  ;;  %8066 = vst [vmem:[#allocation98_spill] sm:$0xff] %v5899_v33  ;;  %v2548_v39 = vpack.c.bf16 %v5592_v25, %v5572_v0  ;;  %v8075_v0 = vld [vmem:[#allocation24_spill] sm:$0xff] }
 0x267   : > { %2766 = vmatpush.bf16.msrb.mxu0 %v2555_v5  ;;  %v2540_v25 = vpack.c.bf16 %v8075_v0, %v5546_v36  ;;  %8084 = vst [vmem:[#allocation39_spill] sm:$0xff] %v5944_v9  ;;  %v3470_v5 = vld [vmem:[%s249_s8 + $0x14] sm:$0xf]  ;;  %v5962_v37 = vor.u32 %v3471_v49, %v3438_v27 }
 0x268   : > { %2785 = vmatpush.bf16.msrb.mxu1 %v2619_v2  ;;  %v2376_v62 = vadd.f32 %v5835_v3, %v2375_v63  ;;  %v3440_v2 = vld [vmem:[%s249_s8 + $0x18] sm:$0xf0] }
 0x269   : > { %8089 = vst [vmem:[#allocation94_spill] sm:$0xff] %v5962_v37 }
 0x26a   : > { %2804 = vmatpush.bf16.msrb.mxu2 %v2556_v11  ;;  %2823 = vmatpush.bf16.msrb.mxu3 %v2620_v48  ;;  %v2377_v26 = vadd.f32 %v5789_v43, %v2376_v62  ;;  %v2604_v43 = vpack.c.bf16 %v5810_v52, %v5784_v15  ;;  %v3430_v52 = vld [vmem:[%s249_s8] sm:$0xf]  ;;  %v5964_v11 = vor.u32 %v3470_v5, %v3440_v2 }
 0x26b   : > { %2767 = vmatpush.bf16.msrb.mxu0 %v2547_v21  ;;  %v5938_v15 = vpop.f32.mrf.mxu2  ;;  %v5940_v56 = vor.u32 %v3469_v35, %v3430_v52 }
 0x26c   : > { %2786 = vmatpush.bf16.msrb.mxu1 %v2611_v38  ;;  %v5914_v3 = vadd.f32 %v5801_v29, %v2377_v26  ;;  %v5926_v44 = vpop.f32.mrf.mxu1  ;;  %v5928_v29 = vpop.f32.mrf.mxu3  ;;  %8081 = vst [vmem:[#allocation72_spill] sm:$0xff] %v5938_v15  ;;  %2750 = vmatmul.bf16.vlgmr.msra.gmra.mxu3 %v5944_v9 }
 0x26d   : > { %v5924_v41 = vpop.f32.mrf.mxu0  ;;  %8078 = vst [vmem:[#allocation96_spill] sm:$0xff] %v5926_v44  ;;  %2693 = vmatmul.bf16.vlgmr.msra.gmra.mxu0 %v5940_v56  ;;  %2731 = vmatmul.bf16.vlgmr.msra.gmra.mxu2 %v5940_v56 }
 0x26e   : > { %2805 = vmatpush.bf16.msrb.mxu2 %v2548_v39  ;;  %2824 = vmatpush.bf16.msrb.mxu3 %v2612_v31  ;;  %8072 = vst [vmem:[#allocation48_spill] sm:$0xff] %v5914_v3 }
 0x26f   : > { %2768 = vmatpush.bf16.msrb.mxu0 %v2539_v19  ;;  %8077 = vst [vmem:[#allocation97_spill] sm:$0xff] %v5924_v41 }
 0x270   : > { %2787 = vmatpush.bf16.msrb.mxu1 %v2603_v34  ;;  %8079 = vst [vmem:[#allocation99_spill] sm:$0xff] %v5928_v29 }
 0x271   : > { %8082 = vst [vmem:[#allocation8_spill] sm:$0xff] %v5940_v56 }
 0x272   : > { %2806 = vmatpush.bf16.msrb.mxu2 %v2540_v25  ;;  %2825 = vmatpush.bf16.msrb.mxu3 %v2604_v43  ;;  %8090 = vst [vmem:[#allocation64_spill] sm:$0xff] %v5964_v11 }
 0x273   : > { %v5954_v42 = vpop.f32.mrf.mxu2 }
 0x274   : > { %v5936_v6 = vpop.f32.mrf.mxu1  ;;  %v5942_v8 = vpop.f32.mrf.mxu3  ;;  %8086 = vst [vmem:[#allocation40_spill] sm:$0xff] %v5954_v42 }
 0x275   : > { %v5934_v36 = vpop.f32.mrf.mxu0  ;;  %8080 = vst [vmem:[#allocation69_spill] sm:$0xff] %v5936_v6  ;;  %2717 = vmatmul.bf16.gmra.mxu1 %v5964_v11 }
 0x276   : > { %8083 = vst [vmem:[#allocation52_spill] sm:$0xff] %v5942_v8 }
 0x27b   : > { %v5968_v48 = vpop.f32.mrf.mxu2 }
 0x27c   : > { %v5952_v45 = vpop.f32.mrf.mxu1  ;;  %v5956_v47 = vpop.f32.mrf.mxu3  ;;  %8091 = vst [vmem:[#allocation67_spill] sm:$0xff] %v5968_v48  ;;  %2755 = vmatmul.bf16.gmra.mxu3 %v5964_v11 }
 0x27d   : > { %v5950_v61 = vpop.f32.mrf.mxu0  ;;  %8085 = vst [vmem:[#allocation46_spill] sm:$0xff] %v5952_v45  ;;  %2698 = vmatmul.bf16.gmra.mxu0 %v5962_v37  ;;  %2736 = vmatmul.bf16.gmra.mxu2 %v5962_v37 }
 0x27e   : > { %8087 = vst [vmem:[#allocation74_spill] sm:$0xff] %v5956_v47 }
 0x283   : > { %v5978_v21 = vpop.f32.mrf.mxu2 }
 0x284   : > { %v5960_v32 = vpop.f32.mrf.mxu1  ;;  %v5972_v63 = vpop.f32.mrf.mxu3  ;;  %8095 = vst [vmem:[#allocation87_spill] sm:$0xff] %v5978_v21 }
 0x285   : > { %v5958_v4 = vpop.f32.mrf.mxu0  ;;  %8088 = vst [vmem:[#allocation93_spill] sm:$0xff] %v5960_v32  ;;  %2788 = vmatmul.bf16.vlgmr.msrb.gmra.mxu1 %v5944_v9 }
 0x286   : > { %8092 = vst [vmem:[#allocation9_spill] sm:$0xff] %v5972_v63 }
 0x28b   : > { %v5994_v31 = vpop.f32.mrf.mxu2 }
 0x28c   : > { %v5976_v13 = vpop.f32.mrf.mxu1  ;;  %v5984_v12 = vpop.f32.mrf.mxu3  ;;  %2826 = vmatmul.bf16.vlgmr.msrb.gmra.mxu3 %v5944_v9  ;;  %8098 = vst [vmem:[#allocation91_spill] sm:$0xff] %v5994_v31  ;;  %v8113_v9 = vld [vmem:[#allocation45_spill] sm:$0xff]  ;;  %v8119_v31 = vld [vmem:[#allocation36_spill] sm:$0xff] }
 0x28d   : > { %v5974_v57 = vpop.f32.mrf.mxu0  ;;  %8094 = vst [vmem:[#allocation32_spill] sm:$0xff] %v5976_v13  ;;  %2769 = vmatmul.bf16.vlgmr.msrb.gmra.mxu0 %v5940_v56  ;;  %2807 = vmatmul.bf16.vlgmr.msrb.gmra.mxu2 %v5940_v56  ;;  %v8114_v56 = vld [vmem:[#allocation26_spill] sm:$0xff] }
 0x28e   : > { %8093 = vst [vmem:[#allocation85_spill] sm:$0xff] %v5974_v57 }
 0x28f   : > { %8097 = vst [vmem:[#allocation37_spill] sm:$0xff] %v5984_v12 }
 0x293   : > { %v6002_v19 = vpop.f32.mrf.mxu2 }
 0x294   : > { %v5982_v50 = vpop.f32.mrf.mxu1  ;;  %v5996_v26 = vpop.f32.mrf.mxu3  ;;  %8101 = vst [vmem:[#allocation62_spill] sm:$0xff] %v6002_v19 }
 0x295   : > { %v5980_v62 = vpop.f32.mrf.mxu0  ;;  %8096 = vst [vmem:[#allocation33_spill] sm:$0xff] %v5982_v50  ;;  %2793 = vmatmul.bf16.gmra.mxu1 %v5964_v11 }
 0x296   : > { %8099 = vst [vmem:[#allocation92_spill] sm:$0xff] %v5996_v26 }
 0x29b   : > { %v6018_v43 = vpop.f32.mrf.mxu2 }
 0x29c   : > { %v5992_v39 = vpop.f32.mrf.mxu1  ;;  %v6006_v53 = vpop.f32.mrf.mxu3  ;;  %2831 = vmatmul.bf16.gmra.mxu3 %v5964_v11  ;;  %8106 = vst [vmem:[#allocation29_spill] sm:$0xff] %v6018_v43  ;;  %v1321_v43 = vmax.f32 %v8114_v56, %v8113_v9 }
 0x29d   : > { %v5990_v38 = vpop.f32.mrf.mxu0  ;;  %2774 = vmatmul.bf16.gmra.mxu0 %v5962_v37  ;;  %2812 = vmatmul.bf16.gmra.mxu2 %v5962_v37  ;;  %8102 = vst [vmem:[#allocation13_spill] sm:$0xff] %v6006_v53  ;;  %v8115_v53 = vld [vmem:[#allocation60_spill] sm:$0xff] }
 0x29e   : > { %v1322_v3 = vmax.f32 %v1321_v43, %v8115_v53 }
 0x2a3   : > { %v6024_v59 = vpop.f32.mrf.mxu2 }
 0x2a4   : > { %v6000_v24 = vpop.f32.mrf.mxu1  ;;  %8107 = vst [vmem:[#allocation89_spill] sm:$0xff] %v6024_v59  ;;  %v6028_v27 = vpop.f32.mrf.mxu3 }
 0x2a5   : > { %v5998_v40 = vpop.f32.mrf.mxu0  ;;  %8100 = vst [vmem:[#allocation59_spill] sm:$0xff] %v6000_v24 }
 0x2a6   : > { %8108 = vst [vmem:[#allocation79_spill] sm:$0xff] %v6028_v27  ;;  %v8118_v27 = vld [vmem:[#allocation19_spill] sm:$0xff] }
 0x2a7   : > { %v1323_v26 = vmax.f32 %v1322_v3, %v8118_v27 }
 0x2a9   : > { %v1324_v12 = vmax.f32 %v1323_v26, %v8119_v31 }
 0x2ab   : > { %v6032_v5 = vpop.f32.mrf.mxu2 }
 0x2ac   : > { %v6012_v34 = vpop.f32.mrf.mxu1  ;;  %8110 = vst [vmem:[#allocation30_spill] sm:$0xff] %v6032_v5  ;;  %v6036_v11 = vpop.f32.mrf.mxu3  ;;  %v1325_v5 = vmax.f32 %v1324_v12, %v5659_v55  ;;  %v8127_v55 = vld [vmem:[#allocation80_spill] sm:$0xff] }
 0x2ad   : > { %v6010_v30 = vpop.f32.mrf.mxu0  ;;  %8103 = vst [vmem:[#allocation16_spill] sm:$0xff] %v6012_v34 }
 0x2ae   : > { %8112 = vst [vmem:[#allocation78_spill] sm:$0xff] %v6036_v11  ;;  %v1326_v63 = vmax.f32 %v1325_v5, %v5746_v1  ;;  %v8126_v1 = vld [vmem:[#allocation47_spill] sm:$0xff] }
 0x2af   : > { %v1358_v27 = vmax.f32 %v8127_v55, %v8126_v1 }
 0x2b0   : > { %v1327_v43 = vmax.f32 %v1326_v63, %v5816_v23 }
 0x2b3   : > { %v6043_v59 = vpop.f32.mrf.mxu2 }
 0x2b4   : > { %v6016_v25 = vpop.f32.mrf.mxu1  ;;  %8116 = vst [vmem:[#allocation82_spill] sm:$0xff] %v6043_v59  ;;  %v6050_v21 = vpop.f32.mrf.mxu3  ;;  %v1328_v59 = vmax.f32 %v1327_v43, %v5858_v58  ;;  %v8128_v43 = vld [vmem:[#allocation63_spill] sm:$0xff] }
 0x2b5   : > { %v6014_v0 = vpop.f32.mrf.mxu0  ;;  %8105 = vst [vmem:[#allocation27_spill] sm:$0xff] %v6016_v25  ;;  %v1359_v58 = vmax.f32 %v1358_v27, %v8128_v43  ;;  %v8133_v43 = vld [vmem:[#allocation10_spill] sm:$0xff] }
 0x2b6   : > { %8104 = vst [vmem:[#allocation25_spill] sm:$0xff] %v6014_v0  ;;  %v1329_v3 = vmax.f32 %v1328_v59, %v5877_v16 }
 0x2b7   : > { %8120 = vst [vmem:[#allocation23_spill] sm:$0xff] %v6050_v21 }
 0x2b8   : > { %v1330_v26 = vmax.f32 %v1329_v3, %v5899_v33  ;;  %v8129_v3 = vld [vmem:[#allocation22_spill] sm:$0xff] }
 0x2b9   : > { %v1360_v33 = vmax.f32 %v1359_v58, %v8129_v3 }
 0x2ba   : > { %v1331_v5 = vmax.f32 %v1330_v26, %v5924_v41 }
 0x2bb   : > { %v6058_v53 = vpop.f32.mrf.mxu2 }
 0x2bc   : > { %v6022_v35 = vpop.f32.mrf.mxu1  ;;  %8122 = vst [vmem:[#allocation75_spill] sm:$0xff] %v6058_v53  ;;  %v6063_v31 = vpop.f32.mrf.mxu3  ;;  %v1332_v63 = vmax.f32 %v1331_v5, %v5934_v36  ;;  %v8132_v5 = vld [vmem:[#allocation14_spill] sm:$0xff] }
 0x2bd   : > { %v6020_v52 = vpop.f32.mrf.mxu0  ;;  %8123 = vst [vmem:[#allocation70_spill] sm:$0xff] %v6063_v31  ;;  %v8130_v31 = vld [vmem:[#allocation41_spill] sm:$0xff] }
 0x2be   : > { %v1333_v59 = vmax.f32 %v1332_v63, %v5950_v61  ;;  %v1361_v23 = vmax.f32 %v1360_v33, %v8130_v31 }
 0x2c0   : > { %v1334_v16 = vmax.f32 %v1333_v59, %v5958_v4  ;;  %v1362_v55 = vmax.f32 %v1361_v23, %v8132_v5 }
 0x2c2   : > { %v1335_v26 = vmax.f32 %v1334_v16, %v5974_v57  ;;  %v1363_v63 = vmax.f32 %v1362_v55, %v8133_v43  ;;  %v8136_v43 = vld [vmem:[#allocation86_spill] sm:$0xff] }
 0x2c3   : > { %v6073_v53 = vpop.f32.mrf.mxu2 }
 0x2c4   : > { %v6030_v49 = vpop.f32.mrf.mxu1  ;;  %v6083_v41 = vpop.f32.mrf.mxu3  ;;  %v1336_v27 = vmax.f32 %v1335_v26, %v5980_v62  ;;  %v1364_v33 = vmax.f32 %v1363_v63, %v5818_v7 }
 0x2c5   : > { %v6026_v46 = vpop.f32.mrf.mxu0  ;;  %8109 = vst [vmem:[#allocation56_spill] sm:$0xff] %v6030_v49 }
 0x2c6   : > { %v1337_v58 = vmax.f32 %v1336_v27, %v5990_v38  ;;  %v1365_v16 = vmax.f32 %v1364_v33, %v5860_v10 }
 0x2c8   : > { %v1338_v59 = vmax.f32 %v1337_v58, %v5998_v40  ;;  %v1366_v23 = vmax.f32 %v1365_v16, %v5879_v18  ;;  %v8135_v18 = vld [vmem:[#allocation50_spill] sm:$0xff] }
 0x2ca   : > { %v1339_v57 = vmax.f32 %v1338_v59, %v6010_v30  ;;  %v1367_v27 = vmax.f32 %v1366_v23, %v5901_v20  ;;  %v8139_v20 = vld [vmem:[#allocation38_spill] sm:$0xff] }
 0x2cb   : > { %v6091_v3 = vpop.f32.mrf.mxu2 }
 0x2cc   : > { %v6038_v37 = vpop.f32.mrf.mxu1  ;;  %v1340_v26 = vmax.f32 %v1339_v57, %v6014_v0  ;;  %v6101_v5 = vpop.f32.mrf.mxu3  ;;  %v1368_v58 = vmax.f32 %v1367_v27, %v5926_v44  ;;  %v1395_v0 = vmax.f32 %v8136_v43, %v8135_v18 }
 0x2cd   : > { %v6034_v2 = vpop.f32.mrf.mxu0 }
 0x2ce   : > { %8111 = vst [vmem:[#allocation34_spill] sm:$0xff] %v6034_v2  ;;  %v1341_v63 = vmax.f32 %v1340_v26, %v6020_v52  ;;  %v1369_v59 = vmax.f32 %v1368_v58, %v5936_v6  ;;  %v8138_v6 = vld [vmem:[#allocation53_spill] sm:$0xff] }
 0x2d0   : > { %v1342_v33 = vmax.f32 %v1341_v63, %v6026_v46  ;;  %v1370_v16 = vmax.f32 %v1369_v59, %v5952_v45 }
 0x2d2   : > { %v1343_v57 = vmax.f32 %v1342_v33, %v6034_v2  ;;  %v1371_v26 = vmax.f32 %v1370_v16, %v5960_v32  ;;  %v1432_v33 = vmax.f32 %v8139_v20, %v8138_v6  ;;  %v8140_v2 = vld [vmem:[#allocation12_spill] sm:$0xff]  ;;  %v8141_v32 = vld [vmem:[#allocation17_spill] sm:$0xff]  ;;  %v8143_v20 = vld [vmem:[#allocation31_spill] sm:$0xff] }
 0x2d3   : > { %v6109_v10 = vpop.f32.mrf.mxu2  ;;  %v1396_v59 = vmax.f32 %v1395_v0, %v8140_v2 }
 0x2d4   : > { %v6052_v11 = vpop.f32.mrf.mxu1  ;;  %v6120_v27 = vpop.f32.mrf.mxu3  ;;  %v1372_v58 = vmax.f32 %v1371_v26, %v5976_v13  ;;  %v8142_v26 = vld [vmem:[#allocation28_spill] sm:$0xff] }
 0x2d5   : > { %v6045_v19 = vpop.f32.mrf.mxu0  ;;  %v1397_v13 = vmax.f32 %v1396_v59, %v8142_v26  ;;  %v8148_v26 = vld [vmem:[#allocation68_spill] sm:$0xff] }
 0x2d6   : > { %8117 = vst [vmem:[#allocation76_spill] sm:$0xff] %v6045_v19  ;;  %v1344_v23 = vmax.f32 %v1343_v57, %v6045_v19  ;;  %v1373_v18 = vmax.f32 %v1372_v58, %v5982_v50  ;;  %v8144_v50 = vld [vmem:[#allocation44_spill] sm:$0xff] }
 0x2db   : > { %v6133_v16 = vpop.f32.mrf.mxu2 }
 0x2dc   : > { %v6065_v12 = vpop.f32.mrf.mxu1  ;;  %v6145_v19 = vpop.f32.mrf.mxu3 }
 0x2dd   : > { %v6055_v48 = vpop.f32.mrf.mxu0  ;;  %8124 = vst [vmem:[#allocation73_spill] sm:$0xff] %v6065_v12 }
 0x2de   : > { %8121 = vst [vmem:[#allocation18_spill] sm:$0xff] %v6055_v48  ;;  %v1345_v63 = vmax.f32 %v1344_v23, %v6055_v48  ;;  %v1374_v23 = vmax.f32 %v1373_v18, %v5992_v39  ;;  %v1433_v48 = vmax.f32 %v1432_v33, %v8141_v32  ;;  %v8147_v32 = vld [vmem:[#allocation88_spill] sm:$0xff] }
 0x2e0   : > { %v1375_v0 = vmax.f32 %v1374_v23, %v6000_v24  ;;  %v1434_v2 = vmax.f32 %v1433_v48, %v8143_v20  ;;  %v8146_v23 = vld [vmem:[#allocation61_spill] sm:$0xff] }
 0x2e2   : > { %v1376_v58 = vmax.f32 %v1375_v0, %v6012_v34  ;;  %v1435_v0 = vmax.f32 %v1434_v2, %v8146_v23 }
 0x2e3   : > { %v6157_v20 = vpop.f32.mrf.mxu2 }
 0x2e4   : > { %v6085_v1 = vpop.f32.mrf.mxu1  ;;  %v1377_v33 = vmax.f32 %v1376_v58, %v6016_v25  ;;  %v1436_v34 = vmax.f32 %v1435_v0, %v8148_v26  ;;  %v8149_v25 = vld [vmem:[#allocation54_spill] sm:$0xff]  ;;  %v8154_v26 = vld [vmem:[#allocation9_spill] sm:$0xff] }
 0x2e5   : > { %v6067_v21 = vpop.f32.mrf.mxu0  ;;  %8131 = vst [vmem:[#allocation15_spill] sm:$0xff] %v6085_v1  ;;  %v2268_v24 = vrot.slane %v8149_v25, 4 }
 0x2e6   : > { %8125 = vst [vmem:[#allocation11_spill] sm:$0xff] %v6067_v21  ;;  %v1346_v45 = vmax.f32 %v1345_v63, %v6067_v21  ;;  %v1398_v21 = vmax.f32 %v1397_v13, %v8144_v50 }
 0x2e8   : > { %v1399_v48 = vmax.f32 %v1398_v21, %v8147_v32 }
 0x2ec   : > { %v6103_v55 = vpop.f32.mrf.mxu1 }
 0x2ed   : > { %v6080_v9 = vpop.f32.mrf.mxu0  ;;  %8134 = vst [vmem:[#allocation57_spill] sm:$0xff] %v6103_v55 }
 0x2ee   : > { %v1347_v43 = vmax.f32 %v1346_v45, %v6080_v9 }
 0x2f4   : > { %v6123_v44 = vpop.f32.mrf.mxu1 }
 0x2f5   : > { %v6096_v31 = vpop.f32.mrf.mxu0  ;;  %8137 = vst [vmem:[#allocation66_spill] sm:$0xff] %v6123_v44 }
 0x2f6   : > { %v1348_v6 = vmax.f32 %v1347_v43, %v6096_v31 }
 0x2fc   : > { %v6147_v45 = vpop.f32.mrf.mxu1 }
 0x2fd   : > { %v6112_v7 = vpop.f32.mrf.mxu0  ;;  %8145 = vst [vmem:[#allocation24_spill] sm:$0xff] %v6147_v45 }
 0x2fe   : > { %v1349_v63 = vmax.f32 %v1348_v6, %v6112_v7  ;;  %v1378_v6 = vmax.f32 %v1377_v33, %v6022_v35  ;;  %v1437_v33 = vmax.f32 %v1436_v34, %v5808_v14 }
 0x300   : > { %v1379_v50 = vmax.f32 %v1378_v6, %v6030_v49  ;;  %v1438_v32 = vmax.f32 %v1437_v33, %v5866_v60  ;;  %v6169_v49 = vpop.f32.mrf.mxu3  ;;  %v6180_v60 = vpop.f32.mrf.mxu2 }
 0x301   : > { %8150 = vst [vmem:[#allocation26_spill] sm:$0xff] %v6169_v49 }
 0x302   : > { %v1439_v34 = vmax.f32 %v1438_v32, %v5895_v28 }
 0x304   : > { %v6171_v0 = vpop.f32.mrf.mxu1  ;;  %v1440_v33 = vmax.f32 %v1439_v34, %v5928_v29  ;;  %v8153_v34 = vld [vmem:[#allocation67_spill] sm:$0xff] }
 0x305   : > { %v6131_v57 = vpop.f32.mrf.mxu0  ;;  %8151 = vst [vmem:[#allocation54_spill] sm:$0xff] %v6171_v0 }
 0x306   : > { %v1350_v18 = vmax.f32 %v1349_v63, %v6131_v57  ;;  %v1400_v63 = vmax.f32 %v1399_v48, %v5799_v51  ;;  %v2269_v48 = vadd.f32 %v2268_v24, %v8149_v25  ;;  %v1441_v24 = vmax.f32 %v1440_v33, %v5942_v8  ;;  %v8162_v8 = vld [vmem:[#allocation71_spill] sm:$0xff] }
 0x308   : > { %v1401_v2 = vmax.f32 %v1400_v63, %v5852_v54  ;;  %v2270_v14 = vrot.slane %v2269_v48, 2  ;;  %v6194_v33 = vpop.f32.mrf.mxu3  ;;  %v6214_v51 = vpop.f32.mrf.mxu2 }
 0x30a   : > { %v1402_v6 = vmax.f32 %v1401_v2, %v5891_v22 }
 0x30d   : > { %v6151_v59 = vpop.f32.mrf.mxu0 }
 0x30e   : > { %v1351_v43 = vmax.f32 %v1350_v18, %v6151_v59  ;;  %v1380_v18 = vmax.f32 %v1379_v50, %v6038_v37 }
 0x310   : > { %v1352_v13 = vrot.slane %v1351_v43, 4  ;;  %v1381_v21 = vmax.f32 %v1380_v18, %v6052_v11 }
 0x312   : > { %v1353_v58 = vmax.f32 %v1351_v43, %v1352_v13  ;;  %v1382_v50 = vmax.f32 %v1381_v21, %v6065_v12  ;;  %v1403_v13 = vmax.f32 %v1402_v6, %v5922_v17  ;;  %v8152_v21 = vld [vmem:[#allocation42_spill] sm:$0xff]  ;;  %v6231_v12 = vpop.f32.mrf.mxu3 }
 0x313   : > { %v2305_v6 = vrot.slane %v8152_v21, 4  ;;  %8156 = vst [vmem:[#allocation42_spill] sm:$0xff] %v6194_v33 }
 0x314   : > { %v1354_v23 = vrot.slane %v1353_v58, 2  ;;  %v1383_v18 = vmax.f32 %v1382_v50, %v6085_v1  ;;  %v1404_v2 = vmax.f32 %v1403_v13, %v5938_v15  ;;  %v1442_v50 = vmax.f32 %v1441_v24, %v5956_v47  ;;  %v8172_v1 = vld [vmem:[#allocation89_spill] sm:$0xff] }
 0x315   : > { %v2271_v13 = vadd.f32 %v2270_v14, %v2269_v48  ;;  %v8159_v14 = vld [vmem:[#allocation60_spill] sm:$0xff] }
 0x316   : > { %v1355_v43 = vmax.f32 %v1353_v58, %v1354_v23  ;;  %v1384_v23 = vmax.f32 %v1383_v18, %v6103_v55  ;;  %v1405_v25 = vmax.f32 %v1404_v2, %v5954_v42  ;;  %v1443_v15 = vmax.f32 %v1442_v50, %v8154_v26  ;;  %v8155_v18 = vld [vmem:[#allocation87_spill] sm:$0xff]  ;;  %v8164_v42 = vld [vmem:[#allocation92_spill] sm:$0xff]  ;;  %8176 = vst [vmem:[#allocation60_spill] sm:$0xff] %v6231_v12 }
 0x317   : > { %v2272_v47 = vrot.slane %v2271_v13, 1 }
 0x318   : > { %v1356_v63 = vrot.slane %v1355_v43, 1  ;;  %v1385_v32 = vmax.f32 %v1384_v23, %v6123_v44  ;;  %v1406_v29 = vmax.f32 %v1405_v25, %v8153_v34  ;;  %v6200_v23 = vpop.f32.mrf.mxu1  ;;  %v2306_v25 = vadd.f32 %v2305_v6, %v8152_v21  ;;  %v8166_v6 = vld [vmem:[#allocation48_spill] sm:$0xff] }
 0x31a   : > { %v6185_v58 = vmax.f32 %v1355_v43, %v1356_v63  ;;  %v1386_v28 = vmax.f32 %v1385_v32, %v6147_v45  ;;  %v1407_v17 = vmax.f32 %v1406_v29, %v8155_v18  ;;  %v8157_v63 = vld [vmem:[#allocation45_spill] sm:$0xff]  ;;  %v8161_v29 = vld [vmem:[#allocation91_spill] sm:$0xff]  ;;  %v2342_v18 = vrot.slane %v8162_v8, 4 }
 0x31b   : > { %8158 = vst [vmem:[#allocation45_spill] sm:$0xff] %v6200_v23  ;;  %v8160_v32 = vld [vmem:[#allocation37_spill] sm:$0xff] }
 0x31c   : > { %v1473_v43 = vsub.f32 %v8114_v56, %v6185_v58  ;;  %v1481_v2 = vsub.f32 %v8157_v63, %v6185_v58  ;;  %v1387_v24 = vmax.f32 %v1386_v28, %v6171_v0  ;;  %v1489_v48 = vsub.f32 %v8159_v14, %v6185_v58  ;;  %v8163_v56 = vld [vmem:[#allocation19_spill] sm:$0xff]  ;;  %v8165_v28 = vld [vmem:[#allocation62_spill] sm:$0xff]  ;;  %v8168_v45 = vld [vmem:[#allocation13_spill] sm:$0xff] }
 0x31d   : > { %v1444_v50 = vmax.f32 %v1443_v15, %v8160_v32  ;;  %v1408_v26 = vmax.f32 %v1407_v17, %v8161_v29  ;;  %v1497_v34 = vsub.f32 %v8163_v56, %v6185_v58  ;;  %v2379_v15 = vrot.slane %v8166_v6, 4  ;;  %v8167_v17 = vld [vmem:[#allocation36_spill] sm:$0xff]  ;;  %v8169_v56 = vld [vmem:[#allocation29_spill] sm:$0xff] }
 0x31e   : > { %v1388_v63 = vmax.f32 %v1387_v24, %v6200_v23  ;;  %v1733_v14 = vmul.f32 1.442695, %v1473_v43  ;;  %v1749_v21 = vmul.f32 1.442695, %v1481_v2  ;;  %v1505_v32 = vsub.f32 %v8167_v17, %v6185_v58  ;;  %v8170_v24 = vld [vmem:[#allocation65_spill] sm:$0xff] }
 0x31f   : > { %v1445_v22 = vmax.f32 %v1444_v50, %v8164_v42  ;;  %v1409_v54 = vmax.f32 %v1408_v26, %v8165_v28  ;;  %v1765_v29 = vmul.f32 1.442695, %v1489_v48  ;;  %v2307_v0 = vrot.slane %v2306_v25, 2  ;;  %v8171_v28 = vld [vmem:[#allocation79_spill] sm:$0xff] }
 0x320   : > { %3795 = vpow2.f32 %v1733_v14  ;;  %v1513_v50 = vsub.f32 %v8170_v24, %v6185_v58  ;;  %v1781_v26 = vmul.f32 1.442695, %v1497_v34  ;;  %v1389_v42 = vrot.slane %v1388_v63, 4 }
 0x321   : > { %v1446_v44 = vmax.f32 %v1445_v22, %v8168_v45  ;;  %v1410_v55 = vmax.f32 %v1409_v54, %v8169_v56  ;;  %3797 = vpow2.f32 %v1749_v21  ;;  %v2273_v43 = vadd.f32 %v2272_v47, %v2271_v13  ;;  %v8173_v22 = vld [vmem:[#allocation58_spill] sm:$0xff] }
 0x322   : > { %v2343_v2 = vadd.f32 %v2342_v18, %v8162_v8  ;;  %v2380_v48 = vadd.f32 %v2379_v15, %v8166_v6  ;;  %v1521_v45 = vsub.f32 %v8173_v22, %v6185_v58  ;;  %3799 = vpow2.f32 %v1765_v29  ;;  %v8174_v56 = vld [vmem:[#allocation78_spill] sm:$0xff]  ;;  %v8177_v8 = vld [vmem:[#allocation21_spill] sm:$0xff]  ;;  %v8179_v6 = vld [vmem:[#allocation23_spill] sm:$0xff] }
 0x323   : > { %v1447_v23 = vmax.f32 %v1446_v44, %v8171_v28  ;;  %v1411_v17 = vmax.f32 %v1410_v55, %v8172_v1  ;;  %v1797_v54 = vmul.f32 1.442695, %v1505_v32  ;;  %v2308_v14 = vadd.f32 %v2307_v0, %v2306_v25  ;;  %v8175_v21 = vld [vmem:[#allocation30_spill] sm:$0xff]  ;;  %v8182_v15 = vld [vmem:[#allocation49_spill] sm:$0xff] }
 0x324   : > { %v1529_v47 = vsub.f32 %v8177_v8, %v6185_v58  ;;  %3801 = vpow2.f32 %v1781_v26  ;;  %v1813_v44 = vmul.f32 1.442695, %v1513_v50  ;;  %v1390_v55 = vmax.f32 %v1388_v63, %v1389_v42  ;;  %v8180_v32 = vld [vmem:[#allocation82_spill] sm:$0xff]  ;;  %v8184_v42 = vld [vmem:[#allocation75_spill] sm:$0xff] }
 0x325   : > { %v1448_v24 = vmax.f32 %v1447_v23, %v8174_v56  ;;  %v1412_v34 = vmax.f32 %v1411_v17, %v8175_v21  ;;  %3803 = vrcp.f32 %v2273_v43  ;;  %v2344_v18 = vrot.slane %v2343_v2, 2  ;;  %v8183_v26 = vld [vmem:[#allocation70_spill] sm:$0xff]  ;;  %v6245_v56 = vpop.f32.mrf.mxu2 }
 0x326   : > { %v6235_v13 = vpop.eup %3795  ;;  %v2381_v23 = vrot.slane %v2380_v48, 2  ;;  %v1537_v17 = vsub.f32 %v8182_v15, %v6185_v58  ;;  %3805 = vpow2.f32 %v1797_v54  ;;  %v1829_v22 = vmul.f32 1.442695, %v1521_v45 }
 0x327   : > { %8178 = vst [vmem:[#allocation71_spill] sm:$0xff] %v6235_v13  ;;  %v1449_v29 = vmax.f32 %v1448_v24, %v8179_v6  ;;  %v1413_v0 = vmax.f32 %v1412_v34, %v8180_v32  ;;  %v6239_v25 = vpop.eup %3797  ;;  %v2309_v8 = vrot.slane %v2308_v14, 1  ;;  %v8186_v34 = vld [vmem:[#allocation51_spill] sm:$0xff]  ;;  %3807 = vpow2.f32 %v1813_v44 }
 0x328   : > { %8181 = vst [vmem:[#allocation19_spill] sm:$0xff] %v6239_v25  ;;  %v2385_v43 = vadd.f32 %v6239_v25, %v6235_v13  ;;  %v6249_v24 = vpop.eup %3799  ;;  %v1545_v6 = vsub.f32 %v8186_v34, %v6185_v58  ;;  %v1845_v28 = vmul.f32 1.442695, %v1529_v47  ;;  %v1391_v15 = vrot.slane %v1390_v55, 2  ;;  %v8188_v25 = vld [vmem:[#allocation98_spill] sm:$0xff] }
 0x329   : > { %v1450_v50 = vmax.f32 %v1449_v29, %v8183_v26  ;;  %v1414_v63 = vmax.f32 %v1413_v0, %v8184_v42  ;;  %8185 = vst [vmem:[#allocation48_spill] sm:$0xff] %v6249_v24  ;;  %v2345_v54 = vadd.f32 %v2344_v18, %v2343_v2  ;;  %v2382_v42 = vadd.f32 %v2381_v23, %v2380_v48 }
 0x32a   : > { %v2386_v0 = vadd.f32 %v6249_v24, %v2385_v43  ;;  %v6256_v26 = vpop.eup %3801  ;;  %v1553_v13 = vsub.f32 %v8188_v25, %v6185_v58  ;;  %3809 = vpow2.f32 %v1829_v22  ;;  %v1861_v32 = vmul.f32 1.442695, %v1537_v17 }
 0x32b   : > { %v1451_v45 = vmax.f32 %v1450_v50, %v6083_v41  ;;  %v1415_v29 = vmax.f32 %v1414_v63, %v6073_v53  ;;  %8187 = vst [vmem:[#allocation36_spill] sm:$0xff] %v6256_v26  ;;  %v6260_v21 = vpop.eup %3803  ;;  %v2310_v44 = vadd.f32 %v2309_v8, %v2308_v14  ;;  %v8190_v63 = vld [vmem:[#allocation97_spill] sm:$0xff]  ;;  %3811 = vpow2.f32 %v1845_v28  ;;  %v6271_v14 = vpop.f32.mrf.mxu3 }
 0x32c   : > { %v2387_v18 = vadd.f32 %v6256_v26, %v2386_v0  ;;  %v6265_v50 = vpop.eup %3805  ;;  %v1561_v43 = vsub.f32 %v8190_v63, %v6185_v58  ;;  %v1877_v48 = vmul.f32 1.442695, %v1545_v6  ;;  %v1392_v23 = vmax.f32 %v1390_v55, %v1391_v15  ;;  %8191 = vst [vmem:[#allocation89_spill] sm:$0xff] %v6271_v14 }
 0x32d   : > { %v1452_v47 = vmax.f32 %v1451_v45, %v6101_v5  ;;  %v1416_v2 = vmax.f32 %v1415_v29, %v6091_v3  ;;  %8189 = vst [vmem:[#allocation65_spill] sm:$0xff] %v6265_v50  ;;  %v2346_v25 = vrot.slane %v2345_v54, 1  ;;  %v6274_v34 = vpop.eup %3807  ;;  %v2383_v45 = vrot.slane %v2382_v42, 1 }
 0x32e   : > { %v2388_v8 = vadd.f32 %v6265_v50, %v2387_v18  ;;  %8192 = vst [vmem:[#allocation58_spill] sm:$0xff] %v6274_v34  ;;  %v1569_v29 = vsub.f32 %v5934_v36, %v6185_v58  ;;  %3813 = vpow2.f32 %v1861_v32  ;;  %v1893_v0 = vmul.f32 1.442695, %v1553_v13  ;;  %v6287_v32 = vpop.f32.mrf.mxu2 }
 0x32f   : > { %v1453_v17 = vmax.f32 %v1452_v47, %v6120_v27  ;;  %v1417_v22 = vmax.f32 %v1416_v2, %v6109_v10  ;;  %3815 = vrcp.f32 %v2310_v44  ;;  %v1577_v47 = vsub.f32 %v5950_v61, %v6185_v58 }
 0x330   : > { %v2389_v6 = vadd.f32 %v6274_v34, %v2388_v8  ;;  %v6281_v15 = vpop.eup %3809  ;;  %3817 = vpow2.f32 %v1877_v48  ;;  %v1909_v2 = vmul.f32 1.442695, %v1561_v43  ;;  %v1393_v18 = vrot.slane %v1392_v23, 1  ;;  %v8195_v48 = vld [vmem:[#allocation85_spill] sm:$0xff] }
 0x331   : > { %v1454_v28 = vmax.f32 %v1453_v17, %v6145_v19  ;;  %v1418_v55 = vmax.f32 %v1417_v22, %v6133_v16  ;;  %8193 = vst [vmem:[#allocation21_spill] sm:$0xff] %v6281_v15  ;;  %v2347_v63 = vadd.f32 %v2346_v25, %v2345_v54  ;;  %v6290_v17 = vpop.eup %3811  ;;  %v2384_v22 = vadd.f32 %v2383_v45, %v2382_v42 }
 0x332   : > { %v2390_v44 = vadd.f32 %v6281_v15, %v2389_v6  ;;  %8194 = vst [vmem:[#allocation49_spill] sm:$0xff] %v6290_v17  ;;  %v1585_v8 = vsub.f32 %v5958_v4, %v6185_v58  ;;  %3819 = vpow2.f32 %v1893_v0  ;;  %v1925_v61 = vmul.f32 1.442695, %v1569_v29 }
 0x333   : > { %v1455_v36 = vmax.f32 %v1454_v28, %v6169_v49  ;;  %v1419_v13 = vmax.f32 %v1418_v55, %v6157_v20  ;;  %v1593_v25 = vsub.f32 %v8195_v48, %v6185_v58  ;;  %v1601_v6 = vsub.f32 %v5980_v62, %v6185_v58 }
 0x334   : > { %v2391_v28 = vadd.f32 %v6290_v17, %v2390_v44  ;;  %v6299_v55 = vpop.eup %3813  ;;  %3821 = vpow2.f32 %v1909_v2  ;;  %v1941_v42 = vmul.f32 1.442695, %v1577_v47  ;;  %v6303_v45 = vmax.f32 %v1392_v23, %v1393_v18  ;;  %v6317_v2 = vpop.f32.mrf.mxu3 }
 0x335   : > { %v1456_v43 = vmax.f32 %v1455_v36, %v6194_v33  ;;  %v1420_v54 = vmax.f32 %v1419_v13, %v6180_v60  ;;  %8196 = vst [vmem:[#allocation51_spill] sm:$0xff] %v6299_v55  ;;  %v6305_v4 = vpop.eup %3815  ;;  %3823 = vrcp.f32 %v2347_v63  ;;  %v1609_v0 = vsub.f32 %v5990_v38, %v6185_v58 }
 0x336   : > { %8197 = vst [vmem:[#allocation98_spill] sm:$0xff] %v6305_v4  ;;  %v2392_v36 = vadd.f32 %v6299_v55, %v2391_v28  ;;  %v6311_v13 = vpop.eup %3817  ;;  %v1617_v62 = vsub.f32 %v5998_v40, %v6185_v58  ;;  %3825 = vpow2.f32 %v1925_v61  ;;  %v1957_v23 = vmul.f32 1.442695, %v1585_v8  ;;  %v8201_v61 = vld [vmem:[#allocation47_spill] sm:$0xff] }
 0x337   : > { %v1457_v29 = vmax.f32 %v1456_v43, %v6231_v12  ;;  %8198 = vst [vmem:[#allocation97_spill] sm:$0xff] %v6311_v13  ;;  %v1421_v44 = vmax.f32 %v1420_v54, %v6214_v51  ;;  %3827 = vrcp.f32 %v2384_v22  ;;  %v1973_v18 = vmul.f32 1.442695, %v1593_v25  ;;  %v8200_v54 = vld [vmem:[#allocation80_spill] sm:$0xff] }
 0x338   : > { %v2393_v63 = vadd.f32 %v6311_v13, %v2392_v36  ;;  %v6320_v38 = vpop.eup %3819  ;;  %3829 = vpow2.f32 %v1941_v42  ;;  %v1989_v48 = vmul.f32 1.442695, %v1601_v6  ;;  %v1474_v28 = vsub.f32 %v8200_v54, %v6303_v45  ;;  %v8203_v42 = vld [vmem:[#allocation25_spill] sm:$0xff] }
 0x339   : > { %v1458_v47 = vmax.f32 %v1457_v29, %v6271_v14  ;;  %8199 = vst [vmem:[#allocation85_spill] sm:$0xff] %v6320_v38  ;;  %v1422_v43 = vmax.f32 %v1421_v44, %v6245_v56  ;;  %v1625_v40 = vsub.f32 %v6010_v30, %v6185_v58  ;;  %v2005_v22 = vmul.f32 1.442695, %v1609_v0  ;;  %v6340_v0 = vpop.f32.mrf.mxu2 }
 0x33a   : > { %v2394_v8 = vadd.f32 %v6320_v38, %v2393_v63  ;;  %v1482_v25 = vsub.f32 %v8201_v61, %v6303_v45  ;;  %v6330_v29 = vpop.eup %3821  ;;  %v1633_v6 = vsub.f32 %v8203_v42, %v6185_v58  ;;  %3831 = vpow2.f32 %v1957_v23 }
 0x33b   : > { %8202 = vst [vmem:[#allocation80_spill] sm:$0xff] %v6330_v29  ;;  %v6333_v36 = vmax.f32 %v1458_v47, %v6317_v2  ;;  %v2021_v44 = vmul.f32 1.442695, %v1617_v62  ;;  %v6337_v54 = vpop.eup %3823  ;;  %v1423_v30 = vmax.f32 %v1422_v43, %v6287_v32  ;;  %v1641_v63 = vsub.f32 %v6020_v52, %v6185_v58  ;;  %v8206_v62 = vld [vmem:[#allocation63_spill] sm:$0xff] }
 0x33c   : > { %8204 = vst [vmem:[#allocation47_spill] sm:$0xff] %v6337_v54  ;;  %3833 = vpow2.f32 %v1973_v18  ;;  %v2395_v61 = vadd.f32 %v6330_v29, %v2394_v8  ;;  %v6345_v26 = vpop.eup %3825  ;;  %v1649_v47 = vsub.f32 %v6026_v46, %v6185_v58  ;;  %v1490_v23 = vsub.f32 %v8206_v62, %v6303_v45  ;;  %v8209_v46 = vld [vmem:[#allocation22_spill] sm:$0xff] }
 0x33d   : > { %8205 = vst [vmem:[#allocation25_spill] sm:$0xff] %v6345_v26  ;;  %3835 = vpow2.f32 %v1989_v48  ;;  %v1735_v42 = vmul.f32 1.442695, %v1474_v28  ;;  %v6351_v24 = vpop.eup %3827  ;;  %v2037_v43 = vmul.f32 1.442695, %v1625_v40  ;;  %v6357_v8 = vmax.f32 %v1423_v30, %v6340_v0  ;;  %v8210_v62 = vld [vmem:[#allocation34_spill] sm:$0xff] }
 0x33e   : > { %8207 = vst [vmem:[#allocation63_spill] sm:$0xff] %v6351_v24  ;;  %3837 = vpow2.f32 %v2005_v22  ;;  %v2396_v34 = vadd.f32 %v6345_v26, %v2395_v61  ;;  %v1751_v52 = vmul.f32 1.442695, %v1482_v25  ;;  %v6354_v18 = vpop.eup %3829  ;;  %v2053_v50 = vmul.f32 1.442695, %v1633_v6  ;;  %v8212_v25 = vld [vmem:[#allocation76_spill] sm:$0xff] }
 0x33f   : > { %8208 = vst [vmem:[#allocation101_spill] sm:$0xff] %v6354_v18  ;;  %3839 = vpow2.f32 %v2021_v44  ;;  %v1498_v48 = vsub.f32 %v8209_v46, %v6303_v45  ;;  %v1657_v28 = vsub.f32 %v8210_v62, %v6185_v58  ;;  %v2069_v17 = vmul.f32 1.442695, %v1641_v63  ;;  %v8213_v30 = vld [vmem:[#allocation41_spill] sm:$0xff]  ;;  %v8215_v46 = vld [vmem:[#allocation18_spill] sm:$0xff]  ;;  %v8217_v62 = vld [vmem:[#allocation11_spill] sm:$0xff] }
 0x340   : > { %v2397_v22 = vadd.f32 %v6354_v18, %v2396_v34  ;;  %3841 = vpow2.f32 %v1735_v42  ;;  %v6364_v40 = vpop.eup %3831  ;;  %v1665_v61 = vsub.f32 %v8212_v25, %v6185_v58  ;;  %v1506_v24 = vsub.f32 %v8213_v30, %v6303_v45  ;;  %v8218_v25 = vld [vmem:[#allocation14_spill] sm:$0xff] }
 0x341   : > { %8211 = vst [vmem:[#allocation22_spill] sm:$0xff] %v6364_v40  ;;  %3843 = vpow2.f32 %v1751_v52  ;;  %v1767_v6 = vmul.f32 1.442695, %v1490_v23  ;;  %v1673_v15 = vsub.f32 %v8215_v46, %v6185_v58  ;;  %v2085_v63 = vmul.f32 1.442695, %v1649_v47 }
 0x342   : > { %v6370_v44 = vpop.eup %3833  ;;  %3845 = vpow2.f32 %v2037_v43  ;;  %v2398_v34 = vadd.f32 %v6364_v40, %v2397_v22  ;;  %v1681_v54 = vsub.f32 %v8217_v62, %v6185_v58  ;;  %v1514_v30 = vsub.f32 %v8218_v25, %v6303_v45 }
 0x343   : > { %8214 = vst [vmem:[#allocation34_spill] sm:$0xff] %v6370_v44  ;;  %v6375_v42 = vpop.eup %3835  ;;  %3847 = vpow2.f32 %v2053_v50  ;;  %v1783_v52 = vmul.f32 1.442695, %v1498_v48  ;;  %v1689_v13 = vsub.f32 %v6080_v9, %v6185_v58  ;;  %v2101_v43 = vmul.f32 1.442695, %v1657_v28  ;;  %v8221_v50 = vld [vmem:[#allocation10_spill] sm:$0xff] }
 0x344   : > { %8216 = vst [vmem:[#allocation76_spill] sm:$0xff] %v6375_v42  ;;  %v6381_v23 = vpop.eup %3837  ;;  %3849 = vpow2.f32 %v2069_v17  ;;  %v2399_v47 = vadd.f32 %v6370_v44, %v2398_v34  ;;  %v1697_v46 = vsub.f32 %v6096_v31, %v6185_v58  ;;  %v1522_v62 = vsub.f32 %v8221_v50, %v6303_v45  ;;  %v8224_v31 = vld [vmem:[#allocation55_spill] sm:$0xff] }
 0x345   : > { %8219 = vst [vmem:[#allocation41_spill] sm:$0xff] %v6381_v23  ;;  %v6386_v22 = vpop.eup %3839  ;;  %3851 = vpow2.f32 %v1767_v6  ;;  %v1799_v25 = vmul.f32 1.442695, %v1506_v24  ;;  %v1705_v55 = vsub.f32 %v6112_v7, %v6185_v58  ;;  %v2117_v9 = vmul.f32 1.442695, %v1665_v61 }
 0x346   : > { %8220 = vst [vmem:[#allocation18_spill] sm:$0xff] %v6386_v22  ;;  %v6392_v48 = vpop.eup %3841  ;;  %3853 = vpow2.f32 %v2085_v63  ;;  %v2400_v17 = vadd.f32 %v6375_v42, %v2399_v47  ;;  %v1713_v34 = vsub.f32 %v6131_v57, %v6185_v58  ;;  %v1530_v29 = vsub.f32 %v8224_v31, %v6303_v45  ;;  %v6408_v63 = vpop.f32.mrf.mxu2  ;;  %v8227_v57 = vld [vmem:[#allocation77_spill] sm:$0xff] }
 0x347   : > { %8222 = vst [vmem:[#allocation11_spill] sm:$0xff] %v6392_v48  ;;  %v6397_v28 = vpop.eup %3843  ;;  %3855 = vpow2.f32 %v1783_v52  ;;  %v1815_v6 = vmul.f32 1.442695, %v1514_v30  ;;  %v1721_v50 = vsub.f32 %v6151_v59, %v6185_v58  ;;  %v2133_v7 = vmul.f32 1.442695, %v1673_v15 }
 0x348   : > { %8223 = vst [vmem:[#allocation14_spill] sm:$0xff] %v6397_v28  ;;  %v6403_v24 = vpop.eup %3845  ;;  %3857 = vpow2.f32 %v2101_v43  ;;  %v2401_v61 = vadd.f32 %v6381_v23, %v2400_v17  ;;  %v2149_v42 = vmul.f32 1.442695, %v1681_v54  ;;  %v1538_v38 = vsub.f32 %v8227_v57, %v6303_v45  ;;  %v8230_v43 = vld [vmem:[#allocation20_spill] sm:$0xff] }
 0x349   : > { %8225 = vst [vmem:[#allocation10_spill] sm:$0xff] %v6403_v24  ;;  %v6410_v47 = vpop.eup %3847  ;;  %3859 = vpow2.f32 %v1799_v25  ;;  %v1831_v52 = vmul.f32 1.442695, %v1522_v62  ;;  %v2165_v31 = vmul.f32 1.442695, %v1689_v13  ;;  %v2422_v58 = vadd.f32 %v6397_v28, %v6392_v48  ;;  %v8233_v28 = vld [vmem:[#allocation43_spill] sm:$0xff] }
 0x34a   : > { %8226 = vst [vmem:[#allocation55_spill] sm:$0xff] %v6410_v47  ;;  %v6414_v30 = vpop.eup %3849  ;;  %3861 = vpow2.f32 %v2117_v9  ;;  %v2402_v59 = vadd.f32 %v6386_v22, %v2401_v61  ;;  %v1546_v17 = vsub.f32 %v8230_v43, %v6303_v45  ;;  %v1847_v54 = vmul.f32 1.442695, %v1530_v29 }
 0x34b   : > { %8228 = vst [vmem:[#allocation77_spill] sm:$0xff] %v6414_v30  ;;  %v6419_v15 = vpop.eup %3851  ;;  %3863 = vpow2.f32 %v1815_v6  ;;  %v1425_v25 = vmax.f32 %v6357_v8, %v6408_v63  ;;  %v2181_v9 = vmul.f32 1.442695, %v1697_v46  ;;  %v1554_v48 = vsub.f32 %v8233_v28, %v6303_v45 }
 0x34c   : > { %8229 = vst [vmem:[#allocation102_spill] sm:$0xff] %v6419_v15  ;;  %v6425_v62 = vpop.eup %3853  ;;  %3865 = vpow2.f32 %v2133_v7  ;;  %v2403_v13 = vadd.f32 %v6403_v24, %v2402_v59  ;;  %v2423_v61 = vadd.f32 %v6419_v15, %v2422_v58  ;;  %v1863_v43 = vmul.f32 1.442695, %v1538_v38  ;;  %v8236_v59 = vld [vmem:[#allocation96_spill] sm:$0xff] }
 0x34d   : > { %8231 = vst [vmem:[#allocation20_spill] sm:$0xff] %v6425_v62  ;;  %v6429_v57 = vpop.eup %3855  ;;  %3867 = vpow2.f32 %v1831_v52  ;;  %v1426_v6 = vrot.slane %v1425_v25, 4  ;;  %v2197_v8 = vmul.f32 1.442695, %v1705_v55  ;;  %v1562_v58 = vsub.f32 %v8236_v59, %v6303_v45 }
 0x34e   : > { %8232 = vst [vmem:[#allocation103_spill] sm:$0xff] %v6429_v57  ;;  %v6433_v29 = vpop.eup %3857  ;;  %3869 = vpow2.f32 %v2149_v42  ;;  %v2404_v23 = vadd.f32 %v6410_v47, %v2403_v13  ;;  %v2424_v46 = vadd.f32 %v6429_v57, %v2423_v61  ;;  %v1879_v15 = vmul.f32 1.442695, %v1546_v17  ;;  %v8239_v61 = vld [vmem:[#allocation69_spill] sm:$0xff]  ;;  %v6451_v17 = vpop.f32.mrf.mxu3 }
 0x34f   : > { %8234 = vst [vmem:[#allocation43_spill] sm:$0xff] %v6433_v29  ;;  %v6437_v7 = vpop.eup %3859  ;;  %3871 = vpow2.f32 %v1847_v54  ;;  %v1427_v24 = vmax.f32 %v1425_v25, %v1426_v6  ;;  %v2213_v38 = vmul.f32 1.442695, %v1713_v34  ;;  %v2229_v13 = vmul.f32 1.442695, %v1721_v50  ;;  %v8243_v25 = vld [vmem:[#allocation46_spill] sm:$0xff] }
 0x350   : > { %8235 = vst [vmem:[#allocation104_spill] sm:$0xff] %v6437_v7  ;;  %v6441_v28 = vpop.eup %3861  ;;  %3873 = vpow2.f32 %v2165_v31  ;;  %v2405_v52 = vadd.f32 %v6414_v30, %v2404_v23  ;;  %v2425_v55 = vadd.f32 %v6437_v7, %v2424_v46  ;;  %v1570_v57 = vsub.f32 %v8239_v61, %v6303_v45  ;;  %v8244_v6 = vld [vmem:[#allocation93_spill] sm:$0xff] }
 0x351   : > { %8237 = vst [vmem:[#allocation96_spill] sm:$0xff] %v6441_v28  ;;  %v6445_v42 = vpop.eup %3863  ;;  %3875 = vpow2.f32 %v1863_v43  ;;  %v1895_v22 = vmul.f32 1.442695, %v1554_v48  ;;  %v1428_v23 = vrot.slane %v1427_v24, 2  ;;  %v1578_v50 = vsub.f32 %v8243_v25, %v6303_v45  ;;  %v8248_v7 = vld [vmem:[#allocation33_spill] sm:$0xff] }
 0x352   : > { %8238 = vst [vmem:[#allocation105_spill] sm:$0xff] %v6445_v42  ;;  %v6449_v59 = vpop.eup %3865  ;;  %3877 = vpow2.f32 %v2181_v9  ;;  %v2406_v31 = vadd.f32 %v6425_v62, %v2405_v52  ;;  %v2426_v34 = vadd.f32 %v6445_v42, %v2425_v55  ;;  %v1586_v46 = vsub.f32 %v8244_v6, %v6303_v45  ;;  %v8246_v52 = vld [vmem:[#allocation32_spill] sm:$0xff] }
 0x353   : > { %8240 = vst [vmem:[#allocation69_spill] sm:$0xff] %v6449_v59  ;;  %v6455_v54 = vpop.eup %3867  ;;  %3879 = vpow2.f32 %v1879_v15  ;;  %v1911_v48 = vmul.f32 1.442695, %v1562_v58  ;;  %v1594_v61 = vsub.f32 %v8246_v52, %v6303_v45  ;;  %v1602_v25 = vsub.f32 %v8248_v7, %v6303_v45  ;;  %v8252_v7 = vld [vmem:[#allocation16_spill] sm:$0xff] }
 0x354   : > { %8241 = vst [vmem:[#allocation106_spill] sm:$0xff] %v6451_v17  ;;  %v6461_v43 = vpop.eup %3869  ;;  %3881 = vpow2.f32 %v2197_v8  ;;  %v2407_v9 = vadd.f32 %v6433_v29, %v2406_v31  ;;  %v2427_v55 = vadd.f32 %v6455_v54, %v2426_v34  ;;  %v1610_v6 = vsub.f32 %v5992_v39, %v6303_v45  ;;  %v8251_v34 = vld [vmem:[#allocation59_spill] sm:$0xff] }
 0x355   : > { %8242 = vst [vmem:[#allocation107_spill] sm:$0xff] %v6455_v54  ;;  %v6467_v42 = vpop.eup %3871  ;;  %3883 = vpow2.f32 %v1895_v22  ;;  %v1927_v15 = vmul.f32 1.442695, %v1570_v57  ;;  %v1429_v52 = vmax.f32 %v1427_v24, %v1428_v23  ;;  %v1618_v47 = vsub.f32 %v8251_v34, %v6303_v45  ;;  %v8255_v24 = vld [vmem:[#allocation27_spill] sm:$0xff] }
 0x356   : > { %8245 = vst [vmem:[#allocation46_spill] sm:$0xff] %v6461_v43  ;;  %v6473_v58 = vpop.eup %3873  ;;  %3885 = vpow2.f32 %v2213_v38  ;;  %v2408_v8 = vadd.f32 %v6441_v28, %v2407_v9  ;;  %v2428_v31 = vadd.f32 %v6467_v42, %v2427_v55  ;;  %v1626_v54 = vsub.f32 %v8252_v7, %v6303_v45 }
 0x357   : > { %8247 = vst [vmem:[#allocation93_spill] sm:$0xff] %v6467_v42  ;;  %v6477_v30 = vpop.eup %3875  ;;  %3887 = vpow2.f32 %v1911_v48  ;;  %v1943_v39 = vmul.f32 1.442695, %v1578_v50  ;;  %v1959_v38 = vmul.f32 1.442695, %v1586_v46  ;;  %v1634_v23 = vsub.f32 %v8255_v24, %v6303_v45 }
 0x358   : > { %8249 = vst [vmem:[#allocation32_spill] sm:$0xff] %v6473_v58  ;;  %v6483_v22 = vpop.eup %3877  ;;  %3889 = vpow2.f32 %v2229_v13  ;;  %v2409_v57 = vadd.f32 %v6449_v59, %v2408_v8  ;;  %v2429_v9 = vadd.f32 %v6477_v30, %v2428_v31  ;;  %v1642_v34 = vsub.f32 %v6022_v35, %v6303_v45  ;;  %v8258_v31 = vld [vmem:[#allocation56_spill] sm:$0xff]  ;;  %v8265_v59 = vld [vmem:[#allocation15_spill] sm:$0xff] }
 0x359   : > { %8250 = vst [vmem:[#allocation33_spill] sm:$0xff] %v6477_v30  ;;  %v6487_v55 = vpop.eup %3879  ;;  %3891 = vpow2.f32 %v1927_v15  ;;  %v1975_v7 = vmul.f32 1.442695, %v1594_v61  ;;  %v1991_v13 = vmul.f32 1.442695, %v1602_v25  ;;  %v1430_v46 = vrot.slane %v1429_v52, 1  ;;  %v6505_v61 = vpop.f32.mrf.mxu3 }
 0x35a   : > { %8253 = vst [vmem:[#allocation59_spill] sm:$0xff] %v6483_v22  ;;  %v6493_v48 = vpop.eup %3881  ;;  %v2410_v50 = vadd.f32 %v6461_v43, %v2409_v57  ;;  %v2430_v8 = vadd.f32 %v6487_v55, %v2429_v9  ;;  %v1650_v29 = vsub.f32 %v8258_v31, %v6303_v45  ;;  %v1658_v24 = vsub.f32 %v6038_v37, %v6303_v45  ;;  %v8283_v43 = vld [vmem:[#allocation45_spill] sm:$0xff] }
 0x35b   : > { %8254 = vst [vmem:[#allocation16_spill] sm:$0xff] %v6487_v55  ;;  %v6497_v42 = vpop.eup %3883  ;;  %3893 = vpow2.f32 %v1943_v39  ;;  %v2007_v35 = vmul.f32 1.442695, %v1610_v6  ;;  %v2023_v25 = vmul.f32 1.442695, %v1618_v47  ;;  %v1666_v31 = vsub.f32 %v6052_v11, %v6303_v45 }
 0x35c   : > { %8256 = vst [vmem:[#allocation27_spill] sm:$0xff] %v6493_v48  ;;  %v6503_v15 = vpop.eup %3885  ;;  %v2411_v57 = vadd.f32 %v6473_v58, %v2410_v50  ;;  %3895 = vpow2.f32 %v1959_v38  ;;  %v2431_v9 = vadd.f32 %v6497_v42, %v2430_v8  ;;  %v2039_v55 = vmul.f32 1.442695, %v1626_v54  ;;  %v8264_v38 = vld [vmem:[#allocation73_spill] sm:$0xff] }
 0x35d   : > { %8257 = vst [vmem:[#allocation108_spill] sm:$0xff] %v6497_v42  ;;  %v6509_v62 = vpop.eup %3887  ;;  %3897 = vpow2.f32 %v1975_v7  ;;  %v2055_v37 = vmul.f32 1.442695, %v1634_v23  ;;  %v6517_v50 = vmax.f32 %v1429_v52, %v1430_v46  ;;  %v1674_v8 = vsub.f32 %v8264_v38, %v6303_v45  ;;  %v8267_v52 = vld [vmem:[#allocation57_spill] sm:$0xff]  ;;  %v8278_v42 = vld [vmem:[#allocation54_spill] sm:$0xff] }
 0x35e   : > { %8259 = vst [vmem:[#allocation56_spill] sm:$0xff] %v6503_v15  ;;  %v6513_v39 = vpop.eup %3889  ;;  %v2412_v6 = vadd.f32 %v6483_v22, %v2411_v57  ;;  %3899 = vpow2.f32 %v1991_v13  ;;  %v2432_v30 = vadd.f32 %v6509_v62, %v2431_v9  ;;  %v1682_v11 = vsub.f32 %v8265_v59, %v6303_v45 }
 0x35f   : > { %8260 = vst [vmem:[#allocation109_spill] sm:$0xff] %v6505_v61  ;;  %v6519_v47 = vpop.eup %3891  ;;  %3901 = vpow2.f32 %v2007_v35  ;;  %v2071_v54 = vmul.f32 1.442695, %v1642_v34  ;;  %v2087_v7 = vmul.f32 1.442695, %v1650_v29  ;;  %v1690_v46 = vsub.f32 %v8267_v52, %v6303_v45  ;;  %v8269_v35 = vld [vmem:[#allocation86_spill] sm:$0xff] }
 0x360   : > { %8261 = vst [vmem:[#allocation110_spill] sm:$0xff] %v6509_v62  ;;  %v2413_v23 = vadd.f32 %v6493_v48, %v2412_v6  ;;  %3903 = vpow2.f32 %v2023_v25  ;;  %v2433_v13 = vadd.f32 %v6519_v47, %v2432_v30  ;;  %v2103_v9 = vmul.f32 1.442695, %v1658_v24  ;;  %v8271_v30 = vld [vmem:[#allocation66_spill] sm:$0xff] }
 0x361   : > { %8262 = vst [vmem:[#allocation111_spill] sm:$0xff] %v6513_v39  ;;  %v6527_v57 = vpop.eup %3893  ;;  %3905 = vpow2.f32 %v2039_v55  ;;  %v2119_v28 = vmul.f32 1.442695, %v1666_v31  ;;  %v1475_v29 = vsub.f32 %v8269_v35, %v6517_v50  ;;  %v1698_v6 = vsub.f32 %v8271_v30, %v6303_v45  ;;  %v8272_v55 = vld [vmem:[#allocation50_spill] sm:$0xff] }
 0x362   : > { %8263 = vst [vmem:[#allocation112_spill] sm:$0xff] %v6519_v47  ;;  %v6531_v38 = vpop.eup %3895  ;;  %v2414_v59 = vadd.f32 %v6503_v15, %v2413_v23  ;;  %3907 = vpow2.f32 %v2055_v37  ;;  %v2434_v34 = vadd.f32 %v6527_v57, %v2433_v13  ;;  %v2135_v52 = vmul.f32 1.442695, %v1674_v8 }
 0x363   : > { %8266 = vst [vmem:[#allocation73_spill] sm:$0xff] %v6527_v57  ;;  %v6537_v25 = vpop.eup %3897  ;;  %3909 = vpow2.f32 %v2071_v54  ;;  %v1483_v24 = vsub.f32 %v8272_v55, %v6517_v50  ;;  %v2151_v37 = vmul.f32 1.442695, %v1682_v11  ;;  %v1460_v62 = vmax.f32 %v6333_v36, %v6451_v17  ;;  %v8276_v54 = vld [vmem:[#allocation24_spill] sm:$0xff] }
 0x364   : > { %8268 = vst [vmem:[#allocation15_spill] sm:$0xff] %v6531_v38  ;;  %v6543_v31 = vpop.eup %3899  ;;  %v6546_v23 = vadd.f32 %v6513_v39, %v2414_v59  ;;  %3911 = vpow2.f32 %v2087_v7  ;;  %v2435_v13 = vadd.f32 %v6531_v38, %v2434_v34  ;;  %v1706_v8 = vsub.f32 %v8276_v54, %v6303_v45  ;;  %v6560_v34 = vpop.f32.mrf.mxu3  ;;  %v8281_v54 = vld [vmem:[#allocation12_spill] sm:$0xff] }
 0x365   : > { %8270 = vst [vmem:[#allocation57_spill] sm:$0xff] %v6537_v25  ;;  %v6549_v35 = vpop.eup %3901  ;;  %3913 = vpow2.f32 %v2103_v9  ;;  %v2167_v30 = vmul.f32 1.442695, %v1690_v46  ;;  %v1714_v59 = vsub.f32 %v8278_v42, %v6303_v45  ;;  %v1737_v7 = vmul.f32 1.442695, %v1475_v29 }
 0x366   : > { %8273 = vst [vmem:[#allocation86_spill] sm:$0xff] %v6543_v31  ;;  %v6555_v55 = vpop.eup %3903  ;;  %3915 = vpow2.f32 %v2119_v28  ;;  %v2436_v11 = vadd.f32 %v6537_v25, %v2435_v13  ;;  %v1461_v36 = vmax.f32 %v1460_v62, %v6505_v61  ;;  %v1491_v9 = vsub.f32 %v8281_v54, %v6517_v50  ;;  %v8285_v62 = vld [vmem:[#allocation28_spill] sm:$0xff] }
 0x367   : > { %8274 = vst [vmem:[#allocation66_spill] sm:$0xff] %v6546_v23  ;;  %v6562_v23 = vpop.eup %3905  ;;  %3917 = vpow2.f32 %v2135_v52  ;;  %v1753_v46 = vmul.f32 1.442695, %v1483_v24  ;;  %v1722_v42 = vsub.f32 %v8283_v43, %v6303_v45  ;;  %v2183_v28 = vmul.f32 1.442695, %v1698_v6  ;;  %v8288_v43 = vld [vmem:[#allocation44_spill] sm:$0xff] }
 0x368   : > { %8275 = vst [vmem:[#allocation50_spill] sm:$0xff] %v6549_v35  ;;  %v6567_v58 = vpop.eup %3907  ;;  %3919 = vpow2.f32 %v2151_v37  ;;  %v2437_v29 = vadd.f32 %v6543_v31, %v2436_v11  ;;  %v2199_v57 = vmul.f32 1.442695, %v1706_v8  ;;  %v1499_v52 = vsub.f32 %v8285_v62, %v6517_v50 }
 0x369   : > { %8277 = vst [vmem:[#allocation24_spill] sm:$0xff] %v6555_v55  ;;  %v6572_v13 = vpop.eup %3909  ;;  %3921 = vpow2.f32 %v2167_v30  ;;  %v1462_v47 = vmax.f32 %v1461_v36, %v6560_v34  ;;  %v2215_v24 = vmul.f32 1.442695, %v1714_v59  ;;  %v1507_v6 = vsub.f32 %v8288_v43, %v6517_v50  ;;  %v8291_v59 = vld [vmem:[#allocation88_spill] sm:$0xff] }
 0x36a   : > { %8279 = vst [vmem:[#allocation54_spill] sm:$0xff] %v6560_v34  ;;  %v6577_v54 = vpop.eup %3911  ;;  %v2438_v48 = vadd.f32 %v6549_v35, %v2437_v29  ;;  %3923 = vpow2.f32 %v1737_v7  ;;  %v1769_v37 = vmul.f32 1.442695, %v1491_v9  ;;  %v2231_v8 = vmul.f32 1.442695, %v1722_v42  ;;  %v8293_v9 = vld [vmem:[#allocation81_spill] sm:$0xff] }
 0x36b   : > { %8280 = vst [vmem:[#allocation113_spill] sm:$0xff] %v6562_v23  ;;  %v6580_v45 = vpop.eup %3913  ;;  %3925 = vpow2.f32 %v1753_v46  ;;  %v1515_v29 = vsub.f32 %v8291_v59, %v6517_v50  ;;  %v1785_v7 = vmul.f32 1.442695, %v1499_v52  ;;  %v1463_v62 = vrot.slane %v1462_v47, 4  ;;  %v8294_v42 = vld [vmem:[#allocation90_spill] sm:$0xff]  ;;  %v8297_v59 = vld [vmem:[#allocation95_spill] sm:$0xff] }
 0x36c   : > { %8282 = vst [vmem:[#allocation12_spill] sm:$0xff] %v6567_v58  ;;  %v6584_v30 = vpop.eup %3915  ;;  %3927 = vpow2.f32 %v2183_v28  ;;  %v2439_v11 = vadd.f32 %v6555_v55, %v2438_v48  ;;  %v1523_v43 = vsub.f32 %v8293_v9, %v6517_v50  ;;  %v1531_v28 = vsub.f32 %v8294_v42, %v6517_v50  ;;  %v8300_v42 = vld [vmem:[#allocation40_spill] sm:$0xff] }
 0x36d   : > { %8284 = vst [vmem:[#allocation45_spill] sm:$0xff] %v6572_v13  ;;  %v6587_v36 = vpop.eup %3917  ;;  %3929 = vpow2.f32 %v2199_v57  ;;  %v8296_v57 = vld [vmem:[#allocation84_spill] sm:$0xff]  ;;  %v1547_v52 = vsub.f32 %v8297_v59, %v6517_v50  ;;  %v1801_v55 = vmul.f32 1.442695, %v1507_v6  ;;  %v8303_v59 = vld [vmem:[#allocation87_spill] sm:$0xff] }
 0x36e   : > { %8286 = vst [vmem:[#allocation28_spill] sm:$0xff] %v6577_v54  ;;  %v6591_v35 = vpop.eup %3919  ;;  %3931 = vpow2.f32 %v2215_v24  ;;  %v2440_v46 = vadd.f32 %v6562_v23, %v2439_v11  ;;  %v1539_v31 = vsub.f32 %v8296_v57, %v6517_v50  ;;  %v8299_v11 = vld [vmem:[#allocation72_spill] sm:$0xff]  ;;  %v1563_v23 = vsub.f32 %v8300_v42, %v6517_v50  ;;  %v8302_v57 = vld [vmem:[#allocation67_spill] sm:$0xff] }
 0x36f   : > { %8287 = vst [vmem:[#allocation114_spill] sm:$0xff] %v6580_v45  ;;  %v6598_v48 = vpop.eup %3921  ;;  %3933 = vpow2.f32 %v1769_v37  ;;  %v1555_v9 = vsub.f32 %v8299_v11, %v6517_v50  ;;  %v1571_v26 = vsub.f32 %v8302_v57, %v6517_v50  ;;  %v1579_v37 = vsub.f32 %v8303_v59, %v6517_v50  ;;  %v8307_v57 = vld [vmem:[#allocation29_spill] sm:$0xff] }
 0x370   : > { %8289 = vst [vmem:[#allocation44_spill] sm:$0xff] %v6584_v30  ;;  %v6604_v22 = vpop.eup %3923  ;;  %3935 = vpow2.f32 %v2231_v8  ;;  %v2441_v24 = vadd.f32 %v6567_v58, %v2440_v46  ;;  %v1817_v6 = vmul.f32 1.442695, %v1515_v29  ;;  %v8304_v46 = vld [vmem:[#allocation91_spill] sm:$0xff]  ;;  %v8305_v58 = vld [vmem:[#allocation62_spill] sm:$0xff]  ;;  %v1603_v15 = vsub.f32 %v8307_v57, %v6517_v50 }
 0x371   : > { %8290 = vst [vmem:[#allocation115_spill] sm:$0xff] %v6587_v36  ;;  %v6611_v18 = vpop.eup %3925  ;;  %3937 = vpow2.f32 %v1785_v7  ;;  %v1587_v11 = vsub.f32 %v8304_v46, %v6517_v50  ;;  %v1595_v42 = vsub.f32 %v8305_v58, %v6517_v50  ;;  %v1833_v38 = vmul.f32 1.442695, %v1523_v43  ;;  %v8308_v46 = vld [vmem:[#allocation30_spill] sm:$0xff] }
 0x372   : > { %8292 = vst [vmem:[#allocation88_spill] sm:$0xff] %v6591_v35  ;;  %v6617_v25 = vpop.eup %3927  ;;  %v2442_v8 = vadd.f32 %v6572_v13, %v2441_v24  ;;  %v1611_v7 = vsub.f32 %v8172_v1, %v6517_v50  ;;  %3939 = vpow2.f32 %v1801_v55  ;;  %v1849_v29 = vmul.f32 1.442695, %v1531_v28  ;;  %v8310_v57 = vld [vmem:[#allocation82_spill] sm:$0xff] }
 0x373   : > { %8295 = vst [vmem:[#allocation81_spill] sm:$0xff] %v6598_v48  ;;  %v6624_v39 = vpop.eup %3929  ;;  %v1619_v13 = vsub.f32 %v8308_v46, %v6517_v50  ;;  %v1865_v44 = vmul.f32 1.442695, %v1539_v31  ;;  %v2459_v58 = vadd.f32 %v6611_v18, %v6604_v22  ;;  %v1627_v40 = vsub.f32 %v8310_v57, %v6517_v50 }
 0x374   : > { %8298 = vst [vmem:[#allocation90_spill] sm:$0xff] %v6604_v22  ;;  %v6630_v59 = vpop.eup %3931  ;;  %v2443_v24 = vadd.f32 %v6577_v54, %v2442_v8  ;;  %3941 = vpow2.f32 %v1817_v6  ;;  %v1881_v1 = vmul.f32 1.442695, %v1547_v52  ;;  %v1464_v55 = vmax.f32 %v1462_v47, %v1463_v62 }
 0x375   : > { %8301 = vst [vmem:[#allocation84_spill] sm:$0xff] %v6611_v18  ;;  %v6637_v43 = vpop.eup %3933  ;;  %3943 = vpow2.f32 %v1833_v38  ;;  %v1897_v8 = vmul.f32 1.442695, %v1555_v9  ;;  %v8312_v18 = vld [vmem:[#allocation75_spill] sm:$0xff]  ;;  %v1913_v54 = vmul.f32 1.442695, %v1563_v23  ;;  %v1643_v38 = vsub.f32 %v6073_v53, %v6517_v50 }
 0x376   : > { %8306 = vst [vmem:[#allocation95_spill] sm:$0xff] %v6624_v39  ;;  %v6641_v28 = vpop.eup %3935  ;;  %v2444_v4 = vadd.f32 %v6580_v45, %v2443_v24  ;;  %v2460_v46 = vadd.f32 %v6637_v43, %v2459_v58  ;;  %v1635_v22 = vsub.f32 %v8312_v18, %v6517_v50  ;;  %3945 = vpow2.f32 %v1849_v29 }
 0x377   : > { %8309 = vst [vmem:[#allocation72_spill] sm:$0xff] %v6637_v43  ;;  %v6645_v31 = vpop.eup %3937  ;;  %v1929_v34 = vmul.f32 1.442695, %v1571_v26  ;;  %3947 = vpow2.f32 %v1865_v44  ;;  %v1465_v62 = vrot.slane %v1464_v55, 2  ;;  %v1651_v9 = vsub.f32 %v6091_v3, %v6517_v50 }
 0x378   : > { %8311 = vst [vmem:[#allocation40_spill] sm:$0xff] %v6645_v31  ;;  %v2445_v6 = vadd.f32 %v6584_v30, %v2444_v4  ;;  %v2461_v47 = vadd.f32 %v6645_v31, %v2460_v46  ;;  %v6651_v52 = vpop.eup %3939  ;;  %3949 = vpow2.f32 %v1881_v1  ;;  %v1945_v24 = vmul.f32 1.442695, %v1579_v37 }
 0x379   : > { %8313 = vst [vmem:[#allocation67_spill] sm:$0xff] %v6651_v52  ;;  %3951 = vpow2.f32 %v1897_v8  ;;  %v1961_v26 = vmul.f32 1.442695, %v1587_v11  ;;  %v1659_v23 = vsub.f32 %v6109_v10, %v6517_v50  ;;  %v1977_v29 = vmul.f32 1.442695, %v1595_v42 }
 0x37a   : > { %v2446_v18 = vadd.f32 %v6587_v36, %v2445_v6  ;;  %v2462_v4 = vadd.f32 %v6651_v52, %v2461_v47  ;;  %v6659_v44 = vpop.eup %3941  ;;  %3953 = vpow2.f32 %v1913_v54  ;;  %v1993_v58 = vmul.f32 1.442695, %v1603_v15  ;;  %v6673_v54 = vpop.f32.mrf.mxu0  ;;  %v8351_v36 = vld [vmem:[#allocation70_spill] sm:$0xff] }
 0x37b   : > { %8314 = vst [vmem:[#allocation87_spill] sm:$0xff] %v6659_v44  ;;  %v6663_v53 = vpop.eup %3943  ;;  %3955 = vpow2.f32 %v1929_v34  ;;  %v1466_v57 = vmax.f32 %v1464_v55, %v1465_v62  ;;  %v1667_v11 = vsub.f32 %v6133_v16, %v6517_v50  ;;  %v1675_v8 = vsub.f32 %v6157_v20, %v6517_v50  ;;  %v6675_v15 = vpop.f32.mrf.mxu1 }
 0x37c   : > { %8315 = vst [vmem:[#allocation91_spill] sm:$0xff] %v6663_v53  ;;  %v2447_v3 = vadd.f32 %v6591_v35, %v2446_v18  ;;  %v2463_v37 = vadd.f32 %v6659_v44, %v2462_v4  ;;  %v6667_v1 = vpop.eup %3945  ;;  %3957 = vpow2.f32 %v1945_v24  ;;  %v2009_v10 = vmul.f32 1.442695, %v1611_v7  ;;  %v8349_v35 = vld [vmem:[#allocation23_spill] sm:$0xff] }
 0x37d   : > { %8316 = vst [vmem:[#allocation62_spill] sm:$0xff] %v6667_v1  ;;  %v6677_v42 = vpop.eup %3947  ;;  %3959 = vpow2.f32 %v1961_v26  ;;  %v2025_v55 = vmul.f32 1.442695, %v1619_v13  ;;  %v1683_v16 = vsub.f32 %v6180_v60, %v6517_v50  ;;  %v2041_v20 = vmul.f32 1.442695, %v1627_v40 }
 0x37e   : > { %8317 = vst [vmem:[#allocation29_spill] sm:$0xff] %v6677_v42  ;;  %v2448_v34 = vadd.f32 %v6598_v48, %v2447_v3  ;;  %v2464_v46 = vadd.f32 %v6663_v53, %v2463_v37  ;;  %v6681_v6 = vpop.eup %3949  ;;  %3961 = vpow2.f32 %v1977_v29  ;;  %v2057_v7 = vmul.f32 1.442695, %v1635_v22  ;;  %v8337_v53 = vld [vmem:[#allocation100_spill] sm:$0xff] }
 0x37f   : > { %8318 = vst [vmem:[#allocation30_spill] sm:$0xff] %v6681_v6  ;;  %v6685_v47 = vpop.eup %3951  ;;  %3963 = vpow2.f32 %v1993_v58  ;;  %v1467_v18 = vrot.slane %v1466_v57, 1  ;;  %v1691_v13 = vsub.f32 %v6214_v51, %v6517_v50  ;;  %v1699_v4 = vsub.f32 %v6245_v56, %v6517_v50  ;;  %v6705_v56 = vpop.f32.mrf.mxu3 }
 0x380   : > { %8319 = vst [vmem:[#allocation82_spill] sm:$0xff] %v6685_v47  ;;  %v2449_v62 = vadd.f32 %v6617_v25, %v2448_v34  ;;  %v2465_v24 = vadd.f32 %v6667_v1, %v2464_v46  ;;  %v6689_v26 = vpop.eup %3953  ;;  %3965 = vpow2.f32 %v2009_v10  ;;  %v2073_v60 = vmul.f32 1.442695, %v1643_v38  ;;  %v6703_v46 = vpop.f32.mrf.mxu2 }
 0x381   : > { %8320 = vst [vmem:[#allocation75_spill] sm:$0xff] %v6689_v26  ;;  %v6695_v40 = vpop.eup %3955  ;;  %3967 = vpow2.f32 %v2025_v55  ;;  %v2089_v29 = vmul.f32 1.442695, %v1651_v9  ;;  %v1707_v37 = vsub.f32 %v6287_v32, %v6517_v50  ;;  %v2105_v51 = vmul.f32 1.442695, %v1659_v23 }
 0x382   : > { %8321 = vst [vmem:[#allocation116_spill] sm:$0xff] %v6695_v40  ;;  %v2450_v22 = vadd.f32 %v6624_v39, %v2449_v62  ;;  %v2466_v58 = vadd.f32 %v6677_v42, %v2465_v24  ;;  %v6699_v3 = vpop.eup %3957  ;;  %3969 = vpow2.f32 %v2041_v20  ;;  %v2121_v34 = vmul.f32 1.442695, %v1667_v11  ;;  %v6719_v20 = vpop.f32.mrf.mxu0 }
 0x383   : > { %8322 = vst [vmem:[#allocation117_spill] sm:$0xff] %v6699_v3  ;;  %v6707_v38 = vpop.eup %3959  ;;  %3971 = vpow2.f32 %v2057_v7  ;;  %v6711_v55 = vmax.f32 %v1466_v57, %v1467_v18  ;;  %v1715_v32 = vsub.f32 %v6340_v0, %v6517_v50  ;;  %v1723_v23 = vsub.f32 %v6408_v63, %v6517_v50  ;;  %v6721_v24 = vpop.f32.mrf.mxu1 }
 0x384   : > { %8323 = vst [vmem:[#allocation118_spill] sm:$0xff] %v6707_v38  ;;  %v2451_v10 = vadd.f32 %v6630_v59, %v2450_v22  ;;  %v2467_v9 = vadd.f32 %v6681_v6, %v2466_v58  ;;  %v6713_v62 = vpop.eup %3961  ;;  %3973 = vpow2.f32 %v2073_v60  ;;  %v2137_v11 = vmul.f32 1.442695, %v1675_v8  ;;  %v8329_v60 = vld [vmem:[#allocation38_spill] sm:$0xff] }
 0x385   : > { %8324 = vst [vmem:[#allocation119_spill] sm:$0xff] %v6713_v62  ;;  %v6723_v22 = vpop.eup %3963  ;;  %3975 = vpow2.f32 %v2089_v29  ;;  %v2153_v57 = vmul.f32 1.442695, %v1683_v16  ;;  %v2169_v0 = vmul.f32 1.442695, %v1691_v13  ;;  %v1476_v31 = vsub.f32 %v8329_v60, %v6711_v55  ;;  %v8331_v16 = vld [vmem:[#allocation53_spill] sm:$0xff] }
 0x386   : > { %8325 = vst [vmem:[#allocation120_spill] sm:$0xff] %v6723_v22  ;;  %v6726_v7 = vadd.f32 %v6641_v28, %v2451_v10  ;;  %v2468_v18 = vadd.f32 %v6685_v47, %v2467_v9  ;;  %v6729_v58 = vpop.eup %3965  ;;  %3977 = vpow2.f32 %v2105_v51  ;;  %v2185_v50 = vmul.f32 1.442695, %v1699_v4 }
 0x387   : > { %8327 = vst [vmem:[#allocation122_spill] sm:$0xff] %v6729_v58  ;;  %v6731_v63 = vpop.eup %3967  ;;  %3979 = vpow2.f32 %v2121_v34  ;;  %v2201_v29 = vmul.f32 1.442695, %v1707_v37  ;;  %v1484_v10 = vsub.f32 %v8331_v16, %v6711_v55  ;;  %v2217_v13 = vmul.f32 1.442695, %v1715_v32  ;;  %v6760_v44 = vpop.f32.mrf.mxu3 }
 0x388   : > { %8326 = vst [vmem:[#allocation121_spill] sm:$0xff] %v6726_v7  ;;  %v2469_v8 = vadd.f32 %v6689_v26, %v2468_v18  ;;  %v6736_v43 = vpop.eup %3969  ;;  %3981 = vpow2.f32 %v2137_v11  ;;  %v2233_v51 = vmul.f32 1.442695, %v1723_v23  ;;  %v8332_v18 = vld [vmem:[#allocation17_spill] sm:$0xff]  ;;  %v8333_v7 = vld [vmem:[#allocation31_spill] sm:$0xff]  ;;  %v6751_v37 = vadd.f32 %v6675_v15, %v6673_v54  ;;  %v8340_v26 = vld [vmem:[#allocation52_spill] sm:$0xff] }
 0x389   : > { %8328 = vst [vmem:[#allocation123_spill] sm:$0xff] %v6731_v63  ;;  %v6740_v9 = vpop.eup %3971  ;;  %3983 = vpow2.f32 %v2153_v57  ;;  %v1492_v60 = vsub.f32 %v8332_v18, %v6711_v55  ;;  %v1500_v11 = vsub.f32 %v8333_v7, %v6711_v55  ;;  %v8334_v23 = vld [vmem:[#allocation61_spill] sm:$0xff]  ;;  %v8335_v7 = vld [vmem:[#allocation68_spill] sm:$0xff]  ;;  %v8336_v15 = vld [vmem:[#allocation83_spill] sm:$0xff]  ;;  %v1532_v6 = vsub.f32 %v8337_v53, %v6711_v55 }
 0x38a   : > { %8330 = vst [vmem:[#allocation38_spill] sm:$0xff] %v6736_v43  ;;  %v2470_v34 = vadd.f32 %v6695_v40, %v2469_v8  ;;  %v6743_v4 = vpop.eup %3973  ;;  %3985 = vpow2.f32 %v2169_v0  ;;  %v1508_v57 = vsub.f32 %v8334_v23, %v6711_v55  ;;  %v1739_v8 = vmul.f32 1.442695, %v1476_v31  ;;  %v6758_v0 = vpop.f32.mrf.mxu2  ;;  %v8342_v53 = vld [vmem:[#allocation9_spill] sm:$0xff] }
 0x38b   : > { %v6753_v16 = vpop.eup %3975  ;;  %3987 = vpow2.f32 %v2185_v50  ;;  %v1516_v54 = vsub.f32 %v8335_v7, %v6711_v55  ;;  %v1524_v52 = vsub.f32 %v8336_v15, %v6711_v55  ;;  %v1755_v50 = vmul.f32 1.442695, %v1484_v10  ;;  %v6768_v1 = vpop.f32.mrf.mxu0  ;;  %v8339_v10 = vld [vmem:[#allocation99_spill] sm:$0xff] }
 0x38c   : > { %v2471_v32 = vadd.f32 %v6699_v3, %v2470_v34  ;;  %v6762_v18 = vpop.eup %3977  ;;  %3989 = vpow2.f32 %v2201_v29  ;;  %v6770_v34 = vpop.f32.mrf.mxu1  ;;  %v8338_v29 = vld [vmem:[#allocation35_spill] sm:$0xff]  ;;  %v1548_v15 = vsub.f32 %v8339_v10, %v6711_v55  ;;  %v1556_v47 = vsub.f32 %v8340_v26, %v6711_v55  ;;  %v8341_v3 = vld [vmem:[#allocation74_spill] sm:$0xff]  ;;  %v8345_v10 = vld [vmem:[#allocation92_spill] sm:$0xff] }
 0x38d   : > { %v6772_v23 = vpop.eup %3979  ;;  %3991 = vpow2.f32 %v2217_v13  ;;  %v1540_v42 = vsub.f32 %v8338_v29, %v6711_v55  ;;  %v1564_v13 = vsub.f32 %v8341_v3, %v6711_v55  ;;  %v8343_v29 = vld [vmem:[#allocation37_spill] sm:$0xff]  ;;  %v1771_v3 = vmul.f32 1.442695, %v1492_v60 }
 0x38e   : > { %v2472_v31 = vadd.f32 %v6707_v38, %v2471_v32  ;;  %v6779_v7 = vpop.eup %3981  ;;  %3993 = vpow2.f32 %v2233_v51  ;;  %v1572_v38 = vsub.f32 %v8342_v53, %v6711_v55  ;;  %v1580_v45 = vsub.f32 %v8343_v29, %v6711_v55  ;;  %v8346_v26 = vld [vmem:[#allocation13_spill] sm:$0xff]  ;;  %v8347_v53 = vld [vmem:[#allocation79_spill] sm:$0xff]  ;;  %v8348_v29 = vld [vmem:[#allocation78_spill] sm:$0xff] }
 0x38f   : > { %v6787_v40 = vpop.eup %3983  ;;  %3995 = vpow2.f32 %v1739_v8  ;;  %v6843_v60 = vpop.f32.mrf.mxu3  ;;  %v1835_v14 = vmul.f32 1.442695, %v1524_v52  ;;  %v1851_v12 = vmul.f32 1.442695, %v1532_v6  ;;  %v1867_v17 = vmul.f32 1.442695, %v1540_v42 }
 0x390   : > { %v2473_v32 = vadd.f32 %v6713_v62, %v2472_v31  ;;  %v6794_v51 = vpop.eup %3985  ;;  %3997 = vpow2.f32 %v1755_v50  ;;  %v1803_v50 = vmul.f32 1.442695, %v1508_v57  ;;  %v1883_v57 = vmul.f32 1.442695, %v1548_v15  ;;  %v4071_v52 = vld [vmem:[%s4321_s22] sm:$0xff] }
 0x391   : > { %8344 = vst [vmem:[#allocation53_spill] sm:$0xff] %v6794_v51  ;;  %v6800_v48 = vpop.eup %3987  ;;  %3999 = vpow2.f32 %v1771_v3  ;;  %v2997_v3 = vmul.f32 %v6260_v21, %v6751_v37  ;;  %v6861_v37 = vmul.f32 1.442695, %v1564_v13  ;;  %v6863_v61 = vmul.f32 1.442695, %v1572_v38 }
 0x392   : > { %v2474_v31 = vadd.f32 %v6723_v22, %v2473_v32  ;;  %v6809_v39 = vpop.eup %3989  ;;  %v1787_v32 = vmul.f32 1.442695, %v1500_v11  ;;  %v6841_v49 = vpop.f32.mrf.mxu2  ;;  %v2752_v42 = vadd.f32 %v6705_v56, %v6703_v46  ;;  %v6875_v15 = vmul.f32 1.442695, %v1580_v45  ;;  %v8353_v46 = vld [vmem:[#allocation98_spill] sm:$0xff] }
 0x393   : > { %8350 = vst [vmem:[#allocation17_spill] sm:$0xff] %v6809_v39  ;;  %v6817_v22 = vpop.eup %3991  ;;  %v6851_v51 = vpop.f32.mrf.mxu0  ;;  %v3029_v6 = vadd.f32 %v4071_v52, %v2997_v3  ;;  %v2754_v13 = vadd.f32 %v6760_v44, %v6758_v0  ;;  %v8354_v44 = vsub.f32 %v8345_v10, %v6711_v55  ;;  %v4073_v52 = vld [vmem:[%s4321_s22 + $0x40] sm:$0xff]  ;;  %v8355_v10 = vsub.f32 %v8346_v26, %v6711_v55  ;;  %v8357_v26 = vld [vmem:[#allocation34_spill] sm:$0xff] }
 0x394   : > { %v2475_v62 = vadd.f32 %v6729_v58, %v2474_v31  ;;  %v6826_v39 = vpop.eup %3993  ;;  %4001 = vpow2.f32 %v1787_v32  ;;  %v6853_v30 = vpop.f32.mrf.mxu1  ;;  %v6858_v32 = vmul.f32 1.442695, %v1556_v47  ;;  %v2716_v47 = vadd.f32 %v6721_v24, %v6719_v20 }
 0x395   : > { %v6832_v31 = vpop.eup %3995  ;;  %4003 = vpow2.f32 %v1803_v50  ;;  %3061 = vst [vmem:[%s6884_s9] sm:$0xff] %v3029_v6  ;;  %v2998_v56 = vmul.f32 %v8353_v46, %v2752_v42  ;;  %v2719_v20 = vadd.f32 %v6770_v34, %v6768_v1  ;;  %v6895_v0 = vmul.f32 1.442695, %v8354_v44 }
 0x396   : > { %v2476_v8 = vadd.f32 %v6731_v63, %v2475_v62  ;;  %v6845_v11 = vpop.eup %3997  ;;  %v1819_v62 = vmul.f32 1.442695, %v1516_v54  ;;  %v8352_v63 = vld [vmem:[#allocation54_spill] sm:$0xff]  ;;  %v3005_v45 = vmul.f32 %v6260_v21, %v2716_v47  ;;  %v6908_v42 = vmul.f32 1.442695, %v8355_v10 }
 0x397   : > { %v3013_v34 = vmul.f32 %v6260_v21, %v2719_v20  ;;  %v8360_v33 = vsub.f32 %v8347_v53, %v6711_v55  ;;  %v2757_v53 = vadd.f32 %v6843_v60, %v6841_v49  ;;  %v8367_v60 = vld [vmem:[#allocation59_spill] sm:$0xff] }
 0x398   : > { %v2477_v58 = vadd.f32 %v6736_v43, %v2476_v8  ;;  %v2496_v8 = vadd.f32 %v6845_v11, %v6832_v31  ;;  %v6867_v43 = vpop.eup %3999  ;;  %4005 = vpow2.f32 %v1819_v62  ;;  %v3006_v62 = vmul.f32 %v8353_v46, %v2754_v13  ;;  %v6914_v13 = vpop.f32.mrf.mxu3 }
 0x399   : > { %4007 = vpow2.f32 %v1835_v14  ;;  %v3037_v1 = vadd.f32 %v4073_v52, %v3005_v45  ;;  %v4075_v45 = vld [vmem:[%s4321_s22 + $0x80] sm:$0xff]  ;;  %v8359_v52 = vld [vmem:[#allocation111_spill] sm:$0xff]  ;;  %v3014_v49 = vmul.f32 %v8353_v46, %v2757_v53 }
 0x39a   : > { %v2478_v54 = vadd.f32 %v6740_v9, %v2477_v58  ;;  %v2497_v38 = vadd.f32 %v6867_v43, %v2496_v8  ;;  %v6880_v50 = vpop.eup %4001  ;;  %4009 = vpow2.f32 %v1851_v12  ;;  %v6912_v12 = vpop.f32.mrf.mxu2  ;;  %v3045_v20 = vadd.f32 %v4075_v45, %v3013_v34  ;;  %v8361_v34 = vld [vmem:[#allocation15_spill] sm:$0xff]  ;;  %v8362_v45 = vld [vmem:[#allocation57_spill] sm:$0xff] }
 0x39b   : > { %v6899_v3 = vpop.eup %4003  ;;  %4011 = vpow2.f32 %v1867_v17  ;;  %v6924_v10 = vpop.f32.mrf.mxu0  ;;  %v6932_v17 = vmul.f32 1.442695, %v8360_v33  ;;  %3069 = vst [vmem:[%s6884_s9 + $0x40] sm:$0xff] %v3037_v1  ;;  %v2662_v33 = vpack.c.bf16 %v6641_v28, %v6630_v59  ;;  %v8365_v59 = vld [vmem:[#allocation25_spill] sm:$0xff] }
 0x39c   : > { %v2479_v58 = vadd.f32 %v6743_v4, %v2478_v54  ;;  %v2498_v14 = vadd.f32 %v6880_v50, %v2497_v38  ;;  %v4072_v54 = vld [vmem:[%s4321_s22 + $0x8] sm:$0xff]  ;;  %4013 = vpow2.f32 %v1883_v57  ;;  %3077 = vst [vmem:[%s6884_s9 + $0x80] sm:$0xff] %v3045_v20 }
 0x39d   : > { %v3030_v8 = vadd.f32 %v4072_v54, %v2998_v56  ;;  %v8358_v54 = vld [vmem:[#allocation56_spill] sm:$0xff]  ;;  %4015 = vpow2.f32 %v6858_v32  ;;  %2894 = vmatpush.bf16.msra.mxu3 %v2662_v33  ;;  %v8366_v28 = vld [vmem:[#allocation101_spill] sm:$0xff] }
 0x39e   : > { %v2480_v24 = vadd.f32 %v6753_v16, %v2479_v58  ;;  %v2499_v47 = vadd.f32 %v6899_v3, %v2498_v14  ;;  %v4074_v58 = vld [vmem:[%s4321_s22 + $0x48] sm:$0xff]  ;;  %v6916_v56 = vpop.eup %4005  ;;  %v2661_v14 = vpack.c.bf16 %v8359_v52, %v8358_v54  ;;  %v8363_v54 = vsub.f32 %v8348_v29, %v6711_v55 }
 0x39f   : > { %v3038_v38 = vadd.f32 %v4074_v58, %v3006_v62  ;;  %3062 = vst [vmem:[%s6884_s9 + $0x8] sm:$0xff] %v3030_v8  ;;  %v6926_v62 = vpop.f32.mrf.mxu1  ;;  %4017 = vpow2.f32 %v6861_v37 }
 0x3a0   : > { %v2481_v6 = vadd.f32 %v6762_v18, %v2480_v24  ;;  %v8356_v24 = vld [vmem:[#allocation22_spill] sm:$0xff]  ;;  %v2500_v8 = vadd.f32 %v6916_v56, %v2499_v47  ;;  %v6943_v52 = vmul.f32 1.442695, %v8363_v54  ;;  %2856 = vmatpush.bf16.msra.mxu1 %v2661_v14  ;;  %v2721_v47 = vadd.f32 %v6853_v30, %v6851_v51  ;;  %v8371_v54 = vld [vmem:[#allocation73_spill] sm:$0xff] }
 0x3a1   : > { %v2597_v44 = vpack.c.bf16 %v8357_v26, %v8356_v24  ;;  %v2598_v24 = vpack.c.bf16 %v8362_v45, %v8361_v34  ;;  %v6938_v26 = vpop.eup %4007  ;;  %3070 = vst [vmem:[%s6884_s9 + $0x48] sm:$0xff] %v3038_v38  ;;  %v4076_v34 = vld [vmem:[%s4321_s22 + $0x88] sm:$0xff]  ;;  %4019 = vpow2.f32 %v6863_v61 }
 0x3a2   : > { %v2482_v58 = vadd.f32 %v6772_v23, %v2481_v6  ;;  %v8364_v6 = vsub.f32 %v8349_v35, %v6711_v55  ;;  %v2501_v29 = vadd.f32 %v6938_v26, %v2500_v8  ;;  %v6960_v38 = vpop.eup %4009  ;;  %v2589_v35 = vpack.c.bf16 %v8366_v28, %v8365_v59 }
 0x3a3   : > { %2837 = vmatpush.bf16.msra.mxu0 %v2597_v44  ;;  %2875 = vmatpush.bf16.msra.mxu2 %v2598_v24  ;;  %v8368_v44 = vld [vmem:[#allocation27_spill] sm:$0xff]  ;;  %v3021_v32 = vmul.f32 %v6260_v21, %v2721_v47  ;;  %v6976_v8 = vpop.eup %4011  ;;  %v3046_v45 = vadd.f32 %v4076_v34, %v3014_v49  ;;  %v8370_v24 = vld [vmem:[#allocation112_spill] sm:$0xff]  ;;  %v8374_v21 = vsub.f32 %v6083_v41, %v6711_v55  ;;  %v8376_v41 = vld [vmem:[#allocation85_spill] sm:$0xff]  ;;  %4021 = vpow2.f32 %v6875_v15 }
 0x3a4   : > { %v2483_v1 = vadd.f32 %v6779_v7, %v2482_v58  ;;  %v6954_v57 = vmul.f32 1.442695, %v8364_v6  ;;  %v2653_v14 = vpack.c.bf16 %v8368_v44, %v8367_v60  ;;  %v8369_v58 = vsub.f32 %v8351_v36, %v6711_v55  ;;  %v8372_v36 = vld [vmem:[#allocation95_spill] sm:$0xff]  ;;  %v4077_v47 = vld [vmem:[%s4321_s22 + $0xc0] sm:$0xff]  ;;  %v6992_v59 = vpop.eup %4013  ;;  %v8378_v44 = vld [vmem:[#allocation46_spill] sm:$0xff] }
 0x3a5   : > { %v2502_v51 = vadd.f32 %v6960_v38, %v2501_v29  ;;  %v2590_v33 = vpack.c.bf16 %v8371_v54, %v8370_v24  ;;  %v2654_v53 = vpack.c.bf16 %v8372_v36, %v6617_v25  ;;  %v6988_v29 = vmul.f32 1.442695, %v8374_v21  ;;  %3078 = vst [vmem:[%s6884_s9 + $0x88] sm:$0xff] %v3046_v45  ;;  %v8382_v34 = vld [vmem:[#allocation110_spill] sm:$0xff]  ;;  %v2808_v24 = vpop.f32.mrf.mxu2  ;;  %v2827_v54 = vpop.f32.mrf.mxu3  ;;  %v8383_v36 = vld [vmem:[#allocation88_spill] sm:$0xff] }
 0x3a6   : > { %v2484_v20 = vadd.f32 %v6787_v40, %v2483_v1  ;;  %v6972_v30 = vmul.f32 1.442695, %v8369_v58  ;;  %2857 = vmatpush.bf16.msra.mxu1 %v2653_v14  ;;  %v8373_v1 = vld [vmem:[#allocation53_spill] sm:$0xff]  ;;  %v3053_v49 = vadd.f32 %v4077_v47, %v3021_v32  ;;  %v8375_v28 = vsub.f32 %v6101_v5, %v6711_v55  ;;  %v8379_v14 = vld [vmem:[#allocation32_spill] sm:$0xff] }
 0x3a7   : > { %2838 = vmatpush.bf16.msra.mxu0 %v2589_v35  ;;  %v2503_v37 = vadd.f32 %v6976_v8, %v2502_v51  ;;  %2876 = vmatpush.bf16.msra.mxu2 %v2590_v33  ;;  %v8377_v35 = vld [vmem:[#allocation80_spill] sm:$0xff]  ;;  %v8380_v51 = vsub.f32 %v6120_v27, %v6711_v55  ;;  %v7015_v33 = vpop.eup %4015  ;;  %v2759_v27 = vadd.f32 %v6914_v13, %v6912_v12  ;;  %v2791_v47 = vpop.f32.mrf.mxu1  ;;  %4023 = vpow2.f32 %v6895_v0 }
 0x3a8   : > { %v2485_v6 = vadd.f32 %v8373_v1, %v2484_v20  ;;  %v6998_v25 = vmul.f32 1.442695, %v8375_v28  ;;  %2895 = vmatpush.bf16.msra.mxu3 %v2654_v53  ;;  %v2581_v60 = vpack.c.bf16 %v8377_v35, %v8376_v41  ;;  %v2645_v20 = vpack.c.bf16 %v8379_v14, %v8378_v44  ;;  %3085 = vst [vmem:[%s6884_s9 + $0xc0] sm:$0xff] %v3053_v49  ;;  %v8381_v32 = vld [vmem:[#allocation108_spill] sm:$0xff]  ;;  %v8384_v53 = vld [vmem:[#allocation81_spill] sm:$0xff]  ;;  %v7033_v12 = vpop.eup %4017 }
 0x3a9   : > { %v7009_v61 = vmul.f32 1.442695, %v8380_v51  ;;  %v2504_v5 = vadd.f32 %v6992_v59, %v2503_v37  ;;  %v2582_v45 = vpack.c.bf16 %v8382_v34, %v8381_v32  ;;  %v2790_v21 = vadd.f32 %v6926_v62, %v6924_v10  ;;  %v2772_v37 = vpop.f32.mrf.mxu0  ;;  %v8385_v49 = vld [vmem:[#allocation17_spill] sm:$0xff]  ;;  %v8389_v10 = vld [vmem:[#allocation47_spill] sm:$0xff]  ;;  %v8394_v0 = vld [vmem:[#allocation16_spill] sm:$0xff] }
 0x3aa   : > { %v2486_v58 = vadd.f32 %v6800_v48, %v2485_v6  ;;  %2858 = vmatpush.bf16.msra.mxu1 %v2645_v20  ;;  %v2646_v6 = vpack.c.bf16 %v8384_v53, %v8383_v36  ;;  %v8386_v41 = vsub.f32 %v6145_v19, %v6711_v55  ;;  %v8388_v44 = vld [vmem:[#allocation97_spill] sm:$0xff]  ;;  %v3022_v13 = vmul.f32 %v8353_v46, %v2759_v27  ;;  %v8390_v19 = vld [vmem:[#allocation96_spill] sm:$0xff]  ;;  %v7049_v53 = vpop.eup %4019  ;;  %v4079_v27 = vld [vmem:[%s4321_s22 + $0x10] sm:$0xff] }
 0x3ab   : > { %2839 = vmatpush.bf16.msra.mxu0 %v2581_v60  ;;  %v2505_v15 = vadd.f32 %v7015_v33, %v2504_v5  ;;  %v8387_v60 = vld [vmem:[#allocation51_spill] sm:$0xff]  ;;  %2877 = vmatpush.bf16.msra.mxu2 %v2582_v45  ;;  %v2999_v62 = vmul.f32 %v8389_v10, %v2790_v21  ;;  %v8391_v20 = vld [vmem:[#allocation69_spill] sm:$0xff]  ;;  %v8392_v5 = vsub.f32 %v6317_v2, %v6711_v55  ;;  %4025 = vpow2.f32 %v6908_v42 }
 0x3ac   : > { %v2487_v28 = vadd.f32 %v8385_v49, %v2486_v58  ;;  %v7028_v35 = vmul.f32 1.442695, %v8386_v41  ;;  %v2573_v14 = vpack.c.bf16 %v8388_v44, %v8387_v60  ;;  %2896 = vmatpush.bf16.msra.mxu3 %v2646_v6  ;;  %v2637_v58 = vpack.c.bf16 %v8391_v20, %v8390_v19  ;;  %v8393_v36 = vld [vmem:[#allocation33_spill] sm:$0xff]  ;;  %v8396_v2 = vld [vmem:[#allocation115_spill] sm:$0xff] }
 0x3ad   : > { %v7044_v32 = vmul.f32 1.442695, %v8392_v5  ;;  %v2506_v34 = vadd.f32 %v7033_v12, %v2505_v15  ;;  %v2574_v45 = vpack.c.bf16 %v8394_v0, %v8393_v36  ;;  %v4078_v46 = vld [vmem:[%s4321_s22 + $0xc8] sm:$0xff]  ;;  %v3031_v21 = vadd.f32 %v4079_v27, %v2999_v62  ;;  %v8402_v5 = vld [vmem:[#allocation43_spill] sm:$0xff] }
 0x3ae   : > { %v2488_v51 = vadd.f32 %v6817_v22, %v2487_v28  ;;  %v3054_v6 = vadd.f32 %v4078_v46, %v3022_v13  ;;  %2859 = vmatpush.bf16.msra.mxu1 %v2637_v58  ;;  %v8395_v28 = vld [vmem:[#allocation44_spill] sm:$0xff]  ;;  %4027 = vpow2.f32 %v6932_v17  ;;  %v8397_v60 = vld [vmem:[#allocation109_spill] sm:$0xff]  ;;  %v7064_v13 = vpop.eup %4021  ;;  %v2828_v36 = vadd.f32 %v2827_v54, %v2808_v24 }
 0x3af   : > { %2840 = vmatpush.bf16.msra.mxu0 %v2573_v14  ;;  %v2638_v41 = vpack.c.bf16 %v8396_v2, %v8395_v28  ;;  %v8398_v44 = vsub.f32 %v8397_v60, %v6711_v55  ;;  %v2507_v42 = vadd.f32 %v7049_v53, %v2506_v34  ;;  %2878 = vmatpush.bf16.msra.mxu2 %v2574_v45  ;;  %v8399_v14 = vld [vmem:[#allocation21_spill] sm:$0xff]  ;;  %v8401_v58 = vld [vmem:[#allocation20_spill] sm:$0xff]  ;;  %4029 = vpow2.f32 %v6943_v52  ;;  %v8404_v45 = vld [vmem:[#allocation107_spill] sm:$0xff]  ;;  %v2810_v60 = vpop.f32.mrf.mxu2 }
 0x3b0   : > { %v7057_v15 = vadd.f32 %v6826_v39, %v2488_v51  ;;  %3086 = vst [vmem:[%s6884_s9 + $0xc8] sm:$0xff] %v3054_v6  ;;  %v8400_v62 = vld [vmem:[#allocation49_spill] sm:$0xff]  ;;  %v2629_v51 = vpack.c.bf16 %v8402_v5, %v8401_v58  ;;  %v8403_v17 = vsub.f32 %v8352_v63, %v6711_v55  ;;  %v2792_v46 = vadd.f32 %v2791_v47, %v2772_v37  ;;  %v7077_v6 = vpop.eup %4023  ;;  %v8406_v54 = vld [vmem:[#allocation28_spill] sm:$0xff]  ;;  %v8407_v52 = vld [vmem:[#allocation114_spill] sm:$0xff] }
 0x3b1   : > { %v2219_v19 = vmul.f32 1.442695, %v8398_v44  ;;  %2897 = vmatpush.bf16.msra.mxu3 %v2638_v41  ;;  %v2565_v20 = vpack.c.bf16 %v8400_v62, %v8399_v14  ;;  %v2508_v34 = vadd.f32 %v7064_v13, %v2507_v42  ;;  %3063 = vst [vmem:[%s6884_s9 + $0x10] sm:$0xff] %v3031_v21  ;;  %4031 = vpow2.f32 %v6954_v57  ;;  %v8405_v27 = vld [vmem:[#allocation93_spill] sm:$0xff]  ;;  %v8408_v2 = vld [vmem:[#allocation63_spill] sm:$0xff]  ;;  %v8409_v41 = vld [vmem:[#allocation106_spill] sm:$0xff]  ;;  %v2829_v44 = vpop.f32.mrf.mxu3  ;;  %v7091_v42 = vpop.eup %4025 }
 0x3b2   : > { %v2235_v0 = vmul.f32 1.442695, %v8403_v17  ;;  %2860 = vmatpush.bf16.msra.mxu1 %v2629_v51  ;;  %v2566_v24 = vpack.c.bf16 %v8405_v27, %v8404_v45  ;;  %v2630_v28 = vpack.c.bf16 %v8407_v52, %v8406_v54  ;;  %v3000_v63 = vmul.f32 %v8408_v2, %v2828_v36  ;;  %v4080_v14 = vld [vmem:[%s4321_s22 + $0x18] sm:$0xff]  ;;  %v8414_v51 = vld [vmem:[#allocation77_spill] sm:$0xff]  ;;  %v2775_v17 = vpop.f32.mrf.mxu0  ;;  %v4081_v27 = vld [vmem:[%s4321_s22 + $0x50] sm:$0xff] }
 0x3b3   : > { %2841 = vmatpush.bf16.msra.mxu0 %v2565_v20  ;;  %4033 = vpow2.f32 %v6972_v30  ;;  %v8410_v37 = vsub.f32 %v8409_v41, %v6711_v55  ;;  %v2509_v21 = vadd.f32 %v7077_v6, %v2508_v34  ;;  %v3007_v57 = vmul.f32 %v8389_v10, %v2792_v46  ;;  %v8411_v30 = vld [vmem:[#allocation65_spill] sm:$0xff]  ;;  %v8412_v20 = vld [vmem:[#allocation58_spill] sm:$0xff]  ;;  %v8413_v5 = vld [vmem:[#allocation55_spill] sm:$0xff]  ;;  %v2794_v34 = vpop.f32.mrf.mxu1 }
 0x3b4   : > { %4035 = vpow2.f32 %v2219_v19  ;;  %2879 = vmatpush.bf16.msra.mxu2 %v2566_v24  ;;  %v3032_v62 = vadd.f32 %v4080_v14, %v3000_v63  ;;  %v2557_v58 = vpack.c.bf16 %v8412_v20, %v8411_v30  ;;  %v2621_v36 = vpack.c.bf16 %v8414_v51, %v8413_v5  ;;  %v7098_v46 = vpop.eup %4027  ;;  %v8415_v24 = vld [vmem:[#allocation104_spill] sm:$0xff]  ;;  %v8416_v54 = vld [vmem:[#allocation105_spill] sm:$0xff] }
 0x3b5   : > { %v2203_v47 = vmul.f32 1.442695, %v8410_v37  ;;  %2898 = vmatpush.bf16.msra.mxu3 %v2630_v28  ;;  %4037 = vpow2.f32 %v2235_v0  ;;  %v2510_v45 = vadd.f32 %v7091_v42, %v2509_v21  ;;  %v3039_v19 = vadd.f32 %v4081_v27, %v3007_v57  ;;  %v8417_v28 = vld [vmem:[#allocation12_spill] sm:$0xff]  ;;  %v8418_v63 = vld [vmem:[#allocation45_spill] sm:$0xff]  ;;  %v7107_v30 = vpop.eup %4029 }
 0x3b6   : > { %v2558_v52 = vpack.c.bf16 %v8416_v54, %v8415_v24  ;;  %3064 = vst [vmem:[%s6884_s9 + $0x18] sm:$0xff] %v3032_v62  ;;  %2861 = vmatpush.bf16.msra.mxu1 %v2621_v36  ;;  %v2622_v41 = vpack.c.bf16 %v8418_v63, %v8417_v28  ;;  %v2830_v37 = vadd.f32 %v2829_v44, %v2810_v60  ;;  %4039 = vpow2.f32 %v6988_v29  ;;  %v8419_v0 = vld [vmem:[#allocation60_spill] sm:$0xff]  ;;  %v8423_v60 = vld [vmem:[#allocation18_spill] sm:$0xff]  ;;  %v8428_v54 = vld [vmem:[#allocation103_spill] sm:$0xff] }
 0x3b7   : > { %2842 = vmatpush.bf16.msra.mxu0 %v2557_v58  ;;  %v2795_v14 = vadd.f32 %v2794_v34, %v2775_v17  ;;  %v8420_v21 = vsub.f32 %v8419_v0, %v6711_v55  ;;  %v2511_v57 = vadd.f32 %v7098_v46, %v2510_v45  ;;  %3071 = vst [vmem:[%s6884_s9 + $0x50] sm:$0xff] %v3039_v19  ;;  %v8421_v5 = vld [vmem:[#allocation48_spill] sm:$0xff]  ;;  %v7117_v51 = vpop.eup %4031  ;;  %4041 = vpow2.f32 %v6998_v25  ;;  %v8424_v44 = vld [vmem:[#allocation10_spill] sm:$0xff]  ;;  %v8425_v45 = vld [vmem:[#allocation89_spill] sm:$0xff] }
 0x3b8   : > { %v8422_v62 = vld [vmem:[#allocation36_spill] sm:$0xff]  ;;  %2880 = vmatpush.bf16.msra.mxu2 %v2558_v52  ;;  %v2613_v29 = vpack.c.bf16 %v8424_v44, %v8423_v60  ;;  %v3008_v36 = vmul.f32 %v8408_v2, %v2830_v37  ;;  %v8426_v27 = vsub.f32 %v8425_v45, %v6711_v55  ;;  %4043 = vpow2.f32 %v7044_v32  ;;  %v8427_v24 = vld [vmem:[#allocation102_spill] sm:$0xff] }
 0x3b9   : > { %v2155_v20 = vmul.f32 1.442695, %v8420_v21  ;;  %v2549_v58 = vpack.c.bf16 %v8422_v62, %v8421_v5  ;;  %2899 = vmatpush.bf16.msra.mxu3 %v2622_v41  ;;  %v3015_v17 = vmul.f32 %v8389_v10, %v2795_v14  ;;  %v7124_v34 = vpop.eup %4033  ;;  %v2512_v25 = vadd.f32 %v7107_v30, %v2511_v57  ;;  %v8429_v63 = vld [vmem:[#allocation24_spill] sm:$0xff]  ;;  %v8430_v41 = vld [vmem:[#allocation113_spill] sm:$0xff]  ;;  %v4082_v14 = vld [vmem:[%s4321_s22 + $0x58] sm:$0xff] }
 0x3ba   : > { %v2171_v19 = vmul.f32 1.442695, %v8426_v27  ;;  %v2550_v52 = vpack.c.bf16 %v8428_v54, %v8427_v24  ;;  %v7133_v28 = vpop.eup %4035  ;;  %4045 = vpow2.f32 %v2203_v47  ;;  %2862 = vmatpush.bf16.msra.mxu1 %v2613_v29  ;;  %v2614_v37 = vpack.c.bf16 %v8430_v41, %v8429_v63  ;;  %v4083_v21 = vld [vmem:[%s4321_s22 + $0x90] sm:$0xff]  ;;  %v8437_v27 = vld [vmem:[#allocation76_spill] sm:$0xff]  ;;  %v8440_v63 = vld [vmem:[#allocation119_spill] sm:$0xff] }
 0x3bb   : > { %2843 = vmatpush.bf16.msra.mxu0 %v2549_v58  ;;  %v3040_v0 = vadd.f32 %v4082_v14, %v3008_v36  ;;  %v3047_v5 = vadd.f32 %v4083_v21, %v3015_v17  ;;  %v7139_v32 = vpop.eup %4037  ;;  %4047 = vpow2.f32 %v7009_v61  ;;  %v8431_v57 = vld [vmem:[#allocation26_spill] sm:$0xff]  ;;  %v2513_v47 = vadd.f32 %v7117_v51, %v2512_v25  ;;  %v8435_v36 = vld [vmem:[#allocation71_spill] sm:$0xff]  ;;  %v8438_v61 = vld [vmem:[#allocation41_spill] sm:$0xff] }
 0x3bc   : > { %v8432_v62 = vsub.f32 %v8431_v57, %v6711_v55  ;;  %4049 = vpow2.f32 %v7028_v35  ;;  %v8433_v58 = vld [vmem:[#allocation42_spill] sm:$0xff]  ;;  %2881 = vmatpush.bf16.msra.mxu2 %v2550_v52  ;;  %v8436_v17 = vld [vmem:[#allocation19_spill] sm:$0xff]  ;;  %v2605_v24 = vpack.c.bf16 %v8438_v61, %v8437_v27  ;;  %v7155_v54 = vpop.eup %4039  ;;  %v2813_v52 = vpop.f32.mrf.mxu2 }
 0x3bd   : > { %v8434_v44 = vsub.f32 %v8433_v58, %v6711_v55  ;;  %2900 = vmatpush.bf16.msra.mxu3 %v2614_v37  ;;  %3072 = vst [vmem:[%s6884_s9 + $0x58] sm:$0xff] %v3040_v0  ;;  %v2541_v45 = vpack.c.bf16 %v8436_v17, %v8435_v36  ;;  %4051 = vpow2.f32 %v2155_v20  ;;  %v2514_v25 = vadd.f32 %v7124_v34, %v2513_v47  ;;  %v8439_v35 = vld [vmem:[#allocation118_spill] sm:$0xff]  ;;  %v2832_v37 = vpop.f32.mrf.mxu3  ;;  %v7163_v14 = vpop.eup %4041  ;;  %v8441_v0 = vld [vmem:[#allocation11_spill] sm:$0xff] }
 0x3be   : > { %v2123_v60 = vmul.f32 1.442695, %v8432_v62  ;;  %3079 = vst [vmem:[%s6884_s9 + $0x90] sm:$0xff] %v3047_v5  ;;  %v2599_v41 = vpack.c.bf16 %v8440_v63, %v8439_v35  ;;  %v2663_v55 = vpack.c.bf16 %v6826_v39, %v6817_v22  ;;  %4053 = vpow2.f32 %v2171_v19  ;;  %2863 = vmatpush.bf16.msra.mxu1 %v2605_v24  ;;  %v8442_v21 = vld [vmem:[#allocation14_spill] sm:$0xff]  ;;  %v7169_v58 = vpop.eup %4043  ;;  %v2777_v19 = vpop.f32.mrf.mxu0  ;;  %v8447_v63 = vld [vmem:[#allocation8_spill] sm:$0xff] }
 0x3bf   : > { %v2139_v29 = vmul.f32 1.442695, %v8434_v44  ;;  %2844 = vmatpush.bf16.msra.mxu0 %v2541_v45  ;;  %v2542_v57 = vpack.c.bf16 %v8442_v21, %v8441_v0  ;;  %v8443_v20 = vld [vmem:[#allocation86_spill] sm:$0xff]  ;;  %v2833_v5 = vadd.f32 %v2832_v37, %v2813_v52  ;;  %v2515_v44 = vadd.f32 %v7155_v54, %v2514_v25  ;;  %v2796_v36 = vpop.f32.mrf.mxu1 }
 0x3c0   : > { %v8444_v62 = vld [vmem:[#allocation50_spill] sm:$0xff]  ;;  %v2600_v39 = vpack.c.bf16 %v7091_v42, %v7077_v6  ;;  %v2664_v22 = vpack.c.bf16 %v7139_v32, %v7133_v28  ;;  %v7176_v17 = vpop.eup %4045  ;;  %4055 = vpow2.f32 %v2123_v60  ;;  %v2797_v27 = vadd.f32 %v2796_v36, %v2777_v19  ;;  %v8445_v6 = vld [vmem:[#allocation116_spill] sm:$0xff]  ;;  %v8446_v42 = vld [vmem:[#allocation117_spill] sm:$0xff] }
 0x3c1   : > { %v2606_v47 = vpack.c.bf16 %v8444_v62, %v8443_v20  ;;  %2882 = vmatpush.bf16.msra.mxu2 %v2542_v57  ;;  %v3016_v45 = vmul.f32 %v8408_v2, %v2833_v5  ;;  %v7179_v61 = vpop.eup %4047  ;;  %v2516_v24 = vadd.f32 %v7163_v14, %v2515_v44  ;;  %v2591_v25 = vpack.c.bf16 %v8446_v42, %v8445_v6  ;;  %v8448_v60 = vld [vmem:[#allocation39_spill] sm:$0xff]  ;;  %v8449_v44 = vld [vmem:[#allocation82_spill] sm:$0xff]  ;;  %v8451_v42 = vld [vmem:[#allocation29_spill] sm:$0xff] }
 0x3c2   : > { %2932 = vmatpush.bf16.msrb.mxu1 %v2663_v55  ;;  %v4050_v35 = vpop.eup %4049  ;;  %4057 = vpow2.f32 %v2139_v29  ;;  %2845 = vmatmul.bf16.vlgmr.msra.gmra.mxu0 %v8447_v63  ;;  %v4084_v55 = vld [vmem:[%s4321_s22 + $0x98] sm:$0xff]  ;;  %v3023_v37 = vmul.f32 %v8389_v10, %v2797_v27  ;;  %v2592_v29 = vpack.c.bf16 %v7064_v13, %v7049_v53  ;;  %v2656_v57 = vpack.c.bf16 %v7176_v17, %v7169_v58 }
 0x3c3   : > { %2913 = vmatpush.bf16.msrb.mxu0 %v2599_v41  ;;  %2901 = vmatpush.bf16.msra.mxu3 %v2606_v47  ;;  %v2655_v41 = vpack.c.bf16 %v8385_v49, %v6800_v48  ;;  %v3048_v52 = vadd.f32 %v4084_v55, %v3016_v45  ;;  %v4052_v0 = vpop.eup %4051  ;;  %v2517_v21 = vadd.f32 %v7179_v61, %v2516_v24  ;;  %v4085_v48 = vld [vmem:[%s4321_s22 + $0xd0] sm:$0xff] }
 0x3c4   : > { %2864 = vmatmul.bf16.vlgmr.msra.gmra.mxu1 %v8448_v60  ;;  %2883 = vmatmul.bf16.vlgmr.msra.gmra.mxu2 %v8447_v63  ;;  %v4054_v20 = vpop.eup %4053  ;;  %v3055_v49 = vadd.f32 %v4085_v48, %v3023_v37  ;;  %v2815_v62 = vpop.f32.mrf.mxu2  ;;  %v2647_v13 = vpack.c.bf16 %v8373_v1, %v6787_v40  ;;  %v2584_v36 = vpack.c.bf16 %v7033_v12, %v7015_v33  ;;  %v4086_v1 = vld [vmem:[%s4321_s22 + $0xd8] sm:$0xff] }
 0x3c5   : > { %2951 = vmatpush.bf16.msrb.mxu2 %v2600_v39  ;;  %3080 = vst [vmem:[%s6884_s9 + $0x98] sm:$0xff] %v3048_v52  ;;  %v2518_v10 = vadd.f32 %v4050_v35, %v2517_v21  ;;  %v2834_v47 = vpop.f32.mrf.mxu3  ;;  %v8450_v39 = vld [vmem:[#allocation75_spill] sm:$0xff]  ;;  %v2648_v45 = vpack.c.bf16 %v4054_v20, %v4052_v0  ;;  %v2639_v40 = vpack.c.bf16 %v6779_v7, %v6772_v23  ;;  %v8454_v21 = vld [vmem:[#allocation62_spill] sm:$0xff] }
 0x3c6   : > { %2902 = vmatmul.bf16.vlgmr.msra.gmra.mxu3 %v8448_v60  ;;  %2933 = vmatpush.bf16.msrb.mxu1 %v2655_v41  ;;  %v4056_v5 = vpop.eup %4055  ;;  %3087 = vst [vmem:[%s6884_s9 + $0xd0] sm:$0xff] %v3055_v49  ;;  %v2583_v53 = vpack.c.bf16 %v8450_v39, %v8449_v44  ;;  %v2576_v33 = vpack.c.bf16 %v6992_v59, %v6976_v8  ;;  %v8453_v37 = vld [vmem:[#allocation91_spill] sm:$0xff] }
 0x3c7   : > { %2970 = vmatpush.bf16.msrb.mxu3 %v2664_v22  ;;  %2914 = vmatpush.bf16.msrb.mxu0 %v2591_v25  ;;  %v2835_v22 = vadd.f32 %v2834_v47, %v2815_v62  ;;  %v2519_v19 = vadd.f32 %v4056_v5, %v2518_v10  ;;  %v8452_v25 = vld [vmem:[#allocation30_spill] sm:$0xff]  ;;  %v2568_v7 = vpack.c.bf16 %v6960_v38, %v6938_v26  ;;  %v8457_v48 = vld [vmem:[#allocation67_spill] sm:$0xff] }
 0x3c8   : > { %v4058_v27 = vpop.eup %4057  ;;  %v2575_v41 = vpack.c.bf16 %v8452_v25, %v8451_v42  ;;  %v2632_v8 = vpack.c.bf16 %v4050_v35, %v7179_v61  ;;  %v8458_v49 = vld [vmem:[#allocation87_spill] sm:$0xff]  ;;  %v2560_v38 = vpack.c.bf16 %v6916_v56, %v6899_v3  ;;  %v8462_v35 = vld [vmem:[#allocation38_spill] sm:$0xff]  ;;  %v2552_v62 = vpack.c.bf16 %v6880_v50, %v6867_v43  ;;  %v8468_v50 = vld [vmem:[#allocation121_spill] sm:$0xff] }
 0x3c9   : > { %2952 = vmatpush.bf16.msrb.mxu2 %v2592_v29  ;;  %v3024_v24 = vmul.f32 %v8408_v2, %v2835_v22  ;;  %v2520_v6 = vadd.f32 %v4058_v27, %v2519_v19  ;;  %v2640_v12 = vpack.c.bf16 %v4058_v27, %v4056_v5  ;;  %v2567_v29 = vpack.c.bf16 %v8454_v21, %v8453_v37  ;;  %v8461_v61 = vld [vmem:[#allocation123_spill] sm:$0xff]  ;;  %v8463_v56 = vld [vmem:[#allocation90_spill] sm:$0xff]  ;;  %v4087_v25 = vld [vmem:[%s4321_s22 + $0x20] sm:$0xff] }
 0x3ca   : > { %2934 = vmatpush.bf16.msrb.mxu1 %v2647_v13  ;;  %v2615_v10 = vpack.c.bf16 %v8462_v35, %v8461_v61  ;;  %v2616_v3 = vpack.c.bf16 %v7124_v34, %v7117_v51  ;;  %v8466_v47 = vld [vmem:[#allocation122_spill] sm:$0xff]  ;;  %v2544_v44 = vpack.c.bf16 %v6845_v11, %v6832_v31  ;;  %v2608_v39 = vpack.c.bf16 %v7107_v30, %v7098_v46  ;;  %v4090_v61 = vld [vmem:[%s4321_s22 + $0x68] sm:$0xff] }
 0x3cb   : > { %2971 = vmatpush.bf16.msrb.mxu3 %v2656_v57  ;;  %2915 = vmatpush.bf16.msrb.mxu0 %v2583_v53  ;;  %v3056_v55 = vadd.f32 %v4086_v1, %v3024_v24  ;;  %v2521_v52 = vadd.f32 %v4052_v0, %v2520_v6  ;;  %v2631_v57 = vpack.c.bf16 %v6762_v18, %v6753_v16  ;;  %v8455_v0 = vld [vmem:[#allocation94_spill] sm:$0xff]  ;;  %v2453_v46 = vrot.slane %v8468_v50, 4 }
 0x3cc   : > { %v2559_v16 = vpack.c.bf16 %v8458_v49, %v8457_v48  ;;  %v2623_v18 = vpack.c.bf16 %v6743_v4, %v6740_v9  ;;  %v8459_v9 = vld [vmem:[#allocation72_spill] sm:$0xff]  ;;  %v8467_v43 = vld [vmem:[#allocation66_spill] sm:$0xff]  ;;  %v2490_v42 = vrot.slane %v7057_v15, 4 }
 0x3cd   : > { %2953 = vmatpush.bf16.msrb.mxu2 %v2584_v36  ;;  %3088 = vst [vmem:[%s6884_s9 + $0xd8] sm:$0xff] %v3056_v55  ;;  %v2522_v2 = vadd.f32 %v4054_v20, %v2521_v52  ;;  %v8456_v20 = vld [vmem:[#allocation64_spill] sm:$0xff]  ;;  %v2416_v11 = vrot.slane %v8467_v43, 4  ;;  %v2454_v51 = vadd.f32 %v2453_v46, %v8468_v50 }
 0x3ce   : > { %2935 = vmatpush.bf16.msrb.mxu1 %v2639_v40  ;;  %v8460_v4 = vld [vmem:[#allocation40_spill] sm:$0xff]  ;;  %v2491_v55 = vadd.f32 %v2490_v42, %v7057_v15 }
 0x3cf   : > { %2972 = vmatpush.bf16.msrb.mxu3 %v2648_v45  ;;  %2916 = vmatpush.bf16.msrb.mxu0 %v2575_v41  ;;  %v2523_v23 = vadd.f32 %v7169_v58, %v2522_v2  ;;  %v2624_v58 = vpack.c.bf16 %v7163_v14, %v7155_v54  ;;  %v8465_v14 = vld [vmem:[#allocation120_spill] sm:$0xff]  ;;  %v2417_v31 = vadd.f32 %v2416_v11, %v8467_v43  ;;  %v4092_v11 = vld [vmem:[%s4321_s22 + $0xa8] sm:$0xff] }
 0x3d0   : > { %v2607_v5 = vpack.c.bf16 %v8466_v47, %v8465_v14  ;;  %v4093_v50 = vld [vmem:[%s4321_s22 + $0xe0] sm:$0xff] }
 0x3d1   : > { %2954 = vmatpush.bf16.msrb.mxu2 %v2576_v33  ;;  %v2524_v59 = vadd.f32 %v7176_v17, %v2523_v23  ;;  %v2418_v30 = vrot.slane %v2417_v31, 2  ;;  %v2492_v23 = vrot.slane %v2491_v55, 2 }
 0x3d2   : > { %2936 = vmatpush.bf16.msrb.mxu1 %v2631_v57  ;;  %2850 = vmatmul.bf16.gmra.mxu0 %v8455_v0 }
 0x3d3   : > { %2973 = vmatpush.bf16.msrb.mxu3 %v2640_v12  ;;  %2917 = vmatpush.bf16.msrb.mxu0 %v2567_v29  ;;  %v2525_v26 = vadd.f32 %v7133_v28, %v2524_v59  ;;  %v2551_v28 = vpack.c.bf16 %v8460_v4, %v8459_v9  ;;  %v2419_v34 = vadd.f32 %v2418_v30, %v2417_v31  ;;  %v4089_v59 = vld [vmem:[%s4321_s22 + $0x60] sm:$0xff] }
 0x3d4   : > { %2869 = vmatmul.bf16.gmra.mxu1 %v8456_v20  ;;  %2888 = vmatmul.bf16.gmra.mxu2 %v8455_v0  ;;  %v2493_v49 = vadd.f32 %v2492_v23, %v2491_v55 }
 0x3d5   : > { %2955 = vmatpush.bf16.msrb.mxu2 %v2568_v7  ;;  %v7238_v17 = vadd.f32 %v7139_v32, %v2525_v26  ;;  %v8464_v32 = vld [vmem:[#allocation84_spill] sm:$0xff]  ;;  %v4088_v7 = vld [vmem:[%s4321_s22 + $0x28] sm:$0xff] }
 0x3d6   : > { %2907 = vmatmul.bf16.gmra.mxu3 %v8456_v20  ;;  %2937 = vmatpush.bf16.msrb.mxu1 %v2623_v18  ;;  %v2543_v54 = vpack.c.bf16 %v8464_v32, %v8463_v56 }
 0x3d7   : > { %2974 = vmatpush.bf16.msrb.mxu3 %v2632_v8  ;;  %2918 = vmatpush.bf16.msrb.mxu0 %v2559_v16  ;;  %v2527_v29 = vrot.slane %v7238_v17, 4 }
 0x3d9   : > { %2956 = vmatpush.bf16.msrb.mxu2 %v2560_v38  ;;  %v2528_v15 = vadd.f32 %v2527_v29, %v7238_v17 }
 0x3da   : > { %2938 = vmatpush.bf16.msrb.mxu1 %v2615_v10  ;;  %v4091_v10 = vld [vmem:[%s4321_s22 + $0xa0] sm:$0xff] }
 0x3db   : > { %2975 = vmatpush.bf16.msrb.mxu3 %v2624_v58  ;;  %2919 = vmatpush.bf16.msrb.mxu0 %v2551_v28  ;;  %v2529_v9 = vrot.slane %v2528_v15, 2  ;;  %v2494_v28 = vrot.slane %v2493_v49, 1 }
 0x3dd   : > { %2957 = vmatpush.bf16.msrb.mxu2 %v2552_v62  ;;  %v2530_v17 = vadd.f32 %v2529_v9, %v2528_v15  ;;  %v2495_v32 = vadd.f32 %v2494_v28, %v2493_v49 }
 0x3de   : > { %2939 = vmatpush.bf16.msrb.mxu1 %v2607_v5 }
 0x3df   : > { %2976 = vmatpush.bf16.msrb.mxu3 %v2616_v3  ;;  %2920 = vmatpush.bf16.msrb.mxu0 %v2543_v54 }
 0x3e1   : > { %2958 = vmatpush.bf16.msrb.mxu2 %v2544_v44 }
 0x3e2   : > { %2921 = vmatmul.bf16.vlgmr.msrb.gmra.mxu0 %v8447_v63 }
 0x3e3   : > { %2977 = vmatpush.bf16.msrb.mxu3 %v2608_v39  ;;  %v2531_v39 = vrot.slane %v2530_v17, 1 }
 0x3e4   : > { %2940 = vmatmul.bf16.vlgmr.msrb.gmra.mxu1 %v8448_v60  ;;  %2959 = vmatmul.bf16.vlgmr.msrb.gmra.mxu2 %v8447_v63  ;;  %v2455_v63 = vrot.slane %v2454_v51, 2 }
 0x3e5   : > { %v2532_v30 = vadd.f32 %v2531_v39, %v2530_v17  ;;  %v4101_v17 = vld [vmem:[%s4321_s22 + $0xf0] sm:$0xff] }
 0x3e6   : > { %2978 = vmatmul.bf16.vlgmr.msrb.gmra.mxu3 %v8448_v60  ;;  %v2420_v60 = vrot.slane %v2419_v34, 1  ;;  %v2456_v53 = vadd.f32 %v2455_v63, %v2454_v51 }
 0x3e8   : > { %v2421_v13 = vadd.f32 %v2420_v60, %v2419_v34  ;;  %v2457_v22 = vrot.slane %v2456_v53, 1 }
 0x3ea   : > { %4059 = vrcp.f32 %v2421_v13  ;;  %v2458_v19 = vadd.f32 %v2457_v22, %v2456_v53 }
 0x3ec   : > { %4061 = vrcp.f32 %v2458_v19 }
 0x3ed   : > { %4063 = vrcp.f32 %v2495_v32 }
 0x3ee   : > { %4065 = vrcp.f32 %v2532_v30 }
 0x3f0   : > { %v4060_v24 = vpop.eup %4059 }
 0x3f2   : > { %2926 = vmatmul.bf16.gmra.mxu0 %v8455_v0  ;;  %v4062_v2 = vpop.eup %4061 }
 0x3f3   : > { %v4064_v22 = vpop.eup %4063 }
 0x3f4   : > { %2945 = vmatmul.bf16.gmra.mxu1 %v8456_v20  ;;  %2964 = vmatmul.bf16.gmra.mxu2 %v8455_v0  ;;  %v4066_v55 = vpop.eup %4065 }
 0x3f6   : > { %2983 = vmatmul.bf16.gmra.mxu3 %v8456_v20 }
 0x43f   : > { %v2846_v36 = vpop.f32.mrf.mxu0 }
 0x441   : > { %v2865_v45 = vpop.f32.mrf.mxu1 }
 0x442   : > { %v2866_v27 = vadd.f32 %v2865_v45, %v2846_v36  ;;  %v4094_v45 = vld [vmem:[%s4321_s22 + $0xe8] sm:$0xff] }
 0x444   : > { %v3001_v6 = vmul.f32 %v4060_v24, %v2866_v27 }
 0x446   : > { %v3033_v41 = vadd.f32 %v4087_v25, %v3001_v6 }
 0x447   : > { %v2884_v40 = vpop.f32.mrf.mxu2  ;;  %v2848_v33 = vpop.f32.mrf.mxu0 }
 0x448   : > { %3065 = vst [vmem:[%s6884_s9 + $0x20] sm:$0xff] %v3033_v41 }
 0x449   : > { %v2903_v1 = vpop.f32.mrf.mxu3  ;;  %v2867_v12 = vpop.f32.mrf.mxu1 }
 0x44a   : > { %v2904_v52 = vadd.f32 %v2903_v1, %v2884_v40  ;;  %v2868_v37 = vadd.f32 %v2867_v12, %v2848_v33 }
 0x44c   : > { %v3002_v21 = vmul.f32 %v4062_v2, %v2904_v52  ;;  %v3009_v57 = vmul.f32 %v4060_v24, %v2868_v37 }
 0x44e   : > { %v3034_v8 = vadd.f32 %v4088_v7, %v3002_v21  ;;  %v3041_v0 = vadd.f32 %v4089_v59, %v3009_v57  ;;  %v4097_v21 = vld [vmem:[%s4321_s22 + $0x70] sm:$0xff] }
 0x44f   : > { %v2886_v20 = vpop.f32.mrf.mxu2  ;;  %v2851_v18 = vpop.f32.mrf.mxu0 }
 0x450   : > { %3066 = vst [vmem:[%s6884_s9 + $0x28] sm:$0xff] %v3034_v8 }
 0x451   : > { %3073 = vst [vmem:[%s6884_s9 + $0x60] sm:$0xff] %v3041_v0  ;;  %v2905_v48 = vpop.f32.mrf.mxu3  ;;  %v2870_v26 = vpop.f32.mrf.mxu1 }
 0x452   : > { %v2906_v16 = vadd.f32 %v2905_v48, %v2886_v20  ;;  %v2871_v38 = vadd.f32 %v2870_v26, %v2851_v18  ;;  %v4098_v48 = vld [vmem:[%s4321_s22 + $0x78] sm:$0xff] }
 0x454   : > { %v3010_v58 = vmul.f32 %v4062_v2, %v2906_v16  ;;  %v3017_v4 = vmul.f32 %v4060_v24, %v2871_v38  ;;  %v4099_v16 = vld [vmem:[%s4321_s22 + $0xb0] sm:$0xff] }
 0x456   : > { %v3042_v35 = vadd.f32 %v4090_v61, %v3010_v58  ;;  %v3049_v62 = vadd.f32 %v4091_v10, %v3017_v4  ;;  %v4100_v10 = vld [vmem:[%s4321_s22 + $0xb8] sm:$0xff] }
 0x457   : > { %v2889_v3 = vpop.f32.mrf.mxu2  ;;  %v2853_v14 = vpop.f32.mrf.mxu0 }
 0x458   : > { %3074 = vst [vmem:[%s6884_s9 + $0x68] sm:$0xff] %v3042_v35 }
 0x459   : > { %3081 = vst [vmem:[%s6884_s9 + $0xa0] sm:$0xff] %v3049_v62  ;;  %v2908_v56 = vpop.f32.mrf.mxu3  ;;  %v2872_v47 = vpop.f32.mrf.mxu1 }
 0x45a   : > { %v2909_v54 = vadd.f32 %v2908_v56, %v2889_v3  ;;  %v2873_v5 = vadd.f32 %v2872_v47, %v2853_v14  ;;  %v4102_v47 = vld [vmem:[%s4321_s22 + $0xf8] sm:$0xff] }
 0x45c   : > { %v3018_v44 = vmul.f32 %v4062_v2, %v2909_v54  ;;  %v3025_v43 = vmul.f32 %v4060_v24, %v2873_v5  ;;  %v4095_v24 = vld [vmem:[%s4321_s22 + $0x30] sm:$0xff] }
 0x45e   : > { %v3050_v31 = vadd.f32 %v4092_v11, %v3018_v44  ;;  %v3057_v46 = vadd.f32 %v4093_v50, %v3025_v43 }
 0x45f   : > { %v2891_v51 = vpop.f32.mrf.mxu2  ;;  %v2922_v60 = vpop.f32.mrf.mxu0 }
 0x460   : > { %3082 = vst [vmem:[%s6884_s9 + $0xa8] sm:$0xff] %v3050_v31 }
 0x461   : > { %3089 = vst [vmem:[%s6884_s9 + $0xe0] sm:$0xff] %v3057_v46  ;;  %v2910_v34 = vpop.f32.mrf.mxu3  ;;  %v2941_v53 = vpop.f32.mrf.mxu1 }
 0x462   : > { %v2911_v63 = vadd.f32 %v2910_v34, %v2891_v51  ;;  %v2942_v13 = vadd.f32 %v2941_v53, %v2922_v60 }
 0x464   : > { %v3026_v19 = vmul.f32 %v4062_v2, %v2911_v63  ;;  %v3003_v36 = vmul.f32 %v4064_v22, %v2942_v13  ;;  %v4096_v2 = vld [vmem:[%s4321_s22 + $0x38] sm:$0xff] }
 0x466   : > { %v3058_v27 = vadd.f32 %v4094_v45, %v3026_v19  ;;  %v3035_v6 = vadd.f32 %v4095_v24, %v3003_v36 }
 0x467   : > { %v2960_v42 = vpop.f32.mrf.mxu2  ;;  %v2924_v40 = vpop.f32.mrf.mxu0 }
 0x468   : > { %3090 = vst [vmem:[%s6884_s9 + $0xe8] sm:$0xff] %v3058_v27 }
 0x469   : > { %3067 = vst [vmem:[%s6884_s9 + $0x30] sm:$0xff] %v3035_v6  ;;  %v2979_v25 = vpop.f32.mrf.mxu3  ;;  %v2943_v1 = vpop.f32.mrf.mxu1 }
 0x46a   : > { %v2980_v41 = vadd.f32 %v2979_v25, %v2960_v42  ;;  %v2944_v52 = vadd.f32 %v2943_v1, %v2924_v40 }
 0x46c   : > { %v3004_v33 = vmul.f32 %v4066_v55, %v2980_v41  ;;  %v3011_v12 = vmul.f32 %v4064_v22, %v2944_v52 }
 0x46e   : > { %v3036_v37 = vadd.f32 %v4096_v2, %v3004_v33  ;;  %v3043_v29 = vadd.f32 %v4097_v21, %v3011_v12 }
 0x46f   : > { %v2962_v57 = vpop.f32.mrf.mxu2  ;;  %v2927_v8 = vpop.f32.mrf.mxu0 }
 0x470   : > { %3068 = vst [vmem:[%s6884_s9 + $0x38] sm:$0xff] %v3036_v37 }
 0x471   : > { %3075 = vst [vmem:[%s6884_s9 + $0x70] sm:$0xff] %v3043_v29  ;;  %v2981_v23 = vpop.f32.mrf.mxu3  ;;  %v2946_v59 = vpop.f32.mrf.mxu1 }
 0x472   : > { %v2982_v7 = vadd.f32 %v2981_v23, %v2962_v57  ;;  %v2947_v0 = vadd.f32 %v2946_v59, %v2927_v8 }
 0x474   : > { %v3012_v15 = vmul.f32 %v4066_v55, %v2982_v7  ;;  %v3019_v20 = vmul.f32 %v4064_v22, %v2947_v0 }
 0x476   : > { %v3044_v49 = vadd.f32 %v4098_v48, %v3012_v15  ;;  %v3051_v18 = vadd.f32 %v4099_v16, %v3019_v20 }
 0x477   : > { %v2965_v26 = vpop.f32.mrf.mxu2  ;;  %v2929_v9 = vpop.f32.mrf.mxu0 }
 0x478   : > { %3076 = vst [vmem:[%s6884_s9 + $0x78] sm:$0xff] %v3044_v49 }
 0x479   : > { %3083 = vst [vmem:[%s6884_s9 + $0xb0] sm:$0xff] %v3051_v18  ;;  %v2984_v38 = vpop.f32.mrf.mxu3  ;;  %v2948_v4 = vpop.f32.mrf.mxu1 }
 0x47a   : > { %v2985_v58 = vadd.f32 %v2984_v38, %v2965_v26  ;;  %v2949_v28 = vadd.f32 %v2948_v4, %v2929_v9 }
 0x47c   : > { %v3020_v61 = vmul.f32 %v4066_v55, %v2985_v58  ;;  %v3027_v35 = vmul.f32 %v4064_v22, %v2949_v28 }
 0x47e   : > { %v3052_v62 = vadd.f32 %v4100_v10, %v3020_v61  ;;  %v3059_v3 = vadd.f32 %v4101_v17, %v3027_v35 }
 0x47f   : > { %v2967_v56 = vpop.f32.mrf.mxu2 }
 0x480   : > { %3084 = vst [vmem:[%s6884_s9 + $0xb8] sm:$0xff] %v3052_v62 }
 0x481   : > { %3091 = vst [vmem:[%s6884_s9 + $0xf0] sm:$0xff] %v3059_v3  ;;  %v2986_v32 = vpop.f32.mrf.mxu3 }
 0x482   : > { %v2987_v54 = vadd.f32 %v2986_v32, %v2967_v56 }
 0x484   : > { %v3028_v14 = vmul.f32 %v4066_v55, %v2987_v54 }
 0x486   : > { %v3060_v5 = vadd.f32 %v4102_v47, %v3028_v14 }
 0x488   : > { %3092 = vst [vmem:[%s6884_s9 + $0xf8] sm:$0xff] %v3060_v5 }
 0x489   : > { %4160 = shalt.err (!%p4157_p0)
}
 0x48a   : > { %s4219_s19 = smov 1024   ;;  %s4220_s22 = smov 64  }
 0x48b   : > { %3475 = dma.vmem_to_hbm [thread:$0]  (%p4292_p9), %s3109_s23, 4096, %s3111_s15, %s3094_s28, %s4219_s19, %s4219_s19, %s4220_s22  }
 0x48c PF: > { %s3125_s8 = sand.u32 1, %s4195_s12   ;;  %p3482_p1 = pnand %p3225_p12, %p4299_p11 }
 0x48d   : > { %s3126_s9 = scalar_lea.sflag [#allocation4], %s3125_s8 }
 0x48e   : > { %p3483_p2 = pneg %p3482_p1 }
 0x490   : > { %4190 = dma.done.wait (%p3483_p2), %s3126_s9, 4096  }
 0x491   : > { %4192 = vsyncadd (%p3483_p2), %s3126_s9, 4294963200  ;;  %s19_s17 = sadd.s32 1, %s4215_s17   ;;  %s8469_s12 = smov %s4199_s13 }
 0x492   : > { %p16_p3 = scmp.ge.s32.totalorder %s19_s17, 4   ;;  %s8470_s13 = smov %s4203_s14 }
 0x493   : > { %s8471_s14 = smov %s4297_s26  ;;  %s8472_s15 = smov %s4211_s16 }
 0x494   : > { %s8473_s16 = smov %s8475_s20  ;;  %18 = sbr.rel (!%p16_p3) target bundleno = 6 (0x6), region = 83 }
 0x499   :  { %3132 = vsyncpa [#allocation3], 1 }
 0x49a   :  { %3134 = vsyncpa [#allocation3 + $0x1], 1 }
 0x49b   :  { %3135 = vsyncpa [#allocation4], 1 }
 0x49c   :  { %3137 = vsyncpa [#allocation4 + $0x1], 1 }

</bundles_post_ra>
